<compile_context>
chip_gen: v5e
topology: v5e:2x2
jax: 0.10.0
libtpu: 0.0.40
codegen_flags: <defaults>
</compile_context>

<pallas_src>
import functools

import numpy as np
import jax
import jax.numpy as jnp
from jax.experimental import pallas as pl
from jax.experimental.pallas import tpu as pltpu


ACT_DTYPE = jnp.bfloat16           # activation / MXU-operand dtype
VMEM_LIMIT = 32 * 1024 * 1024      # safe on v5e/v6e/v7x scoped VMEM at this size
NEG_INF = -1e9                     # cross-window attention mask value
PATCH_K_PAD = 128                  # pad patch-embed contraction K (48 -> 128)


# ----------------------------------------------------------------------------
# small helpers
# ----------------------------------------------------------------------------

def _gelu(x):
    # TODO(synk): torch nn.GELU uses exact erf; tanh approximation kept for
    # guaranteed Mosaic lowering (max abs diff ~1e-3).
    return 0.5 * x * (1.0 + jnp.tanh(
        0.7978845608028654 * (x + 0.044715 * x * x * x)))


def _ln(x, g, b, eps):
    m = jnp.mean(x, axis=-1, keepdims=True)
    c = x - m
    v = jnp.mean(c * c, axis=-1, keepdims=True)
    return c * jax.lax.rsqrt(v + eps) * g + b


def _rows_tile(m, align=16):
    """Row tile: multiple of 16 (bf16 packing) and >=2 grid steps when
    possible so both v7x TensorCores get work."""
    if m >= 2 * align and m % (2 * align) == 0:
        return m // 2
    return m


# ----------------------------------------------------------------------------
# Pallas kernels
# ----------------------------------------------------------------------------

def _patch_embed_kernel(x_ref, w_ref, b_ref, g_ref, bt_ref, o_ref, *, eps):
    """Patch-embed matmul + bias with LayerNorm fused as the epilogue."""
    acc = jnp.dot(x_ref[...], w_ref[...],
                  preferred_element_type=jnp.float32) + b_ref[...]
    o_ref[...] = _ln(acc, g_ref[...], bt_ref[...], eps).astype(o_ref.dtype)


def _swin_block_kernel(x_ref, g1_ref, b1_ref, qkvw_ref, qkvb_ref, bias_ref,
                       projw_ref, projb_ref, g2_ref, b2_ref,
                       fc1w_ref, fc1b_ref, fc2w_ref, fc2b_ref, o_ref,
                       *, num_heads, scale, eps):
    """One full Swin transformer block on one image's tokens (L, C).

    bias_ref packs rel-pos bias + shift mask + window structure in raster
    token order (cross-window pairs = -1e9), so no roll / window partition /
    reverse is needed and the score matmuls run at full (L, L) width.
    """
    x = x_ref[0].astype(jnp.float32)                        # (L, C)
    C = x.shape[-1]
    Dh = C // num_heads

    # ---- attention: LN1 -> qkv -> masked attention -> proj (+residual) -----
    y = _ln(x, g1_ref[...], b1_ref[...], eps)
    qkv = jnp.dot(y.astype(qkvw_ref.dtype), qkvw_ref[...],
                  preferred_element_type=jnp.float32) + qkvb_ref[...]
    q = qkv[:, :C] * scale
    k = qkv[:, C:2 * C]
    v = qkv[:, 2 * C:]
    pw = projw_ref[...]                                     # (C, C) bf16

    attn = x + projb_ref[...]                               # residual + proj bias
    for h in range(num_heads):
        sl = slice(h * Dh, (h + 1) * Dh)
        qh = q[:, sl].astype(jnp.bfloat16)
        kh = k[:, sl].astype(jnp.bfloat16)
        vh = v[:, sl].astype(jnp.bfloat16)
        s = jnp.einsum("td,sd->ts", qh, kh,
                       preferred_element_type=jnp.float32)  # (L, L)
        s = s + bias_ref[h]
        s = s - jnp.max(s, axis=-1, keepdims=True)
        p = jnp.exp(s)
        p = p / jnp.sum(p, axis=-1, keepdims=True)          # exact softmax
        oh = jnp.dot(p.astype(jnp.bfloat16), vh,
                     preferred_element_type=jnp.float32)    # (L, Dh)
        # proj fused per head: no concat of heads, accumulate straight into C
        attn = attn + jnp.dot(oh.astype(jnp.bfloat16), pw[sl, :],
                              preferred_element_type=jnp.float32)

    # ---- MLP: LN2 -> fc1 -> GELU -> fc2 (+residual) -------------------------
    y2 = _ln(attn, g2_ref[...], b2_ref[...], eps)
    h1 = jnp.dot(y2.astype(fc1w_ref.dtype), fc1w_ref[...],
                 preferred_element_type=jnp.float32) + fc1b_ref[...]
    h1 = _gelu(h1)
    out = attn + jnp.dot(h1.astype(fc2w_ref.dtype), fc2w_ref[...],
                         preferred_element_type=jnp.float32) + fc2b_ref[...]
    o_ref[0] = out.astype(o_ref.dtype)


def _ln_linear_kernel(x_ref, g_ref, bt_ref, w_ref, b_ref, o_ref, *, eps):
    """Fused row-LayerNorm prologue + matmul (patch-merging reduction)."""
    y = _ln(x_ref[...].astype(jnp.float32), g_ref[...], bt_ref[...], eps)
    acc = jnp.dot(y.astype(w_ref.dtype), w_ref[...],
                  preferred_element_type=jnp.float32) + b_ref[...]
    o_ref[...] = acc.astype(o_ref.dtype)


def _head_kernel(x_ref, g_ref, bt_ref, w_ref, b_ref, o_ref, *, eps):
    """Final LayerNorm + token mean-pool + classifier head, all fused."""
    x = x_ref[...].astype(jnp.float32)                      # (B, L, C)
    y = _ln(x, g_ref[...], bt_ref[...], eps)
    pooled = jnp.mean(y, axis=1)                            # (B, C)
    o_ref[...] = jnp.dot(pooled.astype(w_ref.dtype), w_ref[...],
                         preferred_element_type=jnp.float32) + b_ref[...]


# ----------------------------------------------------------------------------
# Pallas wrappers
# ----------------------------------------------------------------------------

def patch_embed(xp, w, b, g, beta, eps=1e-5):
    M, K = xp.shape
    N = w.shape[1]
    tm = _rows_tile(M)
    return pl.pallas_call(
        functools.partial(_patch_embed_kernel, eps=eps),
        out_shape=jax.ShapeDtypeStruct((M, N), ACT_DTYPE),
        grid=(M // tm,),
        in_specs=[pl.BlockSpec((tm, K), lambda i: (i, 0)),
                  pl.BlockSpec((K, N), lambda i: (0, 0)),
                  pl.BlockSpec((1, N), lambda i: (0, 0)),
                  pl.BlockSpec((1, N), lambda i: (0, 0)),
                  pl.BlockSpec((1, N), lambda i: (0, 0))],
        out_specs=pl.BlockSpec((tm, N), lambda i: (i, 0)),
        compiler_params=pltpu.CompilerParams(
            dimension_semantics=("parallel",), vmem_limit_bytes=VMEM_LIMIT),
    )(xp, w, b.reshape(1, N).astype(jnp.float32),
      g.reshape(1, N).astype(jnp.float32),
      beta.reshape(1, N).astype(jnp.float32))


def swin_block(x, p, num_heads, eps=1e-5):
    """x: (B, L, C) -> (B, L, C); one pallas_call, one image per grid step."""
    B, L, C = x.shape
    scale = (C // num_heads) ** -0.5
    Ch = p["fc1_w"].shape[1]

    def vec(a):
        return a.reshape(1, -1).astype(jnp.float32)

    in_specs = [
        pl.BlockSpec((1, L, C), lambda b: (b, 0, 0)),             # x
        pl.BlockSpec((1, C), lambda b: (0, 0)),                   # norm1 gamma
        pl.BlockSpec((1, C), lambda b: (0, 0)),                   # norm1 beta
        pl.BlockSpec((C, 3 * C), lambda b: (0, 0)),               # qkv_w
        pl.BlockSpec((1, 3 * C), lambda b: (0, 0)),               # qkv_b
        pl.BlockSpec((num_heads, L, L), lambda b: (0, 0, 0)),     # packed bias
        pl.BlockSpec((C, C), lambda b: (0, 0)),                   # proj_w
        pl.BlockSpec((1, C), lambda b: (0, 0)),                   # proj_b
        pl.BlockSpec((1, C), lambda b: (0, 0)),                   # norm2 gamma
        pl.BlockSpec((1, C), lambda b: (0, 0)),                   # norm2 beta
        pl.BlockSpec((C, Ch), lambda b: (0, 0)),                  # fc1_w
        pl.BlockSpec((1, Ch), lambda b: (0, 0)),                  # fc1_b
        pl.BlockSpec((Ch, C), lambda b: (0, 0)),                  # fc2_w
        pl.BlockSpec((1, C), lambda b: (0, 0)),                   # fc2_b
    ]
    return pl.pallas_call(
        functools.partial(_swin_block_kernel, num_heads=num_heads,
                          scale=scale, eps=eps),
        out_shape=jax.ShapeDtypeStruct((B, L, C), x.dtype),
        grid=(B,),
        in_specs=in_specs,
        out_specs=pl.BlockSpec((1, L, C), lambda b: (b, 0, 0)),
        compiler_params=pltpu.CompilerParams(
            dimension_semantics=("parallel",), vmem_limit_bytes=VMEM_LIMIT),
    )(x, vec(p["norm1_g"]), vec(p["norm1_b"]), p["qkv_w"], vec(p["qkv_b"]),
      p["attn_bias"], p["proj_w"], vec(p["proj_b"]),
      vec(p["norm2_g"]), vec(p["norm2_b"]), p["fc1_w"], vec(p["fc1_b"]),
      p["fc2_w"], vec(p["fc2_b"]))


def ln_linear(x, g, b, w, bias, eps=1e-5):
    M, K = x.shape
    N = w.shape[1]
    tm = _rows_tile(M)
    return pl.pallas_call(
        functools.partial(_ln_linear_kernel, eps=eps),
        out_shape=jax.ShapeDtypeStruct((M, N), x.dtype),
        grid=(M // tm,),
        in_specs=[pl.BlockSpec((tm, K), lambda i: (i, 0)),
                  pl.BlockSpec((1, K), lambda i: (0, 0)),
                  pl.BlockSpec((1, K), lambda i: (0, 0)),
                  pl.BlockSpec((K, N), lambda i: (0, 0)),
                  pl.BlockSpec((1, N), lambda i: (0, 0))],
        out_specs=pl.BlockSpec((tm, N), lambda i: (i, 0)),
        compiler_params=pltpu.CompilerParams(
            dimension_semantics=("parallel",), vmem_limit_bytes=VMEM_LIMIT),
    )(x, g.reshape(1, K).astype(jnp.float32),
      b.reshape(1, K).astype(jnp.float32),
      w, bias.reshape(1, N).astype(jnp.float32))


def head_forward(x, g, b, w, hb, eps=1e-5):
    B, L, C = x.shape
    N = w.shape[1]
    return pl.pallas_call(
        functools.partial(_head_kernel, eps=eps),
        out_shape=jax.ShapeDtypeStruct((B, N), jnp.float32),
        grid=(1,),
        in_specs=[pl.BlockSpec((B, L, C), lambda i: (0, 0, 0)),
                  pl.BlockSpec((1, C), lambda i: (0, 0)),
                  pl.BlockSpec((1, C), lambda i: (0, 0)),
                  pl.BlockSpec((C, N), lambda i: (0, 0)),
                  pl.BlockSpec((1, N), lambda i: (0, 0))],
        out_specs=pl.BlockSpec((B, N), lambda i: (0, 0)),
        compiler_params=pltpu.CompilerParams(
            dimension_semantics=("arbitrary",), vmem_limit_bytes=VMEM_LIMIT),
    )(x, g.reshape(1, C).astype(jnp.float32),
      b.reshape(1, C).astype(jnp.float32),
      w, hb.reshape(1, N).astype(jnp.float32))


# ----------------------------------------------------------------------------
# static (init-time) window / mask machinery — numpy, built once
# ----------------------------------------------------------------------------

def _window_partition_np(x, ws):
    B, H, W, C = x.shape
    x = x.reshape(B, H // ws, ws, W // ws, ws, C)
    return x.transpose(0, 1, 3, 2, 4, 5).reshape(-1, ws, ws, C)


def relative_position_index(ws):
    coords = np.stack(np.meshgrid(np.arange(ws), np.arange(ws), indexing="ij"))
    cf = coords.reshape(2, -1)
    rel = (cf[:, :, None] - cf[:, None, :]).transpose(1, 2, 0).astype(np.int64)
    rel[:, :, 0] += ws - 1
    rel[:, :, 1] += ws - 1
    rel[:, :, 0] *= 2 * ws - 1
    return rel.sum(-1)                                      # (T, T)


def shift_attn_mask(H, W, ws, shift):
    img_mask = np.zeros((1, H, W, 1), np.float32)
    cnt = 0
    for hs in (slice(0, -ws), slice(-ws, -shift), slice(-shift, None)):
        for vs in (slice(0, -ws), slice(-ws, -shift), slice(-shift, None)):
            img_mask[:, hs, vs, :] = cnt
            cnt += 1
    mw = _window_partition_np(img_mask, ws).reshape(-1, ws * ws)
    am = mw[:, None, :] - mw[:, :, None]
    return np.where(am != 0, -100.0, 0.0).astype(np.float32)   # (nW, T, T)


def build_attn_bias(rel_table, H, W, ws, shift, num_heads):
    """Pack rel-pos bias + shift mask + (shifted-)window structure into a
    raster-token-order additive bias (num_heads, H*W, H*W).  Token pairs in
    different (shifted) windows get -1e9, so full-image attention in the
    kernel is exactly equivalent to roll -> window-partition -> masked window
    attention -> window-reverse -> roll-back, with zero XLA relayouts."""
    T = ws * ws
    idx = relative_position_index(ws)
    rel_bias = rel_table[idx.reshape(-1)].reshape(T, T, num_heads)
    rel_bias = rel_bias.transpose(2, 0, 1)                  # (nh, T, T)

    ids = np.arange(H * W).reshape(1, H, W, 1)
    if shift > 0:
        ids = np.roll(ids, (-shift, -shift), axis=(1, 2))
        mask_w = shift_attn_mask(H, W, ws, shift)           # (nW, T, T)
    else:
        mask_w = np.zeros(((H // ws) * (W // ws), T, T), np.float32)
    win_ids = _window_partition_np(ids, ws).reshape(-1, T).astype(np.int64)

    bias = np.full((num_heads, H * W, H * W), NEG_INF, np.float32)
    for w in range(win_ids.shape[0]):
        sel = win_ids[w]
        bias[:, sel[:, None], sel[None, :]] = rel_bias + mask_w[w][None]
    return jnp.asarray(bias)


# ----------------------------------------------------------------------------
# Swin glue
# ----------------------------------------------------------------------------

def patch_merging(x, p, B, H, W, C):
    # TODO(synk): the stride-2 gather/concat stays in XLA (tiny, once per
    # stage); LN + reduction matmul are fused in one Pallas kernel.
    x = x.reshape(B, H, W, C)
    x0 = x[:, 0::2, 0::2, :]
    x1 = x[:, 1::2, 0::2, :]
    x2 = x[:, 0::2, 1::2, :]
    x3 = x[:, 1::2, 1::2, :]
    xc = jnp.concatenate([x0, x1, x2, x3], axis=-1).reshape(-1, 4 * C)
    y = ln_linear(xc, p["norm_g"], p["norm_b"], p["red_w"], p["red_b"])
    return y.reshape(B, (H // 2) * (W // 2), 2 * C)


def swint_forward(x, params, cfg):
    """x: (B, C_in, H, W) NCHW float32 -> logits (B, num_classes) float32."""
    B, Cin, Himg, Wimg = x.shape
    ps, ed = cfg["patch_size"], cfg["embed_dim"]
    Hp, Wp = Himg // ps, Wimg // ps

    # Patch-embed conv (kernel=stride=ps) as a matmul on patches; contraction
    # zero-padded to 128 lanes, post-embed LayerNorm fused into the kernel.
    xp = x.reshape(B, Cin, Hp, ps, Wp, ps).transpose(0, 2, 4, 1, 3, 5)
    xp = xp.reshape(B * Hp * Wp, Cin * ps * ps)
    xp = jnp.pad(xp, ((0, 0), (0, PATCH_K_PAD - xp.shape[1]))).astype(ACT_DTYPE)
    pe = params["patch_embed"]
    h = patch_embed(xp, pe["w"], pe["b"], pe["ng"], pe["nb"])
    h = h.reshape(B, Hp * Wp, ed)

    H, W, C = Hp, Wp, ed
    for si, (depth, nh) in enumerate(zip(cfg["depths"], cfg["num_heads"])):
        stage = params["stages"][si]
        for bi in range(depth):
            h = swin_block(h, stage["blocks"][bi], nh)
        if si < len(cfg["depths"]) - 1:
            h = patch_merging(h, stage["downsample"], B, H, W, C)
            H, W, C = H // 2, W // 2, 2 * C

    # forward_features final norm + forward_head (avg-pool + linear), fused.
    return head_forward(h, params["norm_g"], params["norm_b"],
                        params["head_w"], params["head_b"])


# ----------------------------------------------------------------------------
# Deterministic synthetic parameter init (shapes follow timm Swin)
# ----------------------------------------------------------------------------

def init_params(key, cfg):
    keys = iter(jax.random.split(key, 256))

    def w(shape, scale=0.02, dtype=ACT_DTYPE):
        return (jax.random.normal(next(keys), shape, jnp.float32) * scale
                ).astype(dtype)

    def zeros(n):
        return jnp.zeros((n,), jnp.float32)

    def ones(n):
        return jnp.ones((n,), jnp.float32)

    ps, cin, ed = cfg["patch_size"], cfg["in_chans"], cfg["embed_dim"]
    k_raw = cin * ps * ps
    pe_w = jnp.pad(
        jax.random.normal(next(keys), (k_raw, ed), jnp.float32) * 0.02,
        ((0, PATCH_K_PAD - k_raw), (0, 0))).astype(ACT_DTYPE)
    params = {
        "patch_embed": {"w": pe_w, "b": zeros(ed),
                        "ng": ones(ed), "nb": zeros(ed)},
        "stages": [],
    }

    H = W = cfg["img_size"] // ps
    C = ed
    for si, (depth, nh) in enumerate(zip(cfg["depths"], cfg["num_heads"])):
        ws = min(cfg["window_size"], H)
        hidden = cfg["mlp_ratio"] * C
        blocks = []
        for bi in range(depth):
            shift = 0 if (bi % 2 == 0 or ws >= H) else ws // 2
            # TODO(synk): with a real checkpoint, the learned rel-pos table is
            # packed into attn_bias once after weight load, exactly as here.
            rel_table = np.asarray(jax.random.normal(
                next(keys), ((2 * ws - 1) ** 2, nh), jnp.float32)) * 0.02
            blocks.append({
                "norm1_g": ones(C), "norm1_b": zeros(C),
                "qkv_w": w((C, 3 * C)), "qkv_b": zeros(3 * C),
                "attn_bias": build_attn_bias(rel_table, H, W, ws, shift, nh),
                "proj_w": w((C, C)), "proj_b": zeros(C),
                "norm2_g": ones(C), "norm2_b": zeros(C),
                "fc1_w": w((C, hidden)), "fc1_b": zeros(hidden),
                "fc2_w": w((hidden, C)), "fc2_b": zeros(C),
            })
        stage = {"blocks": blocks}
        if si < len(cfg["depths"]) - 1:
            stage["downsample"] = {
                "norm_g": ones(4 * C), "norm_b": zeros(4 * C),
                "red_w": w((4 * C, 2 * C)), "red_b": zeros(2 * C),
            }
            H, W, C = H // 2, W // 2, 2 * C
        params["stages"].append(stage)

    params["norm_g"] = ones(C)
    params["norm_b"] = zeros(C)
    params["head_w"] = w((C, cfg["num_classes"]))
    params["head_b"] = zeros(cfg["num_classes"])
    return params


# ----------------------------------------------------------------------------
# Main
# ----------------------------------------------------------------------------

if __name__ == "__main__":
    # Scaled-down "swint_base" analogue: 2 stages, embed 32 -> final dim 64
    # (the real swin_base ends at 1024 == self.output_num).
    cfg = dict(img_size=32, patch_size=4, in_chans=3, embed_dim=32,
               depths=(2, 2), num_heads=(2, 4), window_size=4,
               mlp_ratio=4, num_classes=10)

    params = init_params(jax.random.PRNGKey(42), cfg)
    x = jax.random.normal(jax.random.PRNGKey(0), (2, 3, 32, 32), jnp.float32)

    fwd = jax.jit(functools.partial(swint_forward, cfg=cfg))
    out = fwd(x, params)
    jax.block_until_ready(out)

    assert out.shape == (2, cfg["num_classes"]), out.shape
    assert bool(jnp.all(jnp.isfinite(out)))
    print("KERNEL_OK")
</pallas_src>

<mosaic_0001>
module attributes {stable_mosaic.version = 11 : i64} {
  func.func @_patch_embed_kernel(%arg0: i32, %arg1: memref<64x128xbf16, #tpu.memory_space<vmem>>, %arg2: memref<128x32xbf16, #tpu.memory_space<vmem>>, %arg3: memref<1x32xf32, #tpu.memory_space<vmem>>, %arg4: memref<1x32xf32, #tpu.memory_space<vmem>>, %arg5: memref<1x32xf32, #tpu.memory_space<vmem>>, %arg6: memref<64x32xbf16, #tpu.memory_space<vmem>>) attributes {dimension_semantics = [#tpu.dimension_semantics<parallel>], iteration_bounds = array<i64: 2>, scalar_prefetch = 0 : i64, scratch_operands = 0 : i64, tpu.core_type = #tpu.core_type<tc>, window_params = [{transform_indices = @transform_0, window_bounds = array<i64: 64, 128>}, {pipeline_mode = #tpu.pipeline_mode<synchronous>, transform_indices = @transform_1, window_bounds = array<i64: 128, 32>}, {pipeline_mode = #tpu.pipeline_mode<synchronous>, transform_indices = @transform_2, window_bounds = array<i64: 1, 32>}, {pipeline_mode = #tpu.pipeline_mode<synchronous>, transform_indices = @transform_3, window_bounds = array<i64: 1, 32>}, {pipeline_mode = #tpu.pipeline_mode<synchronous>, transform_indices = @transform_4, window_bounds = array<i64: 1, 32>}, {transform_indices = @transform_5, window_bounds = array<i64: 64, 32>}]} {
    %c0 = arith.constant 0 : index
    %c0_0 = arith.constant 0 : index
    %0 = vector.load %arg1[%c0, %c0_0] : memref<64x128xbf16, #tpu.memory_space<vmem>>, vector<64x128xbf16>
    %c0_1 = arith.constant 0 : index
    %c0_2 = arith.constant 0 : index
    %1 = vector.load %arg2[%c0_1, %c0_2] : memref<128x32xbf16, #tpu.memory_space<vmem>>, vector<128x32xbf16>
    %cst = arith.constant dense<0.000000e+00> : vector<64x32xf32>
    %2 = tpu.matmul %0, %1, %cst {dimension_numbers = #tpu.dot_dimension_numbers<[1], [0], [0], [1], [0, 0, 1, 1], [], []>} : vector<64x128xbf16>, vector<128x32xbf16>, vector<64x32xf32> -> vector<64x32xf32>
    %c0_3 = arith.constant 0 : index
    %c0_4 = arith.constant 0 : index
    %3 = vector.load %arg3[%c0_3, %c0_4] : memref<1x32xf32, #tpu.memory_space<vmem>>, vector<1x32xf32>
    %4 = vector.broadcast %3 : vector<1x32xf32> to vector<64x32xf32>
    %5 = arith.addf %2, %4 : vector<64x32xf32>
    %c0_5 = arith.constant 0 : index
    %c0_6 = arith.constant 0 : index
    %6 = vector.load %arg4[%c0_5, %c0_6] : memref<1x32xf32, #tpu.memory_space<vmem>>, vector<1x32xf32>
    %c0_7 = arith.constant 0 : index
    %c0_8 = arith.constant 0 : index
    %7 = vector.load %arg5[%c0_7, %c0_8] : memref<1x32xf32, #tpu.memory_space<vmem>>, vector<1x32xf32>
    %cst_9 = arith.constant dense<0.000000e+00> : vector<64xf32>
    %8 = vector.multi_reduction <add>, %5, %cst_9 [1] : vector<64x32xf32> to vector<64xf32>
    %9 = vector.shape_cast %8 : vector<64xf32> to vector<64x1xf32>
    %cst_10 = arith.constant 3.200000e+01 : f32
    %10 = vector.broadcast %cst_10 : f32 to vector<64x1xf32>
    %11 = arith.divf %9, %10 : vector<64x1xf32>
    %12 = vector.broadcast %11 : vector<64x1xf32> to vector<64x32xf32>
    %13 = arith.subf %5, %12 : vector<64x32xf32>
    %14 = arith.mulf %13, %13 : vector<64x32xf32>
    %cst_11 = arith.constant dense<0.000000e+00> : vector<64xf32>
    %15 = vector.multi_reduction <add>, %14, %cst_11 [1] : vector<64x32xf32> to vector<64xf32>
    %16 = vector.shape_cast %15 : vector<64xf32> to vector<64x1xf32>
    %cst_12 = arith.constant 3.200000e+01 : f32
    %17 = vector.broadcast %cst_12 : f32 to vector<64x1xf32>
    %18 = arith.divf %16, %17 : vector<64x1xf32>
    %cst_13 = arith.constant 9.99999974E-6 : f32
    %19 = vector.broadcast %cst_13 : f32 to vector<64x1xf32>
    %20 = arith.addf %18, %19 : vector<64x1xf32>
    %21 = math.rsqrt %20 : vector<64x1xf32>
    %22 = vector.broadcast %21 : vector<64x1xf32> to vector<64x32xf32>
    %23 = arith.mulf %13, %22 : vector<64x32xf32>
    %24 = vector.broadcast %6 : vector<1x32xf32> to vector<64x32xf32>
    %25 = arith.mulf %23, %24 : vector<64x32xf32>
    %26 = vector.broadcast %7 : vector<1x32xf32> to vector<64x32xf32>
    %27 = arith.addf %25, %26 : vector<64x32xf32>
    %28 = arith.truncf %27 : vector<64x32xf32> to vector<64x32xbf16>
    %c0_14 = arith.constant 0 : index
    %c0_15 = arith.constant 0 : index
    %29 = vector.load %arg6[%c0_14, %c0_15] : memref<64x32xbf16, #tpu.memory_space<vmem>>, vector<64x32xbf16>
    tpu.vector_store %arg6[%c0_14, %c0_15], %28 {strides = array<i32>} : memref<64x32xbf16, #tpu.memory_space<vmem>>, vector<64x32xbf16>,
    return
  }
  func.func @transform_0(%arg0: i32) -> (i32, i32) {
    %c0_i32 = arith.constant 0 : i32
    %c0_i32_0 = arith.constant 0 : i32
    return %arg0, %c0_i32 : i32, i32
  }
  func.func @transform_1(%arg0: i32) -> (i32, i32) {
    %c0_i32 = arith.constant 0 : i32
    %c0_i32_0 = arith.constant 0 : i32
    %c0_i32_1 = arith.constant 0 : i32
    return %c0_i32, %c0_i32_0 : i32, i32
  }
  func.func @transform_2(%arg0: i32) -> (i32, i32) {
    %c0_i32 = arith.constant 0 : i32
    %c0_i32_0 = arith.constant 0 : i32
    %c0_i32_1 = arith.constant 0 : i32
    return %c0_i32, %c0_i32_0 : i32, i32
  }
  func.func @transform_3(%arg0: i32) -> (i32, i32) {
    %c0_i32 = arith.constant 0 : i32
    %c0_i32_0 = arith.constant 0 : i32
    %c0_i32_1 = arith.constant 0 : i32
    return %c0_i32, %c0_i32_0 : i32, i32
  }
  func.func @transform_4(%arg0: i32) -> (i32, i32) {
    %c0_i32 = arith.constant 0 : i32
    %c0_i32_0 = arith.constant 0 : i32
    %c0_i32_1 = arith.constant 0 : i32
    return %c0_i32, %c0_i32_0 : i32, i32
  }
  func.func @transform_5(%arg0: i32) -> (i32, i32) {
    %c0_i32 = arith.constant 0 : i32
    %c0_i32_0 = arith.constant 0 : i32
    return %arg0, %c0_i32 : i32, i32
  }
}

module attributes {stable_mosaic.version = 11 : i64} {
  func.func @_swin_block_kernel(%arg0: i32, %arg1: memref<1x64x32xbf16, #tpu.memory_space<vmem>>, %arg2: memref<1x32xf32, #tpu.memory_space<vmem>>, %arg3: memref<1x32xf32, #tpu.memory_space<vmem>>, %arg4: memref<32x96xbf16, #tpu.memory_space<vmem>>, %arg5: memref<1x96xf32, #tpu.memory_space<vmem>>, %arg6: memref<2x64x64xf32, #tpu.memory_space<vmem>>, %arg7: memref<32x32xbf16, #tpu.memory_space<vmem>>, %arg8: memref<1x32xf32, #tpu.memory_space<vmem>>, %arg9: memref<1x32xf32, #tpu.memory_space<vmem>>, %arg10: memref<1x32xf32, #tpu.memory_space<vmem>>, %arg11: memref<32x128xbf16, #tpu.memory_space<vmem>>, %arg12: memref<1x128xf32, #tpu.memory_space<vmem>>, %arg13: memref<128x32xbf16, #tpu.memory_space<vmem>>, %arg14: memref<1x32xf32, #tpu.memory_space<vmem>>, %arg15: memref<1x64x32xbf16, #tpu.memory_space<vmem>>) attributes {dimension_semantics = [#tpu.dimension_semantics<parallel>], iteration_bounds = array<i64: 2>, scalar_prefetch = 0 : i64, scratch_operands = 0 : i64, tpu.core_type = #tpu.core_type<tc>, window_params = [{transform_indices = @transform_0, window_bounds = array<i64: 1, 64, 32>}, {pipeline_mode = #tpu.pipeline_mode<synchronous>, transform_indices = @transform_1, window_bounds = array<i64: 1, 32>}, {pipeline_mode = #tpu.pipeline_mode<synchronous>, transform_indices = @transform_2, window_bounds = array<i64: 1, 32>}, {pipeline_mode = #tpu.pipeline_mode<synchronous>, transform_indices = @transform_3, window_bounds = array<i64: 32, 96>}, {pipeline_mode = #tpu.pipeline_mode<synchronous>, transform_indices = @transform_4, window_bounds = array<i64: 1, 96>}, {pipeline_mode = #tpu.pipeline_mode<synchronous>, transform_indices = @transform_5, window_bounds = array<i64: 2, 64, 64>}, {pipeline_mode = #tpu.pipeline_mode<synchronous>, transform_indices = @transform_6, window_bounds = array<i64: 32, 32>}, {pipeline_mode = #tpu.pipeline_mode<synchronous>, transform_indices = @transform_7, window_bounds = array<i64: 1, 32>}, {pipeline_mode = #tpu.pipeline_mode<synchronous>, transform_indices = @transform_8, window_bounds = array<i64: 1, 32>}, {pipeline_mode = #tpu.pipeline_mode<synchronous>, transform_indices = @transform_9, window_bounds = array<i64: 1, 32>}, {pipeline_mode = #tpu.pipeline_mode<synchronous>, transform_indices = @transform_10, window_bounds = array<i64: 32, 128>}, {pipeline_mode = #tpu.pipeline_mode<synchronous>, transform_indices = @transform_11, window_bounds = array<i64: 1, 128>}, {pipeline_mode = #tpu.pipeline_mode<synchronous>, transform_indices = @transform_12, window_bounds = array<i64: 128, 32>}, {pipeline_mode = #tpu.pipeline_mode<synchronous>, transform_indices = @transform_13, window_bounds = array<i64: 1, 32>}, {transform_indices = @transform_14, window_bounds = array<i64: 1, 64, 32>}]} {
    %c0 = arith.constant 0 : index
    %c0_0 = arith.constant 0 : index
    %c0_1 = arith.constant 0 : index
    %0 = vector.load %arg1[%c0, %c0_0, %c0_1] : memref<1x64x32xbf16, #tpu.memory_space<vmem>>, vector<1x64x32xbf16>
    %1 = vector.shape_cast %0 : vector<1x64x32xbf16> to vector<64x32xbf16>
    %2 = arith.extf %1 : vector<64x32xbf16> to vector<64x32xf32>
    %c0_2 = arith.constant 0 : index
    %c0_3 = arith.constant 0 : index
    %3 = vector.load %arg2[%c0_2, %c0_3] : memref<1x32xf32, #tpu.memory_space<vmem>>, vector<1x32xf32>
    %c0_4 = arith.constant 0 : index
    %c0_5 = arith.constant 0 : index
    %4 = vector.load %arg3[%c0_4, %c0_5] : memref<1x32xf32, #tpu.memory_space<vmem>>, vector<1x32xf32>
    %cst = arith.constant dense<0.000000e+00> : vector<64xf32>
    %5 = vector.multi_reduction <add>, %2, %cst [1] : vector<64x32xf32> to vector<64xf32>
    %6 = vector.shape_cast %5 : vector<64xf32> to vector<64x1xf32>
    %cst_6 = arith.constant 3.200000e+01 : f32
    %7 = vector.broadcast %cst_6 : f32 to vector<64x1xf32>
    %8 = arith.divf %6, %7 : vector<64x1xf32>
    %9 = vector.broadcast %8 : vector<64x1xf32> to vector<64x32xf32>
    %10 = arith.subf %2, %9 : vector<64x32xf32>
    %11 = arith.mulf %10, %10 : vector<64x32xf32>
    %cst_7 = arith.constant dense<0.000000e+00> : vector<64xf32>
    %12 = vector.multi_reduction <add>, %11, %cst_7 [1] : vector<64x32xf32> to vector<64xf32>
    %13 = vector.shape_cast %12 : vector<64xf32> to vector<64x1xf32>
    %cst_8 = arith.constant 3.200000e+01 : f32
    %14 = vector.broadcast %cst_8 : f32 to vector<64x1xf32>
    %15 = arith.divf %13, %14 : vector<64x1xf32>
    %cst_9 = arith.constant 9.99999974E-6 : f32
    %16 = vector.broadcast %cst_9 : f32 to vector<64x1xf32>
    %17 = arith.addf %15, %16 : vector<64x1xf32>
    %18 = math.rsqrt %17 : vector<64x1xf32>
    %19 = vector.broadcast %18 : vector<64x1xf32> to vector<64x32xf32>
    %20 = arith.mulf %10, %19 : vector<64x32xf32>
    %21 = vector.broadcast %3 : vector<1x32xf32> to vector<64x32xf32>
    %22 = arith.mulf %20, %21 : vector<64x32xf32>
    %23 = vector.broadcast %4 : vector<1x32xf32> to vector<64x32xf32>
    %24 = arith.addf %22, %23 : vector<64x32xf32>
    %25 = arith.truncf %24 : vector<64x32xf32> to vector<64x32xbf16>
    %c0_10 = arith.constant 0 : index
    %c0_11 = arith.constant 0 : index
    %26 = vector.load %arg4[%c0_10, %c0_11] : memref<32x96xbf16, #tpu.memory_space<vmem>>, vector<32x96xbf16>
    %cst_12 = arith.constant dense<0.000000e+00> : vector<64x96xf32>
    %27 = tpu.matmul %25, %26, %cst_12 {dimension_numbers = #tpu.dot_dimension_numbers<[1], [0], [0], [1], [0, 0, 1, 1], [], []>} : vector<64x32xbf16>, vector<32x96xbf16>, vector<64x96xf32> -> vector<64x96xf32>
    %c0_13 = arith.constant 0 : index
    %c0_14 = arith.constant 0 : index
    %28 = vector.load %arg5[%c0_13, %c0_14] : memref<1x96xf32, #tpu.memory_space<vmem>>, vector<1x96xf32>
    %29 = vector.broadcast %28 : vector<1x96xf32> to vector<64x96xf32>
    %30 = arith.addf %27, %29 : vector<64x96xf32>
    %31 = vector.extract_strided_slice %30 {offsets = [0, 0], sizes = [64, 32], strides = [1, 1]} : vector<64x96xf32> to vector<64x32xf32>
    %cst_15 = arith.constant 2.500000e-01 : f32
    %32 = vector.broadcast %cst_15 : f32 to vector<64x32xf32>
    %33 = arith.mulf %31, %32 : vector<64x32xf32>
    %34 = vector.extract_strided_slice %30 {offsets = [0, 32], sizes = [64, 32], strides = [1, 1]} : vector<64x96xf32> to vector<64x32xf32>
    %35 = vector.extract_strided_slice %30 {offsets = [0, 64], sizes = [64, 32], strides = [1, 1]} : vector<64x96xf32> to vector<64x32xf32>
    %c0_16 = arith.constant 0 : index
    %c0_17 = arith.constant 0 : index
    %36 = vector.load %arg7[%c0_16, %c0_17] : memref<32x32xbf16, #tpu.memory_space<vmem>>, vector<32x32xbf16>
    %c0_18 = arith.constant 0 : index
    %c0_19 = arith.constant 0 : index
    %37 = vector.load %arg8[%c0_18, %c0_19] : memref<1x32xf32, #tpu.memory_space<vmem>>, vector<1x32xf32>
    %38 = vector.broadcast %37 : vector<1x32xf32> to vector<64x32xf32>
    %39 = arith.addf %2, %38 : vector<64x32xf32>
    %40 = vector.extract_strided_slice %33 {offsets = [0, 0], sizes = [64, 16], strides = [1, 1]} : vector<64x32xf32> to vector<64x16xf32>
    %41 = arith.truncf %40 : vector<64x16xf32> to vector<64x16xbf16>
    %42 = vector.extract_strided_slice %34 {offsets = [0, 0], sizes = [64, 16], strides = [1, 1]} : vector<64x32xf32> to vector<64x16xf32>
    %43 = arith.truncf %42 : vector<64x16xf32> to vector<64x16xbf16>
    %44 = vector.extract_strided_slice %35 {offsets = [0, 0], sizes = [64, 16], strides = [1, 1]} : vector<64x32xf32> to vector<64x16xf32>
    %45 = arith.truncf %44 : vector<64x16xf32> to vector<64x16xbf16>
    "tpu.trace_start"() <{level = 10 : i32, message = "td,sd->ts"}> : () -> ()
    %cst_20 = arith.constant dense<0.000000e+00> : vector<64x64xf32>
    %46 = tpu.matmul %41, %43, %cst_20 {dimension_numbers = #tpu.dot_dimension_numbers<[1], [1], [0], [0], [0, 0, 1, 0], [], []>} : vector<64x16xbf16>, vector<64x16xbf16>, vector<64x64xf32> -> vector<64x64xf32>
    "tpu.trace_stop"() : () -> ()
    %c0_21 = arith.constant 0 : index
    %c0_22 = arith.constant 0 : index
    %c0_23 = arith.constant 0 : index
    %47 = vector.load %arg6[%c0_21, %c0_22, %c0_23] : memref<2x64x64xf32, #tpu.memory_space<vmem>>, vector<1x64x64xf32>
    %48 = vector.shape_cast %47 : vector<1x64x64xf32> to vector<64x64xf32>
    %49 = arith.addf %46, %48 : vector<64x64xf32>
    %cst_24 = arith.constant dense<0xFF800000> : vector<64xf32>
    %50 = vector.multi_reduction <maximumf>, %49, %cst_24 [1] : vector<64x64xf32> to vector<64xf32>
    %51 = vector.shape_cast %50 : vector<64xf32> to vector<64x1xf32>
    %52 = vector.broadcast %51 : vector<64x1xf32> to vector<64x64xf32>
    %53 = arith.subf %49, %52 : vector<64x64xf32>
    %54 = math.exp %53 : vector<64x64xf32>
    %cst_25 = arith.constant dense<0.000000e+00> : vector<64xf32>
    %55 = vector.multi_reduction <add>, %54, %cst_25 [1] : vector<64x64xf32> to vector<64xf32>
    %56 = vector.shape_cast %55 : vector<64xf32> to vector<64x1xf32>
    %57 = vector.broadcast %56 : vector<64x1xf32> to vector<64x64xf32>
    %58 = arith.divf %54, %57 : vector<64x64xf32>
    %59 = arith.truncf %58 : vector<64x64xf32> to vector<64x64xbf16>
    %cst_26 = arith.constant dense<0.000000e+00> : vector<64x16xf32>
    %60 = tpu.matmul %59, %45, %cst_26 {dimension_numbers = #tpu.dot_dimension_numbers<[1], [0], [0], [1], [0, 0, 1, 1], [], []>} : vector<64x64xbf16>, vector<64x16xbf16>, vector<64x16xf32> -> vector<64x16xf32>
    %61 = arith.truncf %60 : vector<64x16xf32> to vector<64x16xbf16>
    %62 = vector.extract_strided_slice %36 {offsets = [0, 0], sizes = [16, 32], strides = [1, 1]} : vector<32x32xbf16> to vector<16x32xbf16>
    %cst_27 = arith.constant dense<0.000000e+00> : vector<64x32xf32>
    %63 = tpu.matmul %61, %62, %cst_27 {dimension_numbers = #tpu.dot_dimension_numbers<[1], [0], [0], [1], [0, 0, 1, 1], [], []>} : vector<64x16xbf16>, vector<16x32xbf16>, vector<64x32xf32> -> vector<64x32xf32>
    %64 = arith.addf %39, %63 : vector<64x32xf32>
    %65 = vector.extract_strided_slice %33 {offsets = [0, 16], sizes = [64, 16], strides = [1, 1]} : vector<64x32xf32> to vector<64x16xf32>
    %66 = arith.truncf %65 : vector<64x16xf32> to vector<64x16xbf16>
    %67 = vector.extract_strided_slice %34 {offsets = [0, 16], sizes = [64, 16], strides = [1, 1]} : vector<64x32xf32> to vector<64x16xf32>
    %68 = arith.truncf %67 : vector<64x16xf32> to vector<64x16xbf16>
    %69 = vector.extract_strided_slice %35 {offsets = [0, 16], sizes = [64, 16], strides = [1, 1]} : vector<64x32xf32> to vector<64x16xf32>
    %70 = arith.truncf %69 : vector<64x16xf32> to vector<64x16xbf16>
    "tpu.trace_start"() <{level = 10 : i32, message = "td,sd->ts"}> : () -> ()
    %cst_28 = arith.constant dense<0.000000e+00> : vector<64x64xf32>
    %71 = tpu.matmul %66, %68, %cst_28 {dimension_numbers = #tpu.dot_dimension_numbers<[1], [1], [0], [0], [0, 0, 1, 0], [], []>} : vector<64x16xbf16>, vector<64x16xbf16>, vector<64x64xf32> -> vector<64x64xf32>
    "tpu.trace_stop"() : () -> ()
    %c1 = arith.constant 1 : index
    %c0_29 = arith.constant 0 : index
    %c0_30 = arith.constant 0 : index
    %72 = vector.load %arg6[%c1, %c0_29, %c0_30] : memref<2x64x64xf32, #tpu.memory_space<vmem>>, vector<1x64x64xf32>
    %73 = vector.shape_cast %72 : vector<1x64x64xf32> to vector<64x64xf32>
    %74 = arith.addf %71, %73 : vector<64x64xf32>
    %cst_31 = arith.constant dense<0xFF800000> : vector<64xf32>
    %75 = vector.multi_reduction <maximumf>, %74, %cst_31 [1] : vector<64x64xf32> to vector<64xf32>
    %76 = vector.shape_cast %75 : vector<64xf32> to vector<64x1xf32>
    %77 = vector.broadcast %76 : vector<64x1xf32> to vector<64x64xf32>
    %78 = arith.subf %74, %77 : vector<64x64xf32>
    %79 = math.exp %78 : vector<64x64xf32>
    %cst_32 = arith.constant dense<0.000000e+00> : vector<64xf32>
    %80 = vector.multi_reduction <add>, %79, %cst_32 [1] : vector<64x64xf32> to vector<64xf32>
    %81 = vector.shape_cast %80 : vector<64xf32> to vector<64x1xf32>
    %82 = vector.broadcast %81 : vector<64x1xf32> to vector<64x64xf32>
    %83 = arith.divf %79, %82 : vector<64x64xf32>
    %84 = arith.truncf %83 : vector<64x64xf32> to vector<64x64xbf16>
    %cst_33 = arith.constant dense<0.000000e+00> : vector<64x16xf32>
    %85 = tpu.matmul %84, %70, %cst_33 {dimension_numbers = #tpu.dot_dimension_numbers<[1], [0], [0], [1], [0, 0, 1, 1], [], []>} : vector<64x64xbf16>, vector<64x16xbf16>, vector<64x16xf32> -> vector<64x16xf32>
    %86 = arith.truncf %85 : vector<64x16xf32> to vector<64x16xbf16>
    %87 = vector.extract_strided_slice %36 {offsets = [16, 0], sizes = [16, 32], strides = [1, 1]} : vector<32x32xbf16> to vector<16x32xbf16>
    %cst_34 = arith.constant dense<0.000000e+00> : vector<64x32xf32>
    %88 = tpu.matmul %86, %87, %cst_34 {dimension_numbers = #tpu.dot_dimension_numbers<[1], [0], [0], [1], [0, 0, 1, 1], [], []>} : vector<64x16xbf16>, vector<16x32xbf16>, vector<64x32xf32> -> vector<64x32xf32>
    %89 = arith.addf %64, %88 : vector<64x32xf32>
    %c0_35 = arith.constant 0 : index
    %c0_36 = arith.constant 0 : index
    %90 = vector.load %arg9[%c0_35, %c0_36] : memref<1x32xf32, #tpu.memory_space<vmem>>, vector<1x32xf32>
    %c0_37 = arith.constant 0 : index
    %c0_38 = arith.constant 0 : index
    %91 = vector.load %arg10[%c0_37, %c0_38] : memref<1x32xf32, #tpu.memory_space<vmem>>, vector<1x32xf32>
    %cst_39 = arith.constant dense<0.000000e+00> : vector<64xf32>
    %92 = vector.multi_reduction <add>, %89, %cst_39 [1] : vector<64x32xf32> to vector<64xf32>
    %93 = vector.shape_cast %92 : vector<64xf32> to vector<64x1xf32>
    %cst_40 = arith.constant 3.200000e+01 : f32
    %94 = vector.broadcast %cst_40 : f32 to vector<64x1xf32>
    %95 = arith.divf %93, %94 : vector<64x1xf32>
    %96 = vector.broadcast %95 : vector<64x1xf32> to vector<64x32xf32>
    %97 = arith.subf %89, %96 : vector<64x32xf32>
    %98 = arith.mulf %97, %97 : vector<64x32xf32>
    %cst_41 = arith.constant dense<0.000000e+00> : vector<64xf32>
    %99 = vector.multi_reduction <add>, %98, %cst_41 [1] : vector<64x32xf32> to vector<64xf32>
    %100 = vector.shape_cast %99 : vector<64xf32> to vector<64x1xf32>
    %cst_42 = arith.constant 3.200000e+01 : f32
    %101 = vector.broadcast %cst_42 : f32 to vector<64x1xf32>
    %102 = arith.divf %100, %101 : vector<64x1xf32>
    %cst_43 = arith.constant 9.99999974E-6 : f32
    %103 = vector.broadcast %cst_43 : f32 to vector<64x1xf32>
    %104 = arith.addf %102, %103 : vector<64x1xf32>
    %105 = math.rsqrt %104 : vector<64x1xf32>
    %106 = vector.broadcast %105 : vector<64x1xf32> to vector<64x32xf32>
    %107 = arith.mulf %97, %106 : vector<64x32xf32>
    %108 = vector.broadcast %90 : vector<1x32xf32> to vector<64x32xf32>
    %109 = arith.mulf %107, %108 : vector<64x32xf32>
    %110 = vector.broadcast %91 : vector<1x32xf32> to vector<64x32xf32>
    %111 = arith.addf %109, %110 : vector<64x32xf32>
    %112 = arith.truncf %111 : vector<64x32xf32> to vector<64x32xbf16>
    %c0_44 = arith.constant 0 : index
    %c0_45 = arith.constant 0 : index
    %113 = vector.load %arg11[%c0_44, %c0_45] : memref<32x128xbf16, #tpu.memory_space<vmem>>, vector<32x128xbf16>
    %cst_46 = arith.constant dense<0.000000e+00> : vector<64x128xf32>
    %114 = tpu.matmul %112, %113, %cst_46 {dimension_numbers = #tpu.dot_dimension_numbers<[1], [0], [0], [1], [0, 0, 1, 1], [], []>} : vector<64x32xbf16>, vector<32x128xbf16>, vector<64x128xf32> -> vector<64x128xf32>
    %c0_47 = arith.constant 0 : index
    %c0_48 = arith.constant 0 : index
    %115 = vector.load %arg12[%c0_47, %c0_48] : memref<1x128xf32, #tpu.memory_space<vmem>>, vector<1x128xf32>
    %116 = vector.broadcast %115 : vector<1x128xf32> to vector<64x128xf32>
    %117 = arith.addf %114, %116 : vector<64x128xf32>
    %cst_49 = arith.constant 5.000000e-01 : f32
    %118 = vector.broadcast %cst_49 : f32 to vector<64x128xf32>
    %119 = arith.mulf %118, %117 : vector<64x128xf32>
    %cst_50 = arith.constant 4.471500e-02 : f32
    %120 = vector.broadcast %cst_50 : f32 to vector<64x128xf32>
    %121 = arith.mulf %120, %117 : vector<64x128xf32>
    %122 = arith.mulf %121, %117 : vector<64x128xf32>
    %123 = arith.mulf %122, %117 : vector<64x128xf32>
    %124 = arith.addf %117, %123 : vector<64x128xf32>
    %cst_51 = arith.constant 0.797884583 : f32
    %125 = vector.broadcast %cst_51 : f32 to vector<64x128xf32>
    %126 = arith.mulf %125, %124 : vector<64x128xf32>
    %127 = math.tanh %126 : vector<64x128xf32>
    %cst_52 = arith.constant 1.000000e+00 : f32
    %128 = vector.broadcast %cst_52 : f32 to vector<64x128xf32>
    %129 = arith.addf %128, %127 : vector<64x128xf32>
    %130 = arith.mulf %119, %129 : vector<64x128xf32>
    %131 = arith.truncf %130 : vector<64x128xf32> to vector<64x128xbf16>
    %c0_53 = arith.constant 0 : index
    %c0_54 = arith.constant 0 : index
    %132 = vector.load %arg13[%c0_53, %c0_54] : memref<128x32xbf16, #tpu.memory_space<vmem>>, vector<128x32xbf16>
    %cst_55 = arith.constant dense<0.000000e+00> : vector<64x32xf32>
    %133 = tpu.matmul %131, %132, %cst_55 {dimension_numbers = #tpu.dot_dimension_numbers<[1], [0], [0], [1], [0, 0, 1, 1], [], []>} : vector<64x128xbf16>, vector<128x32xbf16>, vector<64x32xf32> -> vector<64x32xf32>
    %134 = arith.addf %89, %133 : vector<64x32xf32>
    %c0_56 = arith.constant 0 : index
    %c0_57 = arith.constant 0 : index
    %135 = vector.load %arg14[%c0_56, %c0_57] : memref<1x32xf32, #tpu.memory_space<vmem>>, vector<1x32xf32>
    %136 = vector.broadcast %135 : vector<1x32xf32> to vector<64x32xf32>
    %137 = arith.addf %134, %136 : vector<64x32xf32>
    %138 = arith.truncf %137 : vector<64x32xf32> to vector<64x32xbf16>
    %c0_58 = arith.constant 0 : index
    %c0_59 = arith.constant 0 : index
    %c0_60 = arith.constant 0 : index
    %139 = vector.load %arg15[%c0_58, %c0_59, %c0_60] : memref<1x64x32xbf16, #tpu.memory_space<vmem>>, vector<1x64x32xbf16>
    %140 = vector.shape_cast %139 : vector<1x64x32xbf16> to vector<64x32xbf16>
    %141 = vector.shape_cast %138 : vector<64x32xbf16> to vector<1x64x32xbf16>
    tpu.vector_store %arg15[%c0_58, %c0_59, %c0_60], %141 {strides = array<i32>} : memref<1x64x32xbf16, #tpu.memory_space<vmem>>, vector<1x64x32xbf16>,
    return
  }
  func.func @transform_0(%arg0: i32) -> (i32, i32, i32) {
    %c0_i32 = arith.constant 0 : i32
    %c0_i32_0 = arith.constant 0 : i32
    %c0_i32_1 = arith.constant 0 : i32
    return %arg0, %c0_i32, %c0_i32_0 : i32, i32, i32
  }
  func.func @transform_1(%arg0: i32) -> (i32, i32) {
    %c0_i32 = arith.constant 0 : i32
    %c0_i32_0 = arith.constant 0 : i32
    %c0_i32_1 = arith.constant 0 : i32
    return %c0_i32, %c0_i32_0 : i32, i32
  }
  func.func @transform_2(%arg0: i32) -> (i32, i32) {
    %c0_i32 = arith.constant 0 : i32
    %c0_i32_0 = arith.constant 0 : i32
    %c0_i32_1 = arith.constant 0 : i32
    return %c0_i32, %c0_i32_0 : i32, i32
  }
  func.func @transform_3(%arg0: i32) -> (i32, i32) {
    %c0_i32 = arith.constant 0 : i32
    %c0_i32_0 = arith.constant 0 : i32
    %c0_i32_1 = arith.constant 0 : i32
    return %c0_i32, %c0_i32_0 : i32, i32
  }
  func.func @transform_4(%arg0: i32) -> (i32, i32) {
    %c0_i32 = arith.constant 0 : i32
    %c0_i32_0 = arith.constant 0 : i32
    %c0_i32_1 = arith.constant 0 : i32
    return %c0_i32, %c0_i32_0 : i32, i32
  }
  func.func @transform_5(%arg0: i32) -> (i32, i32, i32) {
    %c0_i32 = arith.constant 0 : i32
    %c0_i32_0 = arith.constant 0 : i32
    %c0_i32_1 = arith.constant 0 : i32
    %c0_i32_2 = arith.constant 0 : i32
    return %c0_i32, %c0_i32_0, %c0_i32_1 : i32, i32, i32
  }
  func.func @transform_6(%arg0: i32) -> (i32, i32) {
    %c0_i32 = arith.constant 0 : i32
    %c0_i32_0 = arith.constant 0 : i32
    %c0_i32_1 = arith.constant 0 : i32
    return %c0_i32, %c0_i32_0 : i32, i32
  }
  func.func @transform_7(%arg0: i32) -> (i32, i32) {
    %c0_i32 = arith.constant 0 : i32
    %c0_i32_0 = arith.constant 0 : i32
    %c0_i32_1 = arith.constant 0 : i32
    return %c0_i32, %c0_i32_0 : i32, i32
  }
  func.func @transform_8(%arg0: i32) -> (i32, i32) {
    %c0_i32 = arith.constant 0 : i32
    %c0_i32_0 = arith.constant 0 : i32
    %c0_i32_1 = arith.constant 0 : i32
    return %c0_i32, %c0_i32_0 : i32, i32
  }
  func.func @transform_9(%arg0: i32) -> (i32, i32) {
    %c0_i32 = arith.constant 0 : i32
    %c0_i32_0 = arith.constant 0 : i32
    %c0_i32_1 = arith.constant 0 : i32
    return %c0_i32, %c0_i32_0 : i32, i32
  }
  func.func @transform_10(%arg0: i32) -> (i32, i32) {
    %c0_i32 = arith.constant 0 : i32
    %c0_i32_0 = arith.constant 0 : i32
    %c0_i32_1 = arith.constant 0 : i32
    return %c0_i32, %c0_i32_0 : i32, i32
  }
  func.func @transform_11(%arg0: i32) -> (i32, i32) {
    %c0_i32 = arith.constant 0 : i32
    %c0_i32_0 = arith.constant 0 : i32
    %c0_i32_1 = arith.constant 0 : i32
    return %c0_i32, %c0_i32_0 : i32, i32
  }
  func.func @transform_12(%arg0: i32) -> (i32, i32) {
    %c0_i32 = arith.constant 0 : i32
    %c0_i32_0 = arith.constant 0 : i32
    %c0_i32_1 = arith.constant 0 : i32
    return %c0_i32, %c0_i32_0 : i32, i32
  }
  func.func @transform_13(%arg0: i32) -> (i32, i32) {
    %c0_i32 = arith.constant 0 : i32
    %c0_i32_0 = arith.constant 0 : i32
    %c0_i32_1 = arith.constant 0 : i32
    return %c0_i32, %c0_i32_0 : i32, i32
  }
  func.func @transform_14(%arg0: i32) -> (i32, i32, i32) {
    %c0_i32 = arith.constant 0 : i32
    %c0_i32_0 = arith.constant 0 : i32
    %c0_i32_1 = arith.constant 0 : i32
    return %arg0, %c0_i32, %c0_i32_0 : i32, i32, i32
  }
}

module attributes {stable_mosaic.version = 11 : i64} {
  func.func @_ln_linear_kernel(%arg0: i32, %arg1: memref<16x128xbf16, #tpu.memory_space<vmem>>, %arg2: memref<1x128xf32, #tpu.memory_space<vmem>>, %arg3: memref<1x128xf32, #tpu.memory_space<vmem>>, %arg4: memref<128x64xbf16, #tpu.memory_space<vmem>>, %arg5: memref<1x64xf32, #tpu.memory_space<vmem>>, %arg6: memref<16x64xbf16, #tpu.memory_space<vmem>>) attributes {dimension_semantics = [#tpu.dimension_semantics<parallel>], iteration_bounds = array<i64: 2>, scalar_prefetch = 0 : i64, scratch_operands = 0 : i64, tpu.core_type = #tpu.core_type<tc>, window_params = [{transform_indices = @transform_0, window_bounds = array<i64: 16, 128>}, {pipeline_mode = #tpu.pipeline_mode<synchronous>, transform_indices = @transform_1, window_bounds = array<i64: 1, 128>}, {pipeline_mode = #tpu.pipeline_mode<synchronous>, transform_indices = @transform_2, window_bounds = array<i64: 1, 128>}, {pipeline_mode = #tpu.pipeline_mode<synchronous>, transform_indices = @transform_3, window_bounds = array<i64: 128, 64>}, {pipeline_mode = #tpu.pipeline_mode<synchronous>, transform_indices = @transform_4, window_bounds = array<i64: 1, 64>}, {transform_indices = @transform_5, window_bounds = array<i64: 16, 64>}]} {
    %c0 = arith.constant 0 : index
    %c0_0 = arith.constant 0 : index
    %0 = vector.load %arg1[%c0, %c0_0] : memref<16x128xbf16, #tpu.memory_space<vmem>>, vector<16x128xbf16>
    %1 = arith.extf %0 : vector<16x128xbf16> to vector<16x128xf32>
    %c0_1 = arith.constant 0 : index
    %c0_2 = arith.constant 0 : index
    %2 = vector.load %arg2[%c0_1, %c0_2] : memref<1x128xf32, #tpu.memory_space<vmem>>, vector<1x128xf32>
    %c0_3 = arith.constant 0 : index
    %c0_4 = arith.constant 0 : index
    %3 = vector.load %arg3[%c0_3, %c0_4] : memref<1x128xf32, #tpu.memory_space<vmem>>, vector<1x128xf32>
    %cst = arith.constant dense<0.000000e+00> : vector<16xf32>
    %4 = vector.multi_reduction <add>, %1, %cst [1] : vector<16x128xf32> to vector<16xf32>
    %5 = vector.shape_cast %4 : vector<16xf32> to vector<16x1xf32>
    %cst_5 = arith.constant 1.280000e+02 : f32
    %6 = vector.broadcast %cst_5 : f32 to vector<16x1xf32>
    %7 = arith.divf %5, %6 : vector<16x1xf32>
    %8 = vector.broadcast %7 : vector<16x1xf32> to vector<16x128xf32>
    %9 = arith.subf %1, %8 : vector<16x128xf32>
    %10 = arith.mulf %9, %9 : vector<16x128xf32>
    %cst_6 = arith.constant dense<0.000000e+00> : vector<16xf32>
    %11 = vector.multi_reduction <add>, %10, %cst_6 [1] : vector<16x128xf32> to vector<16xf32>
    %12 = vector.shape_cast %11 : vector<16xf32> to vector<16x1xf32>
    %cst_7 = arith.constant 1.280000e+02 : f32
    %13 = vector.broadcast %cst_7 : f32 to vector<16x1xf32>
    %14 = arith.divf %12, %13 : vector<16x1xf32>
    %cst_8 = arith.constant 9.99999974E-6 : f32
    %15 = vector.broadcast %cst_8 : f32 to vector<16x1xf32>
    %16 = arith.addf %14, %15 : vector<16x1xf32>
    %17 = math.rsqrt %16 : vector<16x1xf32>
    %18 = vector.broadcast %17 : vector<16x1xf32> to vector<16x128xf32>
    %19 = arith.mulf %9, %18 : vector<16x128xf32>
    %20 = vector.broadcast %2 : vector<1x128xf32> to vector<16x128xf32>
    %21 = arith.mulf %19, %20 : vector<16x128xf32>
    %22 = vector.broadcast %3 : vector<1x128xf32> to vector<16x128xf32>
    %23 = arith.addf %21, %22 : vector<16x128xf32>
    %24 = arith.truncf %23 : vector<16x128xf32> to vector<16x128xbf16>
    %c0_9 = arith.constant 0 : index
    %c0_10 = arith.constant 0 : index
    %25 = vector.load %arg4[%c0_9, %c0_10] : memref<128x64xbf16, #tpu.memory_space<vmem>>, vector<128x64xbf16>
    %cst_11 = arith.constant dense<0.000000e+00> : vector<16x64xf32>
    %26 = tpu.matmul %24, %25, %cst_11 {dimension_numbers = #tpu.dot_dimension_numbers<[1], [0], [0], [1], [0, 0, 1, 1], [], []>} : vector<16x128xbf16>, vector<128x64xbf16>, vector<16x64xf32> -> vector<16x64xf32>
    %c0_12 = arith.constant 0 : index
    %c0_13 = arith.constant 0 : index
    %27 = vector.load %arg5[%c0_12, %c0_13] : memref<1x64xf32, #tpu.memory_space<vmem>>, vector<1x64xf32>
    %28 = vector.broadcast %27 : vector<1x64xf32> to vector<16x64xf32>
    %29 = arith.addf %26, %28 : vector<16x64xf32>
    %30 = arith.truncf %29 : vector<16x64xf32> to vector<16x64xbf16>
    %c0_14 = arith.constant 0 : index
    %c0_15 = arith.constant 0 : index
    %31 = vector.load %arg6[%c0_14, %c0_15] : memref<16x64xbf16, #tpu.memory_space<vmem>>, vector<16x64xbf16>
    tpu.vector_store %arg6[%c0_14, %c0_15], %30 {strides = array<i32>} : memref<16x64xbf16, #tpu.memory_space<vmem>>, vector<16x64xbf16>,
    return
  }
  func.func @transform_0(%arg0: i32) -> (i32, i32) {
    %c0_i32 = arith.constant 0 : i32
    %c0_i32_0 = arith.constant 0 : i32
    return %arg0, %c0_i32 : i32, i32
  }
  func.func @transform_1(%arg0: i32) -> (i32, i32) {
    %c0_i32 = arith.constant 0 : i32
    %c0_i32_0 = arith.constant 0 : i32
    %c0_i32_1 = arith.constant 0 : i32
    return %c0_i32, %c0_i32_0 : i32, i32
  }
  func.func @transform_2(%arg0: i32) -> (i32, i32) {
    %c0_i32 = arith.constant 0 : i32
    %c0_i32_0 = arith.constant 0 : i32
    %c0_i32_1 = arith.constant 0 : i32
    return %c0_i32, %c0_i32_0 : i32, i32
  }
  func.func @transform_3(%arg0: i32) -> (i32, i32) {
    %c0_i32 = arith.constant 0 : i32
    %c0_i32_0 = arith.constant 0 : i32
    %c0_i32_1 = arith.constant 0 : i32
    return %c0_i32, %c0_i32_0 : i32, i32
  }
  func.func @transform_4(%arg0: i32) -> (i32, i32) {
    %c0_i32 = arith.constant 0 : i32
    %c0_i32_0 = arith.constant 0 : i32
    %c0_i32_1 = arith.constant 0 : i32
    return %c0_i32, %c0_i32_0 : i32, i32
  }
  func.func @transform_5(%arg0: i32) -> (i32, i32) {
    %c0_i32 = arith.constant 0 : i32
    %c0_i32_0 = arith.constant 0 : i32
    return %arg0, %c0_i32 : i32, i32
  }
}

module attributes {stable_mosaic.version = 11 : i64} {
  func.func @_swin_block_kernel(%arg0: i32, %arg1: memref<1x16x64xbf16, #tpu.memory_space<vmem>>, %arg2: memref<1x64xf32, #tpu.memory_space<vmem>>, %arg3: memref<1x64xf32, #tpu.memory_space<vmem>>, %arg4: memref<64x192xbf16, #tpu.memory_space<vmem>>, %arg5: memref<1x192xf32, #tpu.memory_space<vmem>>, %arg6: memref<4x16x16xf32, #tpu.memory_space<vmem>>, %arg7: memref<64x64xbf16, #tpu.memory_space<vmem>>, %arg8: memref<1x64xf32, #tpu.memory_space<vmem>>, %arg9: memref<1x64xf32, #tpu.memory_space<vmem>>, %arg10: memref<1x64xf32, #tpu.memory_space<vmem>>, %arg11: memref<64x256xbf16, #tpu.memory_space<vmem>>, %arg12: memref<1x256xf32, #tpu.memory_space<vmem>>, %arg13: memref<256x64xbf16, #tpu.memory_space<vmem>>, %arg14: memref<1x64xf32, #tpu.memory_space<vmem>>, %arg15: memref<1x16x64xbf16, #tpu.memory_space<vmem>>) attributes {dimension_semantics = [#tpu.dimension_semantics<parallel>], iteration_bounds = array<i64: 2>, scalar_prefetch = 0 : i64, scratch_operands = 0 : i64, tpu.core_type = #tpu.core_type<tc>, window_params = [{transform_indices = @transform_0, window_bounds = array<i64: 1, 16, 64>}, {pipeline_mode = #tpu.pipeline_mode<synchronous>, transform_indices = @transform_1, window_bounds = array<i64: 1, 64>}, {pipeline_mode = #tpu.pipeline_mode<synchronous>, transform_indices = @transform_2, window_bounds = array<i64: 1, 64>}, {pipeline_mode = #tpu.pipeline_mode<synchronous>, transform_indices = @transform_3, window_bounds = array<i64: 64, 192>}, {pipeline_mode = #tpu.pipeline_mode<synchronous>, transform_indices = @transform_4, window_bounds = array<i64: 1, 192>}, {pipeline_mode = #tpu.pipeline_mode<synchronous>, transform_indices = @transform_5, window_bounds = array<i64: 4, 16, 16>}, {pipeline_mode = #tpu.pipeline_mode<synchronous>, transform_indices = @transform_6, window_bounds = array<i64: 64, 64>}, {pipeline_mode = #tpu.pipeline_mode<synchronous>, transform_indices = @transform_7, window_bounds = array<i64: 1, 64>}, {pipeline_mode = #tpu.pipeline_mode<synchronous>, transform_indices = @transform_8, window_bounds = array<i64: 1, 64>}, {pipeline_mode = #tpu.pipeline_mode<synchronous>, transform_indices = @transform_9, window_bounds = array<i64: 1, 64>}, {pipeline_mode = #tpu.pipeline_mode<synchronous>, transform_indices = @transform_10, window_bounds = array<i64: 64, 256>}, {pipeline_mode = #tpu.pipeline_mode<synchronous>, transform_indices = @transform_11, window_bounds = array<i64: 1, 256>}, {pipeline_mode = #tpu.pipeline_mode<synchronous>, transform_indices = @transform_12, window_bounds = array<i64: 256, 64>}, {pipeline_mode = #tpu.pipeline_mode<synchronous>, transform_indices = @transform_13, window_bounds = array<i64: 1, 64>}, {transform_indices = @transform_14, window_bounds = array<i64: 1, 16, 64>}]} {
    %c0 = arith.constant 0 : index
    %c0_0 = arith.constant 0 : index
    %c0_1 = arith.constant 0 : index
    %0 = vector.load %arg1[%c0, %c0_0, %c0_1] : memref<1x16x64xbf16, #tpu.memory_space<vmem>>, vector<1x16x64xbf16>
    %1 = vector.shape_cast %0 : vector<1x16x64xbf16> to vector<16x64xbf16>
    %2 = arith.extf %1 : vector<16x64xbf16> to vector<16x64xf32>
    %c0_2 = arith.constant 0 : index
    %c0_3 = arith.constant 0 : index
    %3 = vector.load %arg2[%c0_2, %c0_3] : memref<1x64xf32, #tpu.memory_space<vmem>>, vector<1x64xf32>
    %c0_4 = arith.constant 0 : index
    %c0_5 = arith.constant 0 : index
    %4 = vector.load %arg3[%c0_4, %c0_5] : memref<1x64xf32, #tpu.memory_space<vmem>>, vector<1x64xf32>
    %cst = arith.constant dense<0.000000e+00> : vector<16xf32>
    %5 = vector.multi_reduction <add>, %2, %cst [1] : vector<16x64xf32> to vector<16xf32>
    %6 = vector.shape_cast %5 : vector<16xf32> to vector<16x1xf32>
    %cst_6 = arith.constant 6.400000e+01 : f32
    %7 = vector.broadcast %cst_6 : f32 to vector<16x1xf32>
    %8 = arith.divf %6, %7 : vector<16x1xf32>
    %9 = vector.broadcast %8 : vector<16x1xf32> to vector<16x64xf32>
    %10 = arith.subf %2, %9 : vector<16x64xf32>
    %11 = arith.mulf %10, %10 : vector<16x64xf32>
    %cst_7 = arith.constant dense<0.000000e+00> : vector<16xf32>
    %12 = vector.multi_reduction <add>, %11, %cst_7 [1] : vector<16x64xf32> to vector<16xf32>
    %13 = vector.shape_cast %12 : vector<16xf32> to vector<16x1xf32>
    %cst_8 = arith.constant 6.400000e+01 : f32
    %14 = vector.broadcast %cst_8 : f32 to vector<16x1xf32>
    %15 = arith.divf %13, %14 : vector<16x1xf32>
    %cst_9 = arith.constant 9.99999974E-6 : f32
    %16 = vector.broadcast %cst_9 : f32 to vector<16x1xf32>
    %17 = arith.addf %15, %16 : vector<16x1xf32>
    %18 = math.rsqrt %17 : vector<16x1xf32>
    %19 = vector.broadcast %18 : vector<16x1xf32> to vector<16x64xf32>
    %20 = arith.mulf %10, %19 : vector<16x64xf32>
    %21 = vector.broadcast %3 : vector<1x64xf32> to vector<16x64xf32>
    %22 = arith.mulf %20, %21 : vector<16x64xf32>
    %23 = vector.broadcast %4 : vector<1x64xf32> to vector<16x64xf32>
    %24 = arith.addf %22, %23 : vector<16x64xf32>
    %25 = arith.truncf %24 : vector<16x64xf32> to vector<16x64xbf16>
    %c0_10 = arith.constant 0 : index
    %c0_11 = arith.constant 0 : index
    %26 = vector.load %arg4[%c0_10, %c0_11] : memref<64x192xbf16, #tpu.memory_space<vmem>>, vector<64x192xbf16>
    %cst_12 = arith.constant dense<0.000000e+00> : vector<16x192xf32>
    %27 = tpu.matmul %25, %26, %cst_12 {dimension_numbers = #tpu.dot_dimension_numbers<[1], [0], [0], [1], [0, 0, 1, 1], [], []>} : vector<16x64xbf16>, vector<64x192xbf16>, vector<16x192xf32> -> vector<16x192xf32>
    %c0_13 = arith.constant 0 : index
    %c0_14 = arith.constant 0 : index
    %28 = vector.load %arg5[%c0_13, %c0_14] : memref<1x192xf32, #tpu.memory_space<vmem>>, vector<1x192xf32>
    %29 = vector.broadcast %28 : vector<1x192xf32> to vector<16x192xf32>
    %30 = arith.addf %27, %29 : vector<16x192xf32>
    %31 = vector.extract_strided_slice %30 {offsets = [0, 0], sizes = [16, 64], strides = [1, 1]} : vector<16x192xf32> to vector<16x64xf32>
    %cst_15 = arith.constant 2.500000e-01 : f32
    %32 = vector.broadcast %cst_15 : f32 to vector<16x64xf32>
    %33 = arith.mulf %31, %32 : vector<16x64xf32>
    %34 = vector.extract_strided_slice %30 {offsets = [0, 64], sizes = [16, 64], strides = [1, 1]} : vector<16x192xf32> to vector<16x64xf32>
    %35 = vector.extract_strided_slice %30 {offsets = [0, 128], sizes = [16, 64], strides = [1, 1]} : vector<16x192xf32> to vector<16x64xf32>
    %c0_16 = arith.constant 0 : index
    %c0_17 = arith.constant 0 : index
    %36 = vector.load %arg7[%c0_16, %c0_17] : memref<64x64xbf16, #tpu.memory_space<vmem>>, vector<64x64xbf16>
    %c0_18 = arith.constant 0 : index
    %c0_19 = arith.constant 0 : index
    %37 = vector.load %arg8[%c0_18, %c0_19] : memref<1x64xf32, #tpu.memory_space<vmem>>, vector<1x64xf32>
    %38 = vector.broadcast %37 : vector<1x64xf32> to vector<16x64xf32>
    %39 = arith.addf %2, %38 : vector<16x64xf32>
    %40 = vector.extract_strided_slice %33 {offsets = [0, 0], sizes = [16, 16], strides = [1, 1]} : vector<16x64xf32> to vector<16x16xf32>
    %41 = arith.truncf %40 : vector<16x16xf32> to vector<16x16xbf16>
    %42 = vector.extract_strided_slice %34 {offsets = [0, 0], sizes = [16, 16], strides = [1, 1]} : vector<16x64xf32> to vector<16x16xf32>
    %43 = arith.truncf %42 : vector<16x16xf32> to vector<16x16xbf16>
    %44 = vector.extract_strided_slice %35 {offsets = [0, 0], sizes = [16, 16], strides = [1, 1]} : vector<16x64xf32> to vector<16x16xf32>
    %45 = arith.truncf %44 : vector<16x16xf32> to vector<16x16xbf16>
    "tpu.trace_start"() <{level = 10 : i32, message = "td,sd->ts"}> : () -> ()
    %cst_20 = arith.constant dense<0.000000e+00> : vector<16x16xf32>
    %46 = tpu.matmul %41, %43, %cst_20 {dimension_numbers = #tpu.dot_dimension_numbers<[1], [1], [0], [0], [0, 0, 1, 0], [], []>} : vector<16x16xbf16>, vector<16x16xbf16>, vector<16x16xf32> -> vector<16x16xf32>
    "tpu.trace_stop"() : () -> ()
    %c0_21 = arith.constant 0 : index
    %c0_22 = arith.constant 0 : index
    %c0_23 = arith.constant 0 : index
    %47 = vector.load %arg6[%c0_21, %c0_22, %c0_23] : memref<4x16x16xf32, #tpu.memory_space<vmem>>, vector<1x16x16xf32>
    %48 = vector.shape_cast %47 : vector<1x16x16xf32> to vector<16x16xf32>
    %49 = arith.addf %46, %48 : vector<16x16xf32>
    %cst_24 = arith.constant dense<0xFF800000> : vector<16xf32>
    %50 = vector.multi_reduction <maximumf>, %49, %cst_24 [1] : vector<16x16xf32> to vector<16xf32>
    %51 = vector.shape_cast %50 : vector<16xf32> to vector<16x1xf32>
    %52 = vector.broadcast %51 : vector<16x1xf32> to vector<16x16xf32>
    %53 = arith.subf %49, %52 : vector<16x16xf32>
    %54 = math.exp %53 : vector<16x16xf32>
    %cst_25 = arith.constant dense<0.000000e+00> : vector<16xf32>
    %55 = vector.multi_reduction <add>, %54, %cst_25 [1] : vector<16x16xf32> to vector<16xf32>
    %56 = vector.shape_cast %55 : vector<16xf32> to vector<16x1xf32>
    %57 = vector.broadcast %56 : vector<16x1xf32> to vector<16x16xf32>
    %58 = arith.divf %54, %57 : vector<16x16xf32>
    %59 = arith.truncf %58 : vector<16x16xf32> to vector<16x16xbf16>
    %cst_26 = arith.constant dense<0.000000e+00> : vector<16x16xf32>
    %60 = tpu.matmul %59, %45, %cst_26 {dimension_numbers = #tpu.dot_dimension_numbers<[1], [0], [0], [1], [0, 0, 1, 1], [], []>} : vector<16x16xbf16>, vector<16x16xbf16>, vector<16x16xf32> -> vector<16x16xf32>
    %61 = arith.truncf %60 : vector<16x16xf32> to vector<16x16xbf16>
    %62 = vector.extract_strided_slice %36 {offsets = [0, 0], sizes = [16, 64], strides = [1, 1]} : vector<64x64xbf16> to vector<16x64xbf16>
    %cst_27 = arith.constant dense<0.000000e+00> : vector<16x64xf32>
    %63 = tpu.matmul %61, %62, %cst_27 {dimension_numbers = #tpu.dot_dimension_numbers<[1], [0], [0], [1], [0, 0, 1, 1], [], []>} : vector<16x16xbf16>, vector<16x64xbf16>, vector<16x64xf32> -> vector<16x64xf32>
    %64 = arith.addf %39, %63 : vector<16x64xf32>
    %65 = vector.extract_strided_slice %33 {offsets = [0, 16], sizes = [16, 16], strides = [1, 1]} : vector<16x64xf32> to vector<16x16xf32>
    %66 = arith.truncf %65 : vector<16x16xf32> to vector<16x16xbf16>
    %67 = vector.extract_strided_slice %34 {offsets = [0, 16], sizes = [16, 16], strides = [1, 1]} : vector<16x64xf32> to vector<16x16xf32>
    %68 = arith.truncf %67 : vector<16x16xf32> to vector<16x16xbf16>
    %69 = vector.extract_strided_slice %35 {offsets = [0, 16], sizes = [16, 16], strides = [1, 1]} : vector<16x64xf32> to vector<16x16xf32>
    %70 = arith.truncf %69 : vector<16x16xf32> to vector<16x16xbf16>
    "tpu.trace_start"() <{level = 10 : i32, message = "td,sd->ts"}> : () -> ()
    %cst_28 = arith.constant dense<0.000000e+00> : vector<16x16xf32>
    %71 = tpu.matmul %66, %68, %cst_28 {dimension_numbers = #tpu.dot_dimension_numbers<[1], [1], [0], [0], [0, 0, 1, 0], [], []>} : vector<16x16xbf16>, vector<16x16xbf16>, vector<16x16xf32> -> vector<16x16xf32>
    "tpu.trace_stop"() : () -> ()
    %c1 = arith.constant 1 : index
    %c0_29 = arith.constant 0 : index
    %c0_30 = arith.constant 0 : index
    %72 = vector.load %arg6[%c1, %c0_29, %c0_30] : memref<4x16x16xf32, #tpu.memory_space<vmem>>, vector<1x16x16xf32>
    %73 = vector.shape_cast %72 : vector<1x16x16xf32> to vector<16x16xf32>
    %74 = arith.addf %71, %73 : vector<16x16xf32>
    %cst_31 = arith.constant dense<0xFF800000> : vector<16xf32>
    %75 = vector.multi_reduction <maximumf>, %74, %cst_31 [1] : vector<16x16xf32> to vector<16xf32>
    %76 = vector.shape_cast %75 : vector<16xf32> to vector<16x1xf32>
    %77 = vector.broadcast %76 : vector<16x1xf32> to vector<16x16xf32>
    %78 = arith.subf %74, %77 : vector<16x16xf32>
    %79 = math.exp %78 : vector<16x16xf32>
    %cst_32 = arith.constant dense<0.000000e+00> : vector<16xf32>
    %80 = vector.multi_reduction <add>, %79, %cst_32 [1] : vector<16x16xf32> to vector<16xf32>
    %81 = vector.shape_cast %80 : vector<16xf32> to vector<16x1xf32>
    %82 = vector.broadcast %81 : vector<16x1xf32> to vector<16x16xf32>
    %83 = arith.divf %79, %82 : vector<16x16xf32>
    %84 = arith.truncf %83 : vector<16x16xf32> to vector<16x16xbf16>
    %cst_33 = arith.constant dense<0.000000e+00> : vector<16x16xf32>
    %85 = tpu.matmul %84, %70, %cst_33 {dimension_numbers = #tpu.dot_dimension_numbers<[1], [0], [0], [1], [0, 0, 1, 1], [], []>} : vector<16x16xbf16>, vector<16x16xbf16>, vector<16x16xf32> -> vector<16x16xf32>
    %86 = arith.truncf %85 : vector<16x16xf32> to vector<16x16xbf16>
    %87 = vector.extract_strided_slice %36 {offsets = [16, 0], sizes = [16, 64], strides = [1, 1]} : vector<64x64xbf16> to vector<16x64xbf16>
    %cst_34 = arith.constant dense<0.000000e+00> : vector<16x64xf32>
    %88 = tpu.matmul %86, %87, %cst_34 {dimension_numbers = #tpu.dot_dimension_numbers<[1], [0], [0], [1], [0, 0, 1, 1], [], []>} : vector<16x16xbf16>, vector<16x64xbf16>, vector<16x64xf32> -> vector<16x64xf32>
    %89 = arith.addf %64, %88 : vector<16x64xf32>
    %90 = vector.extract_strided_slice %33 {offsets = [0, 32], sizes = [16, 16], strides = [1, 1]} : vector<16x64xf32> to vector<16x16xf32>
    %91 = arith.truncf %90 : vector<16x16xf32> to vector<16x16xbf16>
    %92 = vector.extract_strided_slice %34 {offsets = [0, 32], sizes = [16, 16], strides = [1, 1]} : vector<16x64xf32> to vector<16x16xf32>
    %93 = arith.truncf %92 : vector<16x16xf32> to vector<16x16xbf16>
    %94 = vector.extract_strided_slice %35 {offsets = [0, 32], sizes = [16, 16], strides = [1, 1]} : vector<16x64xf32> to vector<16x16xf32>
    %95 = arith.truncf %94 : vector<16x16xf32> to vector<16x16xbf16>
    "tpu.trace_start"() <{level = 10 : i32, message = "td,sd->ts"}> : () -> ()
    %cst_35 = arith.constant dense<0.000000e+00> : vector<16x16xf32>
    %96 = tpu.matmul %91, %93, %cst_35 {dimension_numbers = #tpu.dot_dimension_numbers<[1], [1], [0], [0], [0, 0, 1, 0], [], []>} : vector<16x16xbf16>, vector<16x16xbf16>, vector<16x16xf32> -> vector<16x16xf32>
    "tpu.trace_stop"() : () -> ()
    %c2 = arith.constant 2 : index
    %c0_36 = arith.constant 0 : index
    %c0_37 = arith.constant 0 : index
    %97 = vector.load %arg6[%c2, %c0_36, %c0_37] : memref<4x16x16xf32, #tpu.memory_space<vmem>>, vector<1x16x16xf32>
    %98 = vector.shape_cast %97 : vector<1x16x16xf32> to vector<16x16xf32>
    %99 = arith.addf %96, %98 : vector<16x16xf32>
    %cst_38 = arith.constant dense<0xFF800000> : vector<16xf32>
    %100 = vector.multi_reduction <maximumf>, %99, %cst_38 [1] : vector<16x16xf32> to vector<16xf32>
    %101 = vector.shape_cast %100 : vector<16xf32> to vector<16x1xf32>
    %102 = vector.broadcast %101 : vector<16x1xf32> to vector<16x16xf32>
    %103 = arith.subf %99, %102 : vector<16x16xf32>
    %104 = math.exp %103 : vector<16x16xf32>
    %cst_39 = arith.constant dense<0.000000e+00> : vector<16xf32>
    %105 = vector.multi_reduction <add>, %104, %cst_39 [1] : vector<16x16xf32> to vector<16xf32>
    %106 = vector.shape_cast %105 : vector<16xf32> to vector<16x1xf32>
    %107 = vector.broadcast %106 : vector<16x1xf32> to vector<16x16xf32>
    %108 = arith.divf %104, %107 : vector<16x16xf32>
    %109 = arith.truncf %108 : vector<16x16xf32> to vector<16x16xbf16>
    %cst_40 = arith.constant dense<0.000000e+00> : vector<16x16xf32>
    %110 = tpu.matmul %109, %95, %cst_40 {dimension_numbers = #tpu.dot_dimension_numbers<[1], [0], [0], [1], [0, 0, 1, 1], [], []>} : vector<16x16xbf16>, vector<16x16xbf16>, vector<16x16xf32> -> vector<16x16xf32>
    %111 = arith.truncf %110 : vector<16x16xf32> to vector<16x16xbf16>
    %112 = vector.extract_strided_slice %36 {offsets = [32, 0], sizes = [16, 64], strides = [1, 1]} : vector<64x64xbf16> to vector<16x64xbf16>
    %cst_41 = arith.constant dense<0.000000e+00> : vector<16x64xf32>
    %113 = tpu.matmul %111, %112, %cst_41 {dimension_numbers = #tpu.dot_dimension_numbers<[1], [0], [0], [1], [0, 0, 1, 1], [], []>} : vector<16x16xbf16>, vector<16x64xbf16>, vector<16x64xf32> -> vector<16x64xf32>
    %114 = arith.addf %89, %113 : vector<16x64xf32>
    %115 = vector.extract_strided_slice %33 {offsets = [0, 48], sizes = [16, 16], strides = [1, 1]} : vector<16x64xf32> to vector<16x16xf32>
    %116 = arith.truncf %115 : vector<16x16xf32> to vector<16x16xbf16>
    %117 = vector.extract_strided_slice %34 {offsets = [0, 48], sizes = [16, 16], strides = [1, 1]} : vector<16x64xf32> to vector<16x16xf32>
    %118 = arith.truncf %117 : vector<16x16xf32> to vector<16x16xbf16>
    %119 = vector.extract_strided_slice %35 {offsets = [0, 48], sizes = [16, 16], strides = [1, 1]} : vector<16x64xf32> to vector<16x16xf32>
    %120 = arith.truncf %119 : vector<16x16xf32> to vector<16x16xbf16>
    "tpu.trace_start"() <{level = 10 : i32, message = "td,sd->ts"}> : () -> ()
    %cst_42 = arith.constant dense<0.000000e+00> : vector<16x16xf32>
    %121 = tpu.matmul %116, %118, %cst_42 {dimension_numbers = #tpu.dot_dimension_numbers<[1], [1], [0], [0], [0, 0, 1, 0], [], []>} : vector<16x16xbf16>, vector<16x16xbf16>, vector<16x16xf32> -> vector<16x16xf32>
    "tpu.trace_stop"() : () -> ()
    %c3 = arith.constant 3 : index
    %c0_43 = arith.constant 0 : index
    %c0_44 = arith.constant 0 : index
    %122 = vector.load %arg6[%c3, %c0_43, %c0_44] : memref<4x16x16xf32, #tpu.memory_space<vmem>>, vector<1x16x16xf32>
    %123 = vector.shape_cast %122 : vector<1x16x16xf32> to vector<16x16xf32>
    %124 = arith.addf %121, %123 : vector<16x16xf32>
    %cst_45 = arith.constant dense<0xFF800000> : vector<16xf32>
    %125 = vector.multi_reduction <maximumf>, %124, %cst_45 [1] : vector<16x16xf32> to vector<16xf32>
    %126 = vector.shape_cast %125 : vector<16xf32> to vector<16x1xf32>
    %127 = vector.broadcast %126 : vector<16x1xf32> to vector<16x16xf32>
    %128 = arith.subf %124, %127 : vector<16x16xf32>
    %129 = math.exp %128 : vector<16x16xf32>
    %cst_46 = arith.constant dense<0.000000e+00> : vector<16xf32>
    %130 = vector.multi_reduction <add>, %129, %cst_46 [1] : vector<16x16xf32> to vector<16xf32>
    %131 = vector.shape_cast %130 : vector<16xf32> to vector<16x1xf32>
    %132 = vector.broadcast %131 : vector<16x1xf32> to vector<16x16xf32>
    %133 = arith.divf %129, %132 : vector<16x16xf32>
    %134 = arith.truncf %133 : vector<16x16xf32> to vector<16x16xbf16>
    %cst_47 = arith.constant dense<0.000000e+00> : vector<16x16xf32>
    %135 = tpu.matmul %134, %120, %cst_47 {dimension_numbers = #tpu.dot_dimension_numbers<[1], [0], [0], [1], [0, 0, 1, 1], [], []>} : vector<16x16xbf16>, vector<16x16xbf16>, vector<16x16xf32> -> vector<16x16xf32>
    %136 = arith.truncf %135 : vector<16x16xf32> to vector<16x16xbf16>
    %137 = vector.extract_strided_slice %36 {offsets = [48, 0], sizes = [16, 64], strides = [1, 1]} : vector<64x64xbf16> to vector<16x64xbf16>
    %cst_48 = arith.constant dense<0.000000e+00> : vector<16x64xf32>
    %138 = tpu.matmul %136, %137, %cst_48 {dimension_numbers = #tpu.dot_dimension_numbers<[1], [0], [0], [1], [0, 0, 1, 1], [], []>} : vector<16x16xbf16>, vector<16x64xbf16>, vector<16x64xf32> -> vector<16x64xf32>
    %139 = arith.addf %114, %138 : vector<16x64xf32>
    %c0_49 = arith.constant 0 : index
    %c0_50 = arith.constant 0 : index
    %140 = vector.load %arg9[%c0_49, %c0_50] : memref<1x64xf32, #tpu.memory_space<vmem>>, vector<1x64xf32>
    %c0_51 = arith.constant 0 : index
    %c0_52 = arith.constant 0 : index
    %141 = vector.load %arg10[%c0_51, %c0_52] : memref<1x64xf32, #tpu.memory_space<vmem>>, vector<1x64xf32>
    %cst_53 = arith.constant dense<0.000000e+00> : vector<16xf32>
    %142 = vector.multi_reduction <add>, %139, %cst_53 [1] : vector<16x64xf32> to vector<16xf32>
    %143 = vector.shape_cast %142 : vector<16xf32> to vector<16x1xf32>
    %cst_54 = arith.constant 6.400000e+01 : f32
    %144 = vector.broadcast %cst_54 : f32 to vector<16x1xf32>
    %145 = arith.divf %143, %144 : vector<16x1xf32>
    %146 = vector.broadcast %145 : vector<16x1xf32> to vector<16x64xf32>
    %147 = arith.subf %139, %146 : vector<16x64xf32>
    %148 = arith.mulf %147, %147 : vector<16x64xf32>
    %cst_55 = arith.constant dense<0.000000e+00> : vector<16xf32>
    %149 = vector.multi_reduction <add>, %148, %cst_55 [1] : vector<16x64xf32> to vector<16xf32>
    %150 = vector.shape_cast %149 : vector<16xf32> to vector<16x1xf32>
    %cst_56 = arith.constant 6.400000e+01 : f32
    %151 = vector.broadcast %cst_56 : f32 to vector<16x1xf32>
    %152 = arith.divf %150, %151 : vector<16x1xf32>
    %cst_57 = arith.constant 9.99999974E-6 : f32
    %153 = vector.broadcast %cst_57 : f32 to vector<16x1xf32>
    %154 = arith.addf %152, %153 : vector<16x1xf32>
    %155 = math.rsqrt %154 : vector<16x1xf32>
    %156 = vector.broadcast %155 : vector<16x1xf32> to vector<16x64xf32>
    %157 = arith.mulf %147, %156 : vector<16x64xf32>
    %158 = vector.broadcast %140 : vector<1x64xf32> to vector<16x64xf32>
    %159 = arith.mulf %157, %158 : vector<16x64xf32>
    %160 = vector.broadcast %141 : vector<1x64xf32> to vector<16x64xf32>
    %161 = arith.addf %159, %160 : vector<16x64xf32>
    %162 = arith.truncf %161 : vector<16x64xf32> to vector<16x64xbf16>
    %c0_58 = arith.constant 0 : index
    %c0_59 = arith.constant 0 : index
    %163 = vector.load %arg11[%c0_58, %c0_59] : memref<64x256xbf16, #tpu.memory_space<vmem>>, vector<64x256xbf16>
    %cst_60 = arith.constant dense<0.000000e+00> : vector<16x256xf32>
    %164 = tpu.matmul %162, %163, %cst_60 {dimension_numbers = #tpu.dot_dimension_numbers<[1], [0], [0], [1], [0, 0, 1, 1], [], []>} : vector<16x64xbf16>, vector<64x256xbf16>, vector<16x256xf32> -> vector<16x256xf32>
    %c0_61 = arith.constant 0 : index
    %c0_62 = arith.constant 0 : index
    %165 = vector.load %arg12[%c0_61, %c0_62] : memref<1x256xf32, #tpu.memory_space<vmem>>, vector<1x256xf32>
    %166 = vector.broadcast %165 : vector<1x256xf32> to vector<16x256xf32>
    %167 = arith.addf %164, %166 : vector<16x256xf32>
    %cst_63 = arith.constant 5.000000e-01 : f32
    %168 = vector.broadcast %cst_63 : f32 to vector<16x256xf32>
    %169 = arith.mulf %168, %167 : vector<16x256xf32>
    %cst_64 = arith.constant 4.471500e-02 : f32
    %170 = vector.broadcast %cst_64 : f32 to vector<16x256xf32>
    %171 = arith.mulf %170, %167 : vector<16x256xf32>
    %172 = arith.mulf %171, %167 : vector<16x256xf32>
    %173 = arith.mulf %172, %167 : vector<16x256xf32>
    %174 = arith.addf %167, %173 : vector<16x256xf32>
    %cst_65 = arith.constant 0.797884583 : f32
    %175 = vector.broadcast %cst_65 : f32 to vector<16x256xf32>
    %176 = arith.mulf %175, %174 : vector<16x256xf32>
    %177 = math.tanh %176 : vector<16x256xf32>
    %cst_66 = arith.constant 1.000000e+00 : f32
    %178 = vector.broadcast %cst_66 : f32 to vector<16x256xf32>
    %179 = arith.addf %178, %177 : vector<16x256xf32>
    %180 = arith.mulf %169, %179 : vector<16x256xf32>
    %181 = arith.truncf %180 : vector<16x256xf32> to vector<16x256xbf16>
    %c0_67 = arith.constant 0 : index
    %c0_68 = arith.constant 0 : index
    %182 = vector.load %arg13[%c0_67, %c0_68] : memref<256x64xbf16, #tpu.memory_space<vmem>>, vector<256x64xbf16>
    %cst_69 = arith.constant dense<0.000000e+00> : vector<16x64xf32>
    %183 = tpu.matmul %181, %182, %cst_69 {dimension_numbers = #tpu.dot_dimension_numbers<[1], [0], [0], [1], [0, 0, 1, 1], [], []>} : vector<16x256xbf16>, vector<256x64xbf16>, vector<16x64xf32> -> vector<16x64xf32>
    %184 = arith.addf %139, %183 : vector<16x64xf32>
    %c0_70 = arith.constant 0 : index
    %c0_71 = arith.constant 0 : index
    %185 = vector.load %arg14[%c0_70, %c0_71] : memref<1x64xf32, #tpu.memory_space<vmem>>, vector<1x64xf32>
    %186 = vector.broadcast %185 : vector<1x64xf32> to vector<16x64xf32>
    %187 = arith.addf %184, %186 : vector<16x64xf32>
    %188 = arith.truncf %187 : vector<16x64xf32> to vector<16x64xbf16>
    %c0_72 = arith.constant 0 : index
    %c0_73 = arith.constant 0 : index
    %c0_74 = arith.constant 0 : index
    %189 = vector.load %arg15[%c0_72, %c0_73, %c0_74] : memref<1x16x64xbf16, #tpu.memory_space<vmem>>, vector<1x16x64xbf16>
    %190 = vector.shape_cast %189 : vector<1x16x64xbf16> to vector<16x64xbf16>
    %191 = vector.shape_cast %188 : vector<16x64xbf16> to vector<1x16x64xbf16>
    tpu.vector_store %arg15[%c0_72, %c0_73, %c0_74], %191 {strides = array<i32>} : memref<1x16x64xbf16, #tpu.memory_space<vmem>>, vector<1x16x64xbf16>,
    return
  }
  func.func @transform_0(%arg0: i32) -> (i32, i32, i32) {
    %c0_i32 = arith.constant 0 : i32
    %c0_i32_0 = arith.constant 0 : i32
    %c0_i32_1 = arith.constant 0 : i32
    return %arg0, %c0_i32, %c0_i32_0 : i32, i32, i32
  }
  func.func @transform_1(%arg0: i32) -> (i32, i32) {
    %c0_i32 = arith.constant 0 : i32
    %c0_i32_0 = arith.constant 0 : i32
    %c0_i32_1 = arith.constant 0 : i32
    return %c0_i32, %c0_i32_0 : i32, i32
  }
  func.func @transform_2(%arg0: i32) -> (i32, i32) {
    %c0_i32 = arith.constant 0 : i32
    %c0_i32_0 = arith.constant 0 : i32
    %c0_i32_1 = arith.constant 0 : i32
    return %c0_i32, %c0_i32_0 : i32, i32
  }
  func.func @transform_3(%arg0: i32) -> (i32, i32) {
    %c0_i32 = arith.constant 0 : i32
    %c0_i32_0 = arith.constant 0 : i32
    %c0_i32_1 = arith.constant 0 : i32
    return %c0_i32, %c0_i32_0 : i32, i32
  }
  func.func @transform_4(%arg0: i32) -> (i32, i32) {
    %c0_i32 = arith.constant 0 : i32
    %c0_i32_0 = arith.constant 0 : i32
    %c0_i32_1 = arith.constant 0 : i32
    return %c0_i32, %c0_i32_0 : i32, i32
  }
  func.func @transform_5(%arg0: i32) -> (i32, i32, i32) {
    %c0_i32 = arith.constant 0 : i32
    %c0_i32_0 = arith.constant 0 : i32
    %c0_i32_1 = arith.constant 0 : i32
    %c0_i32_2 = arith.constant 0 : i32
    return %c0_i32, %c0_i32_0, %c0_i32_1 : i32, i32, i32
  }
  func.func @transform_6(%arg0: i32) -> (i32, i32) {
    %c0_i32 = arith.constant 0 : i32
    %c0_i32_0 = arith.constant 0 : i32
    %c0_i32_1 = arith.constant 0 : i32
    return %c0_i32, %c0_i32_0 : i32, i32
  }
  func.func @transform_7(%arg0: i32) -> (i32, i32) {
    %c0_i32 = arith.constant 0 : i32
    %c0_i32_0 = arith.constant 0 : i32
    %c0_i32_1 = arith.constant 0 : i32
    return %c0_i32, %c0_i32_0 : i32, i32
  }
  func.func @transform_8(%arg0: i32) -> (i32, i32) {
    %c0_i32 = arith.constant 0 : i32
    %c0_i32_0 = arith.constant 0 : i32
    %c0_i32_1 = arith.constant 0 : i32
    return %c0_i32, %c0_i32_0 : i32, i32
  }
  func.func @transform_9(%arg0: i32) -> (i32, i32) {
    %c0_i32 = arith.constant 0 : i32
    %c0_i32_0 = arith.constant 0 : i32
    %c0_i32_1 = arith.constant 0 : i32
    return %c0_i32, %c0_i32_0 : i32, i32
  }
  func.func @transform_10(%arg0: i32) -> (i32, i32) {
    %c0_i32 = arith.constant 0 : i32
    %c0_i32_0 = arith.constant 0 : i32
    %c0_i32_1 = arith.constant 0 : i32
    return %c0_i32, %c0_i32_0 : i32, i32
  }
  func.func @transform_11(%arg0: i32) -> (i32, i32) {
    %c0_i32 = arith.constant 0 : i32
    %c0_i32_0 = arith.constant 0 : i32
    %c0_i32_1 = arith.constant 0 : i32
    return %c0_i32, %c0_i32_0 : i32, i32
  }
  func.func @transform_12(%arg0: i32) -> (i32, i32) {
    %c0_i32 = arith.constant 0 : i32
    %c0_i32_0 = arith.constant 0 : i32
    %c0_i32_1 = arith.constant 0 : i32
    return %c0_i32, %c0_i32_0 : i32, i32
  }
  func.func @transform_13(%arg0: i32) -> (i32, i32) {
    %c0_i32 = arith.constant 0 : i32
    %c0_i32_0 = arith.constant 0 : i32
    %c0_i32_1 = arith.constant 0 : i32
    return %c0_i32, %c0_i32_0 : i32, i32
  }
  func.func @transform_14(%arg0: i32) -> (i32, i32, i32) {
    %c0_i32 = arith.constant 0 : i32
    %c0_i32_0 = arith.constant 0 : i32
    %c0_i32_1 = arith.constant 0 : i32
    return %arg0, %c0_i32, %c0_i32_0 : i32, i32, i32
  }
}

module attributes {stable_mosaic.version = 11 : i64} {
  func.func @_head_kernel(%arg0: i32, %arg1: memref<2x16x64xbf16, #tpu.memory_space<vmem>>, %arg2: memref<1x64xf32, #tpu.memory_space<vmem>>, %arg3: memref<1x64xf32, #tpu.memory_space<vmem>>, %arg4: memref<64x10xbf16, #tpu.memory_space<vmem>>, %arg5: memref<1x10xf32, #tpu.memory_space<vmem>>, %arg6: memref<2x10xf32, #tpu.memory_space<vmem>>) attributes {dimension_semantics = [#tpu.dimension_semantics<arbitrary>], iteration_bounds = array<i64: 1>, scalar_prefetch = 0 : i64, scratch_operands = 0 : i64, tpu.core_type = #tpu.core_type<tc>, window_params = [{pipeline_mode = #tpu.pipeline_mode<synchronous>, transform_indices = @transform_0, window_bounds = array<i64: 2, 16, 64>}, {pipeline_mode = #tpu.pipeline_mode<synchronous>, transform_indices = @transform_1, window_bounds = array<i64: 1, 64>}, {pipeline_mode = #tpu.pipeline_mode<synchronous>, transform_indices = @transform_2, window_bounds = array<i64: 1, 64>}, {pipeline_mode = #tpu.pipeline_mode<synchronous>, transform_indices = @transform_3, window_bounds = array<i64: 64, 10>}, {pipeline_mode = #tpu.pipeline_mode<synchronous>, transform_indices = @transform_4, window_bounds = array<i64: 1, 10>}, {pipeline_mode = #tpu.pipeline_mode<synchronous>, transform_indices = @transform_5, window_bounds = array<i64: 2, 10>}]} {
    %c0 = arith.constant 0 : index
    %c0_0 = arith.constant 0 : index
    %c0_1 = arith.constant 0 : index
    %0 = vector.load %arg1[%c0, %c0_0, %c0_1] : memref<2x16x64xbf16, #tpu.memory_space<vmem>>, vector<2x16x64xbf16>
    %1 = arith.extf %0 : vector<2x16x64xbf16> to vector<2x16x64xf32>
    %c0_2 = arith.constant 0 : index
    %c0_3 = arith.constant 0 : index
    %2 = vector.load %arg2[%c0_2, %c0_3] : memref<1x64xf32, #tpu.memory_space<vmem>>, vector<1x64xf32>
    %c0_4 = arith.constant 0 : index
    %c0_5 = arith.constant 0 : index
    %3 = vector.load %arg3[%c0_4, %c0_5] : memref<1x64xf32, #tpu.memory_space<vmem>>, vector<1x64xf32>
    %cst = arith.constant dense<0.000000e+00> : vector<2x16xf32>
    %4 = vector.multi_reduction <add>, %1, %cst [2] : vector<2x16x64xf32> to vector<2x16xf32>
    %5 = vector.shape_cast %4 : vector<2x16xf32> to vector<2x16x1xf32>
    %cst_6 = arith.constant 6.400000e+01 : f32
    %6 = vector.broadcast %cst_6 : f32 to vector<2x16x1xf32>
    %7 = arith.divf %5, %6 : vector<2x16x1xf32>
    %8 = vector.broadcast %7 : vector<2x16x1xf32> to vector<2x16x64xf32>
    %9 = arith.subf %1, %8 : vector<2x16x64xf32>
    %10 = arith.mulf %9, %9 : vector<2x16x64xf32>
    %cst_7 = arith.constant dense<0.000000e+00> : vector<2x16xf32>
    %11 = vector.multi_reduction <add>, %10, %cst_7 [2] : vector<2x16x64xf32> to vector<2x16xf32>
    %12 = vector.shape_cast %11 : vector<2x16xf32> to vector<2x16x1xf32>
    %cst_8 = arith.constant 6.400000e+01 : f32
    %13 = vector.broadcast %cst_8 : f32 to vector<2x16x1xf32>
    %14 = arith.divf %12, %13 : vector<2x16x1xf32>
    %cst_9 = arith.constant 9.99999974E-6 : f32
    %15 = vector.broadcast %cst_9 : f32 to vector<2x16x1xf32>
    %16 = arith.addf %14, %15 : vector<2x16x1xf32>
    %17 = math.rsqrt %16 : vector<2x16x1xf32>
    %18 = vector.broadcast %17 : vector<2x16x1xf32> to vector<2x16x64xf32>
    %19 = arith.mulf %9, %18 : vector<2x16x64xf32>
    %20 = vector.shape_cast %2 : vector<1x64xf32> to vector<1x1x64xf32>
    %21 = vector.broadcast %20 : vector<1x1x64xf32> to vector<2x16x64xf32>
    %22 = arith.mulf %19, %21 : vector<2x16x64xf32>
    %23 = vector.shape_cast %3 : vector<1x64xf32> to vector<1x1x64xf32>
    %24 = vector.broadcast %23 : vector<1x1x64xf32> to vector<2x16x64xf32>
    %25 = arith.addf %22, %24 : vector<2x16x64xf32>
    %cst_10 = arith.constant dense<0.000000e+00> : vector<2x64xf32>
    %26 = vector.multi_reduction <add>, %25, %cst_10 [1] : vector<2x16x64xf32> to vector<2x64xf32>
    %cst_11 = arith.constant 1.600000e+01 : f32
    %27 = vector.broadcast %cst_11 : f32 to vector<2x64xf32>
    %28 = arith.divf %26, %27 : vector<2x64xf32>
    %29 = arith.truncf %28 : vector<2x64xf32> to vector<2x64xbf16>
    %c0_12 = arith.constant 0 : index
    %c0_13 = arith.constant 0 : index
    %30 = vector.load %arg4[%c0_12, %c0_13] : memref<64x10xbf16, #tpu.memory_space<vmem>>, vector<64x10xbf16>
    %cst_14 = arith.constant dense<0.000000e+00> : vector<2x10xf32>
    %31 = tpu.matmul %29, %30, %cst_14 {dimension_numbers = #tpu.dot_dimension_numbers<[1], [0], [0], [1], [0, 0, 1, 1], [], []>} : vector<2x64xbf16>, vector<64x10xbf16>, vector<2x10xf32> -> vector<2x10xf32>
    %c0_15 = arith.constant 0 : index
    %c0_16 = arith.constant 0 : index
    %32 = vector.load %arg5[%c0_15, %c0_16] : memref<1x10xf32, #tpu.memory_space<vmem>>, vector<1x10xf32>
    %33 = vector.broadcast %32 : vector<1x10xf32> to vector<2x10xf32>
    %34 = arith.addf %31, %33 : vector<2x10xf32>
    %c0_17 = arith.constant 0 : index
    %c0_18 = arith.constant 0 : index
    %35 = vector.load %arg6[%c0_17, %c0_18] : memref<2x10xf32, #tpu.memory_space<vmem>>, vector<2x10xf32>
    tpu.vector_store %arg6[%c0_17, %c0_18], %34 {strides = array<i32>} : memref<2x10xf32, #tpu.memory_space<vmem>>, vector<2x10xf32>,
    return
  }
  func.func @transform_0(%arg0: i32) -> (i32, i32, i32) {
    %c0_i32 = arith.constant 0 : i32
    %c0_i32_0 = arith.constant 0 : i32
    %c0_i32_1 = arith.constant 0 : i32
    %c0_i32_2 = arith.constant 0 : i32
    return %c0_i32, %c0_i32_0, %c0_i32_1 : i32, i32, i32
  }
  func.func @transform_1(%arg0: i32) -> (i32, i32) {
    %c0_i32 = arith.constant 0 : i32
    %c0_i32_0 = arith.constant 0 : i32
    %c0_i32_1 = arith.constant 0 : i32
    return %c0_i32, %c0_i32_0 : i32, i32
  }
  func.func @transform_2(%arg0: i32) -> (i32, i32) {
    %c0_i32 = arith.constant 0 : i32
    %c0_i32_0 = arith.constant 0 : i32
    %c0_i32_1 = arith.constant 0 : i32
    return %c0_i32, %c0_i32_0 : i32, i32
  }
  func.func @transform_3(%arg0: i32) -> (i32, i32) {
    %c0_i32 = arith.constant 0 : i32
    %c0_i32_0 = arith.constant 0 : i32
    %c0_i32_1 = arith.constant 0 : i32
    return %c0_i32, %c0_i32_0 : i32, i32
  }
  func.func @transform_4(%arg0: i32) -> (i32, i32) {
    %c0_i32 = arith.constant 0 : i32
    %c0_i32_0 = arith.constant 0 : i32
    %c0_i32_1 = arith.constant 0 : i32
    return %c0_i32, %c0_i32_0 : i32, i32
  }
  func.func @transform_5(%arg0: i32) -> (i32, i32) {
    %c0_i32 = arith.constant 0 : i32
    %c0_i32_0 = arith.constant 0 : i32
    %c0_i32_1 = arith.constant 0 : i32
    return %c0_i32, %c0_i32_0 : i32, i32
  }
}

</mosaic_0001>

<bundles_post_ra>
// kernel: swint_forward.7
= control target key start
LH: loop header
LB: loop body
LE: loop exit
PB: predicated region body
PF: predicated region fallthrough
CT: control target
= control target key end

     0   :  { %s802_s18 = smov 0   ;;  %s1002_s0 = inlined_call_operand.vmem [shape: bf16[128,128], index: 0, kind: input, shape index: {}]   ;;  %s1003_s1 = inlined_call_operand.vmem [shape: bf16[128,32], index: 1, kind: input, shape index: {}]   ;;  %s1004_s2 = inlined_call_operand.vmem [shape: f32[1,32], index: 2, kind: input, shape index: {}]   ;;  %s1005_s3 = inlined_call_operand.vmem [shape: f32[1,32], index: 3, kind: input, shape index: {}]   ;;  %s1006_s4 = inlined_call_operand.vmem [shape: f32[1,32], index: 4, kind: input, shape index: {}]   ;;  %s1007_s5 = inlined_call_operand.vmem [shape: bf16[128,32], index: 5, kind: output, shape index: {}]  }
   0x1 LB: > { %s638_s19 = sadd.s32 4294967295, %s769_s18   ;;  %p642_p0 = scmp.ge.s32.totalorder %s769_s18, 1  ;;  %s769_s18 = sphi %s802_s18, %s15_s18  }
   0x2   : > { %p188_p1 = scmp.lt.s32.totalorder %s769_s18, 3 }
   0x4   : > { %p189_p2 = pnand %p642_p0, %p188_p1 }
   0x5   : > { %s643_s28 = sshll.u32 (!%p189_p2), %s638_s19, 3 }
   0x6   : > { %192 = sbr.rel (%p189_p2) target bundleno = 465 (0x1d1), region = 40  ;;  %p217_p3 = scmp.lt.s32.totalorder (!%p189_p2), %s643_s28, 15 }
   0xb   : > { %v708_v0 = vld [vmem:[%s1003_s1 + $0x38] sm:$0xff]  ;;  %v707_v1 = vld [vmem:[%s1003_s1 + $0x30] sm:$0xff]  ;;  %v706_v2 = vld [vmem:[%s1003_s1 + $0x28] sm:$0xff]  ;;  %s1009_s28 = smov (!%p217_p3, %s643_s28), 15  ;;  %vm359_vm0 = vcmask 261120   ;;  %v771_v37 = vmov 32.0  }
   0xc   : > { %328 = vmatpush.bf16.msra.mxu0 %v708_v0  ;;  %709 = vmatpush.bf16.msra.mxu1 %v708_v0  ;;  %v705_v3 = vld [vmem:[%s1003_s1 + $0x20] sm:$0xff]  ;;  %v704_v4 = vld [vmem:[%s1003_s1 + $0x18] sm:$0xff]  ;;  %v703_v5 = vld [vmem:[%s1003_s1 + $0x10] sm:$0xff]  ;;  %s644_s10 = sshll.u32 %s1009_s28, 2  ;;  %745 = vrcp.f32 %v771_v37  ;;  %vm573_vm8 = vcmask 257024  }
   0xd   : > { %710 = vmatpush.bf16.msra.mxu2 %v708_v0  ;;  %711 = vmatpush.bf16.msra.mxu3 %v708_v0  ;;  %v702_v6 = vld [vmem:[%s1003_s1 + $0x8] sm:$0xff]  ;;  %v701_v7 = vld [vmem:[%s1003_s1] sm:$0xff]  ;;  %s220_s15 = scalar_lea.vmem %s1002_s0, %s644_s10  ;;  %s951_s25 = scalar_lea.vmem %s1007_s5, %s644_s10 }
   0xe   : > { %v697_v8 = vld [vmem:[%s220_s15] sm:$0xff]  ;;  %v698_v9 = vld [vmem:[%s220_s15 + $0x8] sm:$0xff]  ;;  %v699_v10 = vld [vmem:[%s220_s15 + $0x10] sm:$0xff] }
   0xf   : > { %v700_v11 = vld [vmem:[%s220_s15 + $0x18] sm:$0xff]  ;;  %v742_v12 = vld [vmem:[%s1004_s2] ss:$0 sm:$0xff] }
  0x10   : > { %329 = vmatpush.bf16.msra.mxu0 %v707_v1  ;;  %712 = vmatpush.bf16.msra.mxu1 %v707_v1 }
  0x11   : > { %713 = vmatpush.bf16.msra.mxu2 %v707_v1  ;;  %714 = vmatpush.bf16.msra.mxu3 %v707_v1 }
  0x12   : > { %v746_v38 = vpop.eup %745 }
  0x13   : > { %v385_v39 = vmul.f32 32.0, %v746_v38  ;;  %vm389_vm1 = vweird.f32 %v746_v38 }
  0x14   : > { %330 = vmatpush.bf16.msra.mxu0 %v706_v2  ;;  %715 = vmatpush.bf16.msra.mxu1 %v706_v2 }
  0x15   : > { %716 = vmatpush.bf16.msra.mxu2 %v706_v2  ;;  %717 = vmatpush.bf16.msra.mxu3 %v706_v2  ;;  %v386_v40 = vsub.f32 1.0, %v385_v39 }
  0x17   : > { %v387_v41 = vmul.f32 %v746_v38, %v386_v40 }
  0x18   : > { %331 = vmatpush.bf16.msra.mxu0 %v705_v3  ;;  %718 = vmatpush.bf16.msra.mxu1 %v705_v3 }
  0x19   : > { %719 = vmatpush.bf16.msra.mxu2 %v705_v3  ;;  %720 = vmatpush.bf16.msra.mxu3 %v705_v3  ;;  %v388_v42 = vadd.f32 %v746_v38, %v387_v41 }
  0x1b   : > { %v853_v43 = vsel %vm389_vm1, %v746_v38, %v388_v42 }
  0x1c   : > { %332 = vmatpush.bf16.msra.mxu0 %v704_v4  ;;  %721 = vmatpush.bf16.msra.mxu1 %v704_v4 }
  0x1d   : > { %722 = vmatpush.bf16.msra.mxu2 %v704_v4  ;;  %723 = vmatpush.bf16.msra.mxu3 %v704_v4 }
  0x20   : > { %333 = vmatpush.bf16.msra.mxu0 %v703_v5  ;;  %724 = vmatpush.bf16.msra.mxu1 %v703_v5 }
  0x21   : > { %725 = vmatpush.bf16.msra.mxu2 %v703_v5  ;;  %726 = vmatpush.bf16.msra.mxu3 %v703_v5 }
  0x24   : > { %334 = vmatpush.bf16.msra.mxu0 %v702_v6  ;;  %727 = vmatpush.bf16.msra.mxu1 %v702_v6 }
  0x25   : > { %728 = vmatpush.bf16.msra.mxu2 %v702_v6  ;;  %729 = vmatpush.bf16.msra.mxu3 %v702_v6 }
  0x28   : > { %335 = vmatpush.bf16.msra.mxu0 %v701_v7  ;;  %730 = vmatpush.bf16.msra.mxu1 %v701_v7 }
  0x29   : > { %731 = vmatpush.bf16.msra.mxu2 %v701_v7  ;;  %732 = vmatpush.bf16.msra.mxu3 %v701_v7 }
  0x2b   : > { %336 = vmatmul.bf16.vlgmr.msra.gmra.mxu0 %v697_v8  ;;  %341 = vmatmul.bf16.vlgmr.msra.gmra.mxu1 %v698_v9 }
  0x2c   : > { %346 = vmatmul.bf16.vlgmr.msra.gmra.mxu2 %v699_v10  ;;  %351 = vmatmul.bf16.vlgmr.msra.gmra.mxu3 %v700_v11 }
  0xa8   : > { %v337_v13 = vpop.f32.mrf.mxu0  ;;  %v342_v14 = vpop.f32.mrf.mxu1 }
  0xa9   : > { %v338_v15 = vadd.f32 %v742_v12, %v337_v13  ;;  %v343_v16 = vadd.f32 %v742_v12, %v342_v14 }
  0xab   : > { %v366_v17 = vsel %vm359_vm0, %v343_v16, 0.0  ;;  %v360_v18 = vsel %vm359_vm0, %v338_v15, 0.0 }
  0xac   : > { %367 = vadd.xlane.f32.xlu1 %v366_v17  ;;  %361 = vadd.xlane.f32.xlu0 %v360_v18 }
  0xaf   : > { %v347_v19 = vpop.f32.mrf.mxu2  ;;  %v352_v20 = vpop.f32.mrf.mxu3 }
  0xb0   : > { %v348_v21 = vadd.f32 %v742_v12, %v347_v19  ;;  %v339_v22 = vpop.f32.mrf.mxu0  ;;  %v344_v23 = vpop.f32.mrf.mxu1  ;;  %v353_v29 = vadd.f32 %v742_v12, %v352_v20 }
  0xb1   : > { %v340_v24 = vadd.f32 %v742_v12, %v339_v22  ;;  %v345_v25 = vadd.f32 %v742_v12, %v344_v23 }
  0xb2   : > { %v372_v26 = vsel %vm359_vm0, %v348_v21, 0.0  ;;  %v378_v36 = vsel %vm359_vm0, %v353_v29, 0.0 }
  0xb3   : > { %373 = vadd.xlane.f32.xlu2 %v372_v26  ;;  %v369_v27 = vsel %vm359_vm0, %v345_v25, 0.0  ;;  %v363_v28 = vsel %vm359_vm0, %v340_v24, 0.0 }
  0xb4   : > { %370 = vadd.xlane.f32.xlu1 %v369_v27  ;;  %364 = vadd.xlane.f32.xlu0 %v363_v28 }
  0xb7   : > { %v349_v30 = vpop.f32.mrf.mxu2  ;;  %v354_v31 = vpop.f32.mrf.mxu3 }
  0xb8   : > { %v350_v32 = vadd.f32 %v742_v12, %v349_v30  ;;  %v355_v33 = vadd.f32 %v742_v12, %v354_v31 }
  0xba   : > { %v375_v34 = vsel %vm359_vm0, %v350_v32, 0.0  ;;  %v381_v35 = vsel %vm359_vm0, %v355_v33, 0.0 }
  0xbb   : > { %376 = vadd.xlane.f32.xlu2 %v375_v34 }
  0xbc   : > { %382 = vadd.xlane.f32.xlu1 %v381_v35  ;;  %379 = vadd.xlane.f32.xlu0 %v378_v36 }
 0x11f   : > { %v368_v44 = vpop.xlane.xlu1 %367  ;;  %v362_v45 = vpop.xlane.xlu0 %361 }
 0x120   : > { %v393_v46 = vmul.f32 %v853_v43, %v368_v44  ;;  %v391_v47 = vmul.f32 %v853_v43, %v362_v45 }
 0x122   : > { %v857_v48 = vsub.f32 %v343_v16, %v393_v46  ;;  %v859_v49 = vsub.f32 %v338_v15, %v391_v47 }
 0x124   : > { %v409_v50 = vmul.f32 %v857_v48, %v857_v48  ;;  %v407_v51 = vmul.f32 %v859_v49, %v859_v49 }
 0x126   : > { %v374_v52 = vpop.xlane.xlu2 %373  ;;  %v421_v53 = vsel %vm359_vm0, %v409_v50, 0.0  ;;  %v415_v54 = vsel %vm359_vm0, %v407_v51, 0.0 }
 0x127   : > { %v395_v55 = vmul.f32 %v853_v43, %v374_v52  ;;  %422 = vadd.xlane.f32.xlu1 %v421_v53  ;;  %v371_v56 = vpop.xlane.xlu1 %370  ;;  %416 = vadd.xlane.f32.xlu2 %v415_v54  ;;  %v365_v57 = vpop.xlane.xlu0 %364 }
 0x128   : > { %v394_v58 = vmul.f32 %v853_v43, %v371_v56  ;;  %v392_v60 = vmul.f32 %v853_v43, %v365_v57 }
 0x129   : > { %v869_v59 = vsub.f32 %v348_v21, %v395_v55 }
 0x12a   : > { %v872_v61 = vsub.f32 %v345_v25, %v394_v58  ;;  %v878_v0 = vsub.f32 %v340_v24, %v392_v60  ;;  %v928_v60 = vld [vmem:[%s1005_s3] ss:$0 sm:$0xff] }
 0x12b   : > { %v411_v62 = vmul.f32 %v869_v59, %v869_v59 }
 0x12c   : > { %v410_v63 = vmul.f32 %v872_v61, %v872_v61  ;;  %v408_v10 = vmul.f32 %v878_v0, %v878_v0 }
 0x12d   : > { %v427_v1 = vsel %vm359_vm0, %v411_v62, 0.0 }
 0x12e   : > { %v377_v2 = vpop.xlane.xlu2 %376  ;;  %428 = vadd.xlane.f32.xlu0 %v427_v1  ;;  %v424_v3 = vsel %vm359_vm0, %v410_v63, 0.0  ;;  %v418_v16 = vsel %vm359_vm0, %v408_v10, 0.0 }
 0x12f   : > { %v396_v4 = vmul.f32 %v853_v43, %v377_v2  ;;  %v383_v5 = vpop.xlane.xlu1 %382  ;;  %425 = vadd.xlane.f32.xlu2 %v424_v3  ;;  %v380_v6 = vpop.xlane.xlu0 %379  ;;  %v935_v3 = vld [vmem:[%s1006_s4] ss:$0 sm:$0xff] }
 0x130   : > { %v397_v7 = vmul.f32 %v853_v43, %v380_v6  ;;  %v398_v9 = vmul.f32 %v853_v43, %v383_v5 }
 0x131   : > { %v884_v8 = vsub.f32 %v350_v32, %v396_v4 }
 0x132   : > { %v889_v11 = vsub.f32 %v353_v29, %v397_v7  ;;  %v895_v14 = vsub.f32 %v355_v33, %v398_v9 }
 0x133   : > { %v412_v12 = vmul.f32 %v884_v8, %v884_v8 }
 0x134   : > { %v413_v13 = vmul.f32 %v889_v11, %v889_v11  ;;  %v414_v18 = vmul.f32 %v895_v14, %v895_v14 }
 0x135   : > { %v430_v15 = vsel %vm359_vm0, %v412_v12, 0.0 }
 0x136   : > { %431 = vadd.xlane.f32.xlu1 %v430_v15  ;;  %419 = vadd.xlane.f32.xlu0 %v418_v16  ;;  %v433_v17 = vsel %vm359_vm0, %v413_v13, 0.0  ;;  %v436_v19 = vsel %vm359_vm0, %v414_v18, 0.0 }
 0x137   : > { %434 = vadd.xlane.f32.xlu2 %v433_v17 }
 0x13e   : > { %437 = vadd.xlane.f32.xlu0 %v436_v19 }
 0x19a   : > { %v423_v20 = vpop.xlane.xlu1 %422  ;;  %v417_v21 = vpop.xlane.xlu2 %416 }
 0x19b   : > { %v441_v22 = vmul.f32 %v423_v20, %v853_v43  ;;  %v439_v23 = vmul.f32 %v417_v21, %v853_v43 }
 0x19d   : > { %v449_v24 = vadd.f32 1e-05, %v441_v22  ;;  %v447_v25 = vadd.f32 1e-05, %v439_v23 }
 0x19f   : > { %747 = vrsqrt.f32 %v449_v24  ;;  %vm481_vm4 = vweird.f32 %v449_v24  ;;  %vm461_vm6 = vweird.f32 %v447_v25 }
 0x1a0   : > { %749 = vrsqrt.f32 %v447_v25 }
 0x1a1   : > { %v429_v26 = vpop.xlane.xlu0 %428 }
 0x1a2   : > { %v443_v27 = vmul.f32 %v429_v26, %v853_v43  ;;  %v426_v28 = vpop.xlane.xlu2 %425 }
 0x1a3   : > { %v442_v29 = vmul.f32 %v426_v28, %v853_v43 }
 0x1a4   : > { %v907_v30 = vadd.f32 1e-05, %v443_v27 }
 0x1a5   : > { %v748_v31 = vpop.eup %747  ;;  %v909_v32 = vadd.f32 1e-05, %v442_v29 }
 0x1a6   : > { %v750_v33 = vpop.eup %749  ;;  %v476_v34 = vmul.f32 %v748_v31, %v449_v24  ;;  %751 = vrsqrt.f32 %v907_v30  ;;  %vm482_vm2 = vweird.f32 %v748_v31  ;;  %vm501_vm10 = vweird.f32 %v907_v30 }
 0x1a7   : > { %v456_v35 = vmul.f32 %v750_v33, %v447_v25  ;;  %753 = vrsqrt.f32 %v909_v32  ;;  %vm462_vm3 = vweird.f32 %v750_v33  ;;  %vm483_vm5 = vmor %vm481_vm4, %vm482_vm2  ;;  %vm491_vm12 = vweird.f32 %v909_v32 }
 0x1a8   : > { %v477_v36 = vmul.f32 %v748_v31, %v476_v34  ;;  %vm463_vm7 = vmor %vm461_vm6, %vm462_vm3 }
 0x1a9   : > { %v457_v37 = vmul.f32 %v750_v33, %v456_v35  ;;  %v432_v38 = vpop.xlane.xlu1 %431  ;;  %v420_v39 = vpop.xlane.xlu0 %419 }
 0x1aa   : > { %v478_v40 = vmul.f32 0.5, %v477_v36  ;;  %v444_v41 = vmul.f32 %v432_v38, %v853_v43  ;;  %v440_v42 = vmul.f32 %v420_v39, %v853_v43  ;;  %v435_v44 = vpop.xlane.xlu2 %434 }
 0x1ab   : > { %v458_v45 = vmul.f32 0.5, %v457_v37  ;;  %v445_v46 = vmul.f32 %v435_v44, %v853_v43 }
 0x1ac   : > { %v752_v47 = vpop.eup %751  ;;  %v479_v50 = vsub.f32 1.5, %v478_v40  ;;  %v916_v51 = vadd.f32 1e-05, %v444_v41  ;;  %v918_v52 = vadd.f32 1e-05, %v440_v42 }
 0x1ad   : > { %v754_v53 = vpop.eup %753  ;;  %v459_v54 = vsub.f32 1.5, %v458_v45  ;;  %v496_v55 = vmul.f32 %v752_v47, %v907_v30  ;;  %v921_v56 = vadd.f32 1e-05, %v445_v46  ;;  %vm502_vm9 = vweird.f32 %v752_v47 }
 0x1ae   : > { %v480_v57 = vmul.f32 %v748_v31, %v479_v50  ;;  %v486_v58 = vmul.f32 %v754_v53, %v909_v32  ;;  %755 = vrsqrt.f32 %v916_v51  ;;  %vm492_vm11 = vweird.f32 %v754_v53  ;;  %vm503_vm13 = vmor %vm501_vm10, %vm502_vm9 }
 0x1af   : > { %v460_v62 = vmul.f32 %v750_v33, %v459_v54  ;;  %v497_v63 = vmul.f32 %v752_v47, %v496_v55  ;;  %757 = vrsqrt.f32 %v918_v52  ;;  %vm493_vm14 = vmor %vm491_vm12, %vm492_vm11  ;;  %vm511_vm0 = vweird.f32 %v916_v51 }
 0x1b0   : > { %v484_v1 = vsel %vm483_vm5, %v748_v31, %v480_v57  ;;  %v487_v2 = vmul.f32 %v754_v53, %v486_v58  ;;  %759 = vrsqrt.f32 %v921_v56  ;;  %vm471_vm4 = vweird.f32 %v918_v52 }
 0x1b1   : > { %v537_v4 = vmul.f32 %v484_v1, %v857_v48  ;;  %v464_v5 = vsel %vm463_vm7, %v750_v33, %v460_v62  ;;  %v498_v6 = vmul.f32 0.5, %v497_v63  ;;  %v438_v7 = vpop.xlane.xlu0 %437  ;;  %vm521_vm6 = vweird.f32 %v921_v56 }
 0x1b2   : > { %v535_v9 = vmul.f32 %v464_v5, %v859_v49  ;;  %v488_v10 = vmul.f32 0.5, %v487_v2  ;;  %v446_v12 = vmul.f32 %v438_v7, %v853_v43 }
 0x1b3   : > { %v548_v13 = vmul.f32 %v928_v60, %v537_v4  ;;  %v499_v15 = vsub.f32 1.5, %v498_v6 }
 0x1b4   : > { %v756_v16 = vpop.eup %755  ;;  %v546_v17 = vmul.f32 %v928_v60, %v535_v9  ;;  %v489_v48 = vsub.f32 1.5, %v488_v10  ;;  %v955_v24 = vadd.f32 1e-05, %v446_v12 }
 0x1b5   : > { %v758_v18 = vpop.eup %757  ;;  %v559_v19 = vadd.f32 %v935_v3, %v548_v13  ;;  %v500_v49 = vmul.f32 %v752_v47, %v499_v15  ;;  %v506_v43 = vmul.f32 %v756_v16, %v916_v51  ;;  %vm512_vm15 = vweird.f32 %v756_v16 }
 0x1b6   : > { %v760_v20 = vpop.eup %759  ;;  %v557_v21 = vadd.f32 %v935_v3, %v546_v17  ;;  %v490_v22 = vmul.f32 %v754_v53, %v489_v48  ;;  %v466_v23 = vmul.f32 %v758_v18, %v918_v52  ;;  %761 = vrsqrt.f32 %v955_v24  ;;  %vm513_vm3 = vmor %vm511_vm0, %vm512_vm15 }
 0x1b7   : > { %v567_v25 = vpack.c.bf16 %v559_v19, %v559_v19  ;;  %v504_v26 = vsel %vm503_vm13, %v752_v47, %v500_v49  ;;  %v507_v27 = vmul.f32 %v756_v16, %v506_v43  ;;  %v516_v28 = vmul.f32 %v760_v20, %v921_v56 }
 0x1b8   : > { %v565_v29 = vpack.c.bf16 %v557_v21, %v557_v21  ;;  %v539_v30 = vmul.f32 %v504_v26, %v869_v59  ;;  %v494_v31 = vsel %vm493_vm14, %v754_v53, %v490_v22  ;;  %v467_v32 = vmul.f32 %v758_v18, %v466_v23 }
 0x1b9   : > { %576 = vst.msk [vmem:[%s951_s25 + $0x8] sm:$0xf] %vm573_vm8, %v567_v25  ;;  %v538_v33 = vmul.f32 %v494_v31, %v872_v61  ;;  %v508_v34 = vmul.f32 0.5, %v507_v27  ;;  %v517_v35 = vmul.f32 %v760_v20, %v516_v28  ;;  %vm472_vm1 = vweird.f32 %v758_v18 }
 0x1ba   : > { %574 = vst.msk [vmem:[%s951_s25] sm:$0xf] %vm573_vm8, %v565_v29  ;;  %v550_v36 = vmul.f32 %v928_v60, %v539_v30  ;;  %v468_v37 = vmul.f32 0.5, %v467_v32  ;;  %vm522_vm2 = vweird.f32 %v760_v20  ;;  %vm473_vm5 = vmor %vm471_vm4, %vm472_vm1  ;;  %vm531_vm10 = vweird.f32 %v955_v24 }
 0x1bb   : > { %v549_v38 = vmul.f32 %v928_v60, %v538_v33  ;;  %v509_v39 = vsub.f32 1.5, %v508_v34  ;;  %v518_v59 = vmul.f32 0.5, %v517_v35  ;;  %vm523_vm7 = vmor %vm521_vm6, %vm522_vm2 }
 0x1bc   : > { %v561_v40 = vadd.f32 %v935_v3, %v550_v36  ;;  %v469_v41 = vsub.f32 1.5, %v468_v37  ;;  %v762_v51 = vpop.eup %761 }
 0x1bd   : > { %v560_v61 = vadd.f32 %v935_v3, %v549_v38  ;;  %v510_v42 = vmul.f32 %v756_v16, %v509_v39  ;;  %v519_v44 = vsub.f32 1.5, %v518_v59  ;;  %v526_v52 = vmul.f32 %v762_v51, %v955_v24 }
 0x1be   : > { %v569_v45 = vpack.c.bf16 %v561_v40, %v561_v40  ;;  %v470_v46 = vmul.f32 %v758_v18, %v469_v41  ;;  %vm532_vm9 = vweird.f32 %v762_v51 }
 0x1bf   : > { %v568_v47 = vpack.c.bf16 %v560_v61, %v560_v61  ;;  %v514_v50 = vsel %vm513_vm3, %v756_v16, %v510_v42  ;;  %v520_v53 = vmul.f32 %v760_v20, %v519_v44  ;;  %v527_v1 = vmul.f32 %v762_v51, %v526_v52  ;;  %vm533_vm11 = vmor %vm531_vm10, %vm532_vm9 }
 0x1c0   : > { %578 = vst.msk [vmem:[%s951_s25 + $0x10] sm:$0xf] %vm573_vm8, %v569_v45  ;;  %v540_v54 = vmul.f32 %v514_v50, %v884_v8  ;;  %v474_v55 = vsel %vm473_vm5, %v758_v18, %v470_v46 }
 0x1c1   : > { %577 = vst.msk [vmem:[%s951_s25 + $0xc] sm:$0xf] %vm573_vm8, %v568_v47  ;;  %v536_v57 = vmul.f32 %v474_v55, %v878_v0  ;;  %v524_v58 = vsel %vm523_vm7, %v760_v20, %v520_v53  ;;  %v528_v0 = vmul.f32 0.5, %v527_v1 }
 0x1c2   : > { %v551_v62 = vmul.f32 %v928_v60, %v540_v54  ;;  %v541_v56 = vmul.f32 %v524_v58, %v889_v11 }
 0x1c3   : > { %v547_v63 = vmul.f32 %v928_v60, %v536_v57  ;;  %v529_v9 = vsub.f32 1.5, %v528_v0 }
 0x1c4   : > { %v562_v8 = vadd.f32 %v935_v3, %v551_v62  ;;  %v552_v2 = vmul.f32 %v928_v60, %v541_v56 }
 0x1c5   : > { %v558_v4 = vadd.f32 %v935_v3, %v547_v63  ;;  %v530_v10 = vmul.f32 %v762_v51, %v529_v9 }
 0x1c6   : > { %v570_v5 = vpack.c.bf16 %v562_v8, %v562_v8  ;;  %v563_v6 = vadd.f32 %v935_v3, %v552_v2 }
 0x1c7   : > { %v566_v7 = vpack.c.bf16 %v558_v4, %v558_v4  ;;  %v534_v12 = vsel %vm533_vm11, %v762_v51, %v530_v10 }
 0x1c8   : > { %579 = vst.msk [vmem:[%s951_s25 + $0x14] sm:$0xf] %vm573_vm8, %v570_v5  ;;  %v571_v11 = vpack.c.bf16 %v563_v6, %v563_v6  ;;  %v542_v13 = vmul.f32 %v534_v12, %v895_v14 }
 0x1c9   : > { %575 = vst.msk [vmem:[%s951_s25 + $0x4] sm:$0xf] %vm573_vm8, %v566_v7 }
 0x1ca   : > { %580 = vst.msk [vmem:[%s951_s25 + $0x18] sm:$0xf] %vm573_vm8, %v571_v11  ;;  %v553_v15 = vmul.f32 %v928_v60, %v542_v13 }
 0x1cc   : > { %v564_v16 = vadd.f32 %v935_v3, %v553_v15 }
 0x1ce   : > { %v572_v17 = vpack.c.bf16 %v564_v16, %v564_v16 }
 0x1d0   : > { %581 = vst.msk [vmem:[%s951_s25 + $0x1c] sm:$0xf] %vm573_vm8, %v572_v17 }
 0x1d1 PF: > { %s15_s18 = sadd.s32 1, %s769_s18  }
 0x1d2   : > { %p12_p4 = scmp.ge.s32.totalorder %s15_s18, 4  }
 0x1d4   :  { %14 = sbr.rel (!%p12_p4) target bundleno = 1 (0x1), region = 70 }

// kernel: swint_forward.8
= control target key start
LH: loop header
LB: loop body
LE: loop exit
PB: predicated region body
PF: predicated region fallthrough
CT: control target
= control target key end

     0   :  { %s2458_s29 = smov 0   ;;  %s3176_s0 = inlined_call_operand.vmem [shape: bf16[2,64,32], index: 0, kind: input, shape index: {}]   ;;  %s3177_s1 = inlined_call_operand.vmem [shape: f32[1,32], index: 1, kind: input, shape index: {}]   ;;  %s3178_s2 = inlined_call_operand.vmem [shape: f32[1,32], index: 2, kind: input, shape index: {}]   ;;  %s3179_s3 = inlined_call_operand.vmem [shape: bf16[32,96], index: 3, kind: input, shape index: {}]   ;;  %s3180_s4 = inlined_call_operand.vmem [shape: f32[1,96], index: 4, kind: input, shape index: {}]   ;;  %s3181_s5 = inlined_call_operand.vmem [shape: f32[2,64,64], index: 5, kind: input, shape index: {}]   ;;  %s3182_s6 = inlined_call_operand.vmem [shape: bf16[32,32], index: 6, kind: input, shape index: {}]   ;;  %s3183_s7 = inlined_call_operand.vmem [shape: f32[1,32], index: 7, kind: input, shape index: {}]   ;;  %s3184_s8 = inlined_call_operand.vmem [shape: f32[1,32], index: 8, kind: input, shape index: {}]   ;;  %s3185_s9 = inlined_call_operand.vmem [shape: f32[1,32], index: 9, kind: input, shape index: {}]   ;;  %s3186_s10 = inlined_call_operand.vmem [shape: bf16[32,128], index: 10, kind: input, shape index: {}]   ;;  %s3187_s11 = inlined_call_operand.vmem [shape: f32[1,128], index: 11, kind: input, shape index: {}]   ;;  %s3188_s12 = inlined_call_operand.vmem [shape: bf16[128,32], index: 12, kind: input, shape index: {}]   ;;  %s3189_s13 = inlined_call_operand.vmem [shape: f32[1,32], index: 13, kind: input, shape index: {}]   ;;  %s3190_s14 = inlined_call_operand.vmem [shape: bf16[2,64,32], index: 14, kind: output, shape index: {}]  }
   0x1 LB: > { %s2089_s30 = sadd.s32 4294967295, %s2375_s29   ;;  %p2093_p0 = scmp.ge.s32.totalorder %s2375_s29, 1  ;;  %s2375_s29 = sphi %s2458_s29, %s24_s29  }
   0x2   : > { %p412_p1 = scmp.lt.s32.totalorder %s2375_s29, 3 }
   0x4   : > { %p413_p2 = pnand %p2093_p0, %p412_p1 }
   0x5   : > { %p458_p3 = scmp.lt.s32.totalorder (!%p413_p2), %s2089_s30, 1  ;;  %s2378_s16 = smov (!%p413_p2), 96  }
   0x6   : > { %416 = sbr.rel (%p413_p2) target bundleno = 2744 (0xab8), region = 76  ;;  %s2379_s20 = smov (!%p413_p2), 64  }
   0x7   : > { %s2380_s21 = smov (!%p413_p2), 80   ;;  %s2381_s22 = smov (!%p413_p2), 112  }
   0x8   : > { %s2382_s28 = smov (!%p413_p2), 48  }
   0xb   : > { %s3196_s30 = smov (!%p458_p3, %s2089_s30), 1  ;;  %vm487_vm0 = vcmask 261120   ;;  %v2377_v18 = vmov 32.0   ;;  %v2199_v62 = vld [vmem:[%s3179_s3 + $0x8] sm:$0xff] }
   0xc   : > { %s2196_s15 = sshll.u32 %s3196_s30, 5  ;;  %2255 = vrcp.f32 %v2377_v18  ;;  %735 = vmatpush.bf16.msra.mxu0 %v2199_v62 }
   0xd   : > { %s462_s18 = scalar_lea.vmem %s3176_s0, %s2196_s15  ;;  %s3148_s24 = scalar_lea.vmem %s3190_s14, %s2196_s15 }
   0xe   : > { %v2229_v0 = vld [vmem:[%s462_s18 + $0x10] sm:$0xff]   ;;  %v2228_v1 = vld [vmem:[%s462_s18 + $0x8] sm:$0xff]   ;;  %v2213_v2 = vld [vmem:[%s462_s18] sm:$0xff]  }
   0xf   : > { %v2474_v3 = vunpack.c.l.bf16 %v2229_v0  ;;  %v2476_v4 = vunpack.c.l.bf16 %v2228_v1  ;;  %v2478_v5 = vunpack.c.l.bf16 %v2213_v2  ;;  %v2486_v9 = vunpack.c.h.bf16 %v2229_v0  ;;  %v2230_v15 = vld [vmem:[%s462_s18 + $0x18] sm:$0xff]  }
  0x10   : > { %v2488_v10 = vunpack.c.h.bf16 %v2228_v1  ;;  %v2490_v11 = vunpack.c.h.bf16 %v2213_v2  ;;  %v2498_v16 = vunpack.c.l.bf16 %v2230_v15  ;;  %v2515_v39 = vunpack.c.h.bf16 %v2230_v15  ;;  %v2198_v2 = vld [vmem:[%s3179_s3] sm:$0xff] }
  0x11   : > { %v500_v6 = vsel %vm487_vm0, %v2474_v3, 0.0  ;;  %v494_v7 = vsel %vm487_vm0, %v2476_v4, 0.0  ;;  %v488_v8 = vsel %vm487_vm0, %v2478_v5, 0.0  ;;  %v503_v12 = vsel %vm487_vm0, %v2486_v9, 0.0  ;;  %736 = vmatpush.bf16.msra.mxu0 %v2198_v2 }
  0x12   : > { %501 = vadd.xlane.f32.xlu2 %v500_v6  ;;  %495 = vadd.xlane.f32.xlu1 %v494_v7  ;;  %v497_v13 = vsel %vm487_vm0, %v2488_v10, 0.0  ;;  %v491_v14 = vsel %vm487_vm0, %v2490_v11, 0.0  ;;  %v506_v17 = vsel %vm487_vm0, %v2498_v16, 0.0  ;;  %v2256_v19 = vpop.eup %2255  ;;  %v509_v45 = vsel %vm487_vm0, %v2515_v39, 0.0 }
  0x13   : > { %489 = vadd.xlane.f32.xlu0 %v488_v8  ;;  %v513_v20 = vmul.f32 32.0, %v2256_v19  ;;  %vm517_vm1 = vweird.f32 %v2256_v19 }
  0x15   : > { %v514_v21 = vsub.f32 1.0, %v513_v20 }
  0x17   : > { %v515_v22 = vmul.f32 %v2256_v19, %v514_v21 }
  0x19   : > { %v516_v23 = vadd.f32 %v2256_v19, %v515_v22 }
  0x1a   : > { %504 = vadd.xlane.f32.xlu2 %v503_v12  ;;  %498 = vadd.xlane.f32.xlu1 %v497_v13 }
  0x1b   : > { %492 = vadd.xlane.f32.xlu0 %v491_v14  ;;  %v2502_v24 = vsel %vm517_vm1, %v2256_v19, %v516_v23 }
  0x22   : > { %507 = vadd.xlane.f32.xlu2 %v506_v17 }
  0x85   : > { %v502_v25 = vpop.xlane.xlu2 %501  ;;  %v496_v26 = vpop.xlane.xlu1 %495 }
  0x86   : > { %v490_v27 = vpop.xlane.xlu0 %489  ;;  %v523_v36 = vmul.f32 %v2502_v24, %v502_v25  ;;  %v521_v37 = vmul.f32 %v2502_v24, %v496_v26 }
  0x87   : > { %v519_v28 = vmul.f32 %v2502_v24, %v490_v27 }
  0x88   : > { %v2526_v43 = vsub.f32 %v2474_v3, %v523_v36  ;;  %v2529_v44 = vsub.f32 %v2476_v4, %v521_v37 }
  0x89   : > { %v2506_v29 = vsub.f32 %v2478_v5, %v519_v28 }
  0x8a   : > { %v539_v52 = vmul.f32 %v2526_v43, %v2526_v43  ;;  %v537_v53 = vmul.f32 %v2529_v44, %v2529_v44 }
  0x8b   : > { %v535_v30 = vmul.f32 %v2506_v29, %v2506_v29 }
  0x8c   : > { %v555_v57 = vsel %vm487_vm0, %v539_v52, 0.0  ;;  %v549_v58 = vsel %vm487_vm0, %v537_v53, 0.0 }
  0x8d   : > { %v505_v31 = vpop.xlane.xlu2 %504  ;;  %v499_v32 = vpop.xlane.xlu1 %498  ;;  %v543_v33 = vsel %vm487_vm0, %v535_v30, 0.0 }
  0x8e   : > { %v522_v34 = vmul.f32 %v2502_v24, %v499_v32  ;;  %544 = vadd.xlane.f32.xlu0 %v543_v33  ;;  %v493_v35 = vpop.xlane.xlu0 %492  ;;  %v524_v51 = vmul.f32 %v2502_v24, %v505_v31 }
  0x8f   : > { %v520_v38 = vmul.f32 %v2502_v24, %v493_v35 }
  0x90   : > { %v2518_v40 = vsub.f32 %v2488_v10, %v522_v34  ;;  %v2549_v56 = vsub.f32 %v2486_v9, %v524_v51 }
  0x91   : > { %v2521_v41 = vsub.f32 %v2490_v11, %v520_v38 }
  0x92   : > { %v538_v42 = vmul.f32 %v2518_v40, %v2518_v40  ;;  %v540_v60 = vmul.f32 %v2549_v56, %v2549_v56 }
  0x93   : > { %v536_v46 = vmul.f32 %v2521_v41, %v2521_v41 }
  0x94   : > { %v552_v47 = vsel %vm487_vm0, %v538_v42, 0.0  ;;  %v558_v61 = vsel %vm487_vm0, %v540_v60, 0.0 }
  0x95   : > { %v508_v48 = vpop.xlane.xlu2 %507  ;;  %553 = vadd.xlane.f32.xlu2 %v552_v47  ;;  %v546_v49 = vsel %vm487_vm0, %v536_v46, 0.0 }
  0x96   : > { %v525_v50 = vmul.f32 %v2502_v24, %v508_v48  ;;  %510 = vadd.xlane.f32.xlu0 %v509_v45  ;;  %547 = vadd.xlane.f32.xlu1 %v546_v49 }
  0x98   : > { %v2544_v54 = vsub.f32 %v2498_v16, %v525_v50 }
  0x9a   : > { %v541_v55 = vmul.f32 %v2544_v54, %v2544_v54 }
  0x9c   : > { %v561_v59 = vsel %vm487_vm0, %v541_v55, 0.0 }
  0x9d   : > { %562 = vadd.xlane.f32.xlu2 %v561_v59 }
  0x9e   : > { %556 = vadd.xlane.f32.xlu0 %v555_v57  ;;  %550 = vadd.xlane.f32.xlu1 %v549_v58  ;;  %v2588_v58 = vld [vmem:[%s3177_s1] ss:$0 sm:$0xff] }
  0xa6   : > { %559 = vadd.xlane.f32.xlu1 %v558_v61 }
 0x101   : > { %v545_v63 = vpop.xlane.xlu0 %544 }
 0x102   : > { %v567_v0 = vmul.f32 %v545_v63, %v2502_v24 }
 0x104   : > { %v575_v1 = vadd.f32 1e-05, %v567_v0 }
 0x106   : > { %2257 = vrsqrt.f32 %v575_v1  ;;  %vm589_vm3 = vweird.f32 %v575_v1 }
 0x108   : > { %v554_v6 = vpop.xlane.xlu2 %553 }
 0x109   : > { %v570_v7 = vmul.f32 %v554_v6, %v2502_v24  ;;  %v548_v8 = vpop.xlane.xlu1 %547  ;;  %v511_v12 = vpop.xlane.xlu0 %510 }
 0x10a   : > { %v568_v13 = vmul.f32 %v548_v8, %v2502_v24  ;;  %v526_v14 = vmul.f32 %v2502_v24, %v511_v12 }
 0x10b   : > { %v2567_v15 = vadd.f32 1e-05, %v570_v7 }
 0x10c   : > { %v2258_v17 = vpop.eup %2257  ;;  %v576_v18 = vadd.f32 1e-05, %v568_v13  ;;  %v2570_v19 = vsub.f32 %v2515_v39, %v526_v14 }
 0x10d   : > { %v584_v20 = vmul.f32 %v2258_v17, %v575_v1  ;;  %2259 = vrsqrt.f32 %v2567_v15  ;;  %vm590_vm2 = vweird.f32 %v2258_v17  ;;  %vm619_vm10 = vweird.f32 %v2567_v15 }
 0x10e   : > { %2261 = vrsqrt.f32 %v576_v18  ;;  %v542_v21 = vmul.f32 %v2570_v19, %v2570_v19  ;;  %vm591_vm4 = vmor %vm589_vm3, %vm590_vm2  ;;  %vm599_vm5 = vweird.f32 %v576_v18 }
 0x10f   : > { %v585_v22 = vmul.f32 %v2258_v17, %v584_v20 }
 0x110   : > { %v564_v23 = vsel %vm487_vm0, %v542_v21, 0.0 }
 0x111   : > { %v586_v25 = vmul.f32 0.5, %v585_v22  ;;  %v551_v26 = vpop.xlane.xlu1 %550  ;;  %565 = vadd.xlane.f32.xlu0 %v564_v23  ;;  %v557_v28 = vpop.xlane.xlu0 %556 }
 0x112   : > { %v569_v27 = vmul.f32 %v551_v26, %v2502_v24  ;;  %v571_v35 = vmul.f32 %v557_v28, %v2502_v24 }
 0x113   : > { %v2577_v30 = vpop.eup %2259  ;;  %v587_v31 = vsub.f32 1.5, %v586_v25 }
 0x114   : > { %v2262_v32 = vpop.eup %2261  ;;  %v577_v33 = vadd.f32 1e-05, %v569_v27  ;;  %v614_v37 = vmul.f32 %v2577_v30, %v2567_v15  ;;  %v579_v45 = vadd.f32 1e-05, %v571_v35  ;;  %vm620_vm11 = vweird.f32 %v2577_v30 }
 0x115   : > { %v594_v34 = vmul.f32 %v2262_v32, %v576_v18  ;;  %v588_v36 = vmul.f32 %v2258_v17, %v587_v31  ;;  %vm600_vm6 = vweird.f32 %v2262_v32  ;;  %vm621_vm13 = vmor %vm619_vm10, %vm620_vm11  ;;  %vm810_vm11 = vcmask 130048  }
 0x116   : > { %2263 = vrsqrt.f32 %v577_v33  ;;  %v615_v48 = vmul.f32 %v2577_v30, %v614_v37  ;;  %vm601_vm7 = vmor %vm599_vm5, %vm600_vm6  ;;  %vm609_vm8 = vweird.f32 %v577_v33  ;;  %vm629_vm1 = vweird.f32 %v579_v45 }
 0x117   : > { %v595_v38 = vmul.f32 %v2262_v32, %v594_v34  ;;  %v592_v47 = vsel %vm591_vm4, %v2258_v17, %v588_v36  ;;  %2265 = vrsqrt.f32 %v579_v45 }
 0x118   : > { %v663_v53 = vmul.f32 %v592_v47, %v2506_v29  ;;  %v616_v59 = vmul.f32 0.5, %v615_v48  ;;  %v2595_v29 = vld [vmem:[%s3178_s2] ss:$0 sm:$0xff] }
 0x119   : > { %v596_v42 = vmul.f32 0.5, %v595_v38  ;;  %v560_v46 = vpop.xlane.xlu1 %559 }
 0x11a   : > { %v572_v49 = vmul.f32 %v560_v46, %v2502_v24  ;;  %v674_v0 = vmul.f32 %v2588_v58, %v663_v53  ;;  %v617_v1 = vsub.f32 1.5, %v616_v59 }
 0x11b   : > { %v597_v50 = vsub.f32 1.5, %v596_v42 }
 0x11c   : > { %v2264_v51 = vpop.eup %2263  ;;  %v580_v52 = vadd.f32 1e-05, %v572_v49  ;;  %v685_v13 = vadd.f32 %v2595_v29, %v674_v0  ;;  %v618_v14 = vmul.f32 %v2577_v30, %v617_v1 }
 0x11d   : > { %v598_v55 = vmul.f32 %v2262_v32, %v597_v50  ;;  %v604_v57 = vmul.f32 %v2264_v51, %v577_v33  ;;  %vm610_vm9 = vweird.f32 %v2264_v51  ;;  %v2266_v6 = vpop.eup %2265 }
 0x11e   : > { %2267 = vrsqrt.f32 %v580_v52  ;;  %vm611_vm12 = vmor %vm609_vm8, %vm610_vm9  ;;  %v624_v17 = vmul.f32 %v2266_v6, %v579_v45  ;;  %v622_v15 = vsel %vm621_vm13, %v2577_v30, %v618_v14  ;;  %vm639_vm14 = vweird.f32 %v580_v52 }
 0x11f   : > { %v602_v60 = vsel %vm601_vm7, %v2262_v32, %v598_v55  ;;  %v605_v61 = vmul.f32 %v2264_v51, %v604_v57  ;;  %v666_v27 = vmul.f32 %v622_v15, %v2518_v40  ;;  %vm630_vm2 = vweird.f32 %v2266_v6 }
 0x120   : > { %v664_v62 = vmul.f32 %v602_v60, %v2521_v41  ;;  %v625_v23 = vmul.f32 %v2266_v6, %v624_v17  ;;  %vm631_vm4 = vmor %vm629_vm1, %vm630_vm2 }
 0x121   : > { %v606_v63 = vmul.f32 0.5, %v605_v61  ;;  %v677_v33 = vmul.f32 %v2588_v58, %v666_v27 }
 0x122   : > { %v675_v2 = vmul.f32 %v2588_v58, %v664_v62  ;;  %v626_v28 = vmul.f32 0.5, %v625_v23 }
 0x123   : > { %v607_v7 = vsub.f32 1.5, %v606_v63 }
 0x124   : > { %v686_v41 = vadd.f32 %v2595_v29, %v675_v2  ;;  %v2268_v8 = vpop.eup %2267  ;;  %v627_v34 = vsub.f32 1.5, %v626_v28 }
 0x125   : > { %v608_v12 = vmul.f32 %v2264_v51, %v607_v7  ;;  %v634_v18 = vmul.f32 %v2268_v8, %v580_v52  ;;  %vm640_vm15 = vweird.f32 %v2268_v8 }
 0x126   : > { %v693_v20 = vpack.c.bf16 %v686_v41, %v685_v13  ;;  %vm641_vm3 = vmor %vm639_vm14, %vm640_vm15  ;;  %v628_v36 = vmul.f32 %v2266_v6, %v627_v34 }
 0x127   : > { %v612_v21 = vsel %vm611_vm12, %v2264_v51, %v608_v12  ;;  %v635_v22 = vmul.f32 %v2268_v8, %v634_v18  ;;  %v563_v51 = vpop.xlane.xlu2 %562  ;;  %vm864_vm12 = vcmask 523264  }
 0x128   : > { %2106 = vmatmul.msk.bf16.vlgmr.msra.gmra.mxu0 %vm487_vm0, %v693_v20  ;;  %v665_v25 = vmul.f32 %v612_v21, %v2529_v44  ;;  %v688_v44 = vadd.f32 %v2595_v29, %v677_v33  ;;  %v632_v38 = vsel %vm631_vm4, %v2266_v6, %v628_v36  ;;  %v573_v52 = vmul.f32 %v563_v51, %v2502_v24 }
 0x129   : > { %v636_v26 = vmul.f32 0.5, %v635_v22  ;;  %v667_v46 = vmul.f32 %v632_v38, %v2526_v43 }
 0x12a   : > { %v676_v31 = vmul.f32 %v2588_v58, %v665_v25  ;;  %v581_v53 = vadd.f32 1e-05, %v573_v52 }
 0x12b   : > { %v637_v32 = vsub.f32 1.5, %v636_v26  ;;  %v678_v45 = vmul.f32 %v2588_v58, %v667_v46 }
 0x12c   : > { %v687_v35 = vadd.f32 %v2595_v29, %v676_v31  ;;  %2269 = vrsqrt.f32 %v581_v53  ;;  %vm649_vm5 = vweird.f32 %v581_v53 }
 0x12d   : > { %v638_v30 = vmul.f32 %v2268_v8, %v637_v32  ;;  %v689_v49 = vadd.f32 %v2595_v29, %v678_v45 }
 0x12e   : > { %v694_v40 = vpack.c.bf16 %v688_v44, %v687_v35 }
 0x12f   : > { %v642_v37 = vsel %vm641_vm3, %v2268_v8, %v638_v30 }
 0x130   : > { %v668_v42 = vmul.f32 %v642_v37, %v2549_v56 }
 0x132   : > { %v679_v47 = vmul.f32 %v2588_v58, %v668_v42  ;;  %v2270_v55 = vpop.eup %2269 }
 0x133   : > { %v644_v56 = vmul.f32 %v2270_v55, %v581_v53  ;;  %vm650_vm6 = vweird.f32 %v2270_v55 }
 0x134   : > { %v690_v48 = vadd.f32 %v2595_v29, %v679_v47  ;;  %vm651_vm7 = vmor %vm649_vm5, %vm650_vm6 }
 0x135   : > { %v645_v57 = vmul.f32 %v2270_v55, %v644_v56 }
 0x136   : > { %v695_v50 = vpack.c.bf16 %v690_v48, %v689_v49 }
 0x137   : > { %v646_v61 = vmul.f32 0.5, %v645_v57 }
 0x138   : > { %2107 = vmatmul.msk.bf16.gmra.mxu0 %vm487_vm0, %v694_v40 }
 0x139   : > { %v647_v62 = vsub.f32 1.5, %v646_v61 }
 0x13b   : > { %v648_v0 = vmul.f32 %v2270_v55, %v647_v62 }
 0x13d   : > { %v652_v6 = vsel %vm651_vm7, %v2270_v55, %v648_v0 }
 0x13e   : > { %v669_v8 = vmul.f32 %v652_v6, %v2544_v54  ;;  %v2249_v54 = vld [vmem:[%s3180_s4] ss:$0 sm:$0xff] }
 0x140   : > { %v680_v17 = vmul.f32 %v2588_v58, %v669_v8 }
 0x142   : > { %v691_v20 = vadd.f32 %v2595_v29, %v680_v17 }
 0x148   : > { %2108 = vmatmul.msk.bf16.gmra.mxu0 %vm487_vm0, %v695_v50 }
 0x184   : > { %v566_v43 = vpop.xlane.xlu0 %565 }
 0x185   : > { %v574_v59 = vmul.f32 %v566_v43, %v2502_v24 }
 0x187   : > { %v582_v60 = vadd.f32 1e-05, %v574_v59 }
 0x189   : > { %2271 = vrsqrt.f32 %v582_v60  ;;  %vm659_vm9 = vweird.f32 %v582_v60 }
 0x18f   : > { %v2272_v63 = vpop.eup %2271 }
 0x190   : > { %v654_v1 = vmul.f32 %v2272_v63, %v582_v60  ;;  %vm660_vm8 = vweird.f32 %v2272_v63 }
 0x191   : > { %vm661_vm10 = vmor %vm659_vm9, %vm660_vm8 }
 0x192   : > { %v655_v2 = vmul.f32 %v2272_v63, %v654_v1  ;;  %v790_v1 = vld [vmem:[%s3181_s5] sm:$0xff] }
 0x194   : > { %v656_v7 = vmul.f32 0.5, %v655_v2 }
 0x196   : > { %v657_v41 = vsub.f32 1.5, %v656_v7 }
 0x198   : > { %v658_v12 = vmul.f32 %v2272_v63, %v657_v41  ;;  %v791_v41 = vld [vmem:[%s3181_s5 + $0x8] sm:$0xff] }
 0x19a   : > { %v662_v13 = vsel %vm661_vm10, %v2272_v63, %v658_v12 }
 0x19b   : > { %v670_v14 = vmul.f32 %v662_v13, %v2570_v19 }
 0x19d   : > { %v681_v18 = vmul.f32 %v2588_v58, %v670_v14  ;;  %v792_v14 = vld [vmem:[%s3181_s5 + $0x10] sm:$0xff] }
 0x19f   : > { %v692_v21 = vadd.f32 %v2595_v29, %v681_v18 }
 0x1a1   : > { %v696_v22 = vpack.c.bf16 %v692_v21, %v691_v20  ;;  %v793_v21 = vld [vmem:[%s3181_s5 + $0x18] sm:$0xff] }
 0x1a3   : > { %2109 = vmatmul.msk.bf16.gmra.mxu0 %vm487_vm0, %v696_v22 }
 0x1a5   : > { %v738_v15 = vpop.f32.mrf.mxu0 }
 0x1a6   : > { %v739_v23 = vadd.f32 %v2249_v54, %v738_v15 }
 0x1a8   : > { %v758_v19 = vmul.f32 0.25, %v739_v23 }
 0x1ad   : > { %v740_v25 = vpop.f32.mrf.mxu0 }
 0x1ae   : > { %v741_v26 = vadd.f32 %v2249_v54, %v740_v25 }
 0x1b0   : > { %v759_v27 = vmul.f32 0.25, %v741_v26  ;;  %v2643_v45 = vpack.c.bf16 %v741_v26, %v739_v23  ;;  %v794_v23 = vld [vmem:[%s3181_s5 + $0x20] sm:$0xff] }
 0x1b2   : > { %v2631_v28 = vpack.c.bf16 %v759_v27, %v758_v19  ;;  %v795_v27 = vld [vmem:[%s3181_s5 + $0x28] sm:$0xff] }
 0x1b5   : > { %v743_v58 = vpop.f32.mrf.mxu0 }
 0x1b6   : > { %v744_v31 = vadd.f32 %v2249_v54, %v743_v58 }
 0x1b8   : > { %v760_v29 = vmul.f32 0.25, %v744_v31 }
 0x1bd   : > { %v745_v32 = vpop.f32.mrf.mxu0 }
 0x1be   : > { %v746_v33 = vadd.f32 %v2249_v54, %v745_v32 }
 0x1c0   : > { %v761_v34 = vmul.f32 0.25, %v746_v33  ;;  %v2633_v35 = vpack.c.bf16 %v746_v33, %v744_v31  ;;  %v796_v33 = vld [vmem:[%s3181_s5 + $0x30] sm:$0xff] }
 0x1c2   : > { %804 = vrot.lane.b32.xlu0 %v2633_v35, %s2378_s16  ;;  %v2636_v30 = vpack.c.bf16 %v761_v34, %v760_v29 }
 0x1c5   : > { %v748_v44 = vpop.f32.mrf.mxu0 }
 0x1c6   : > { %v749_v36 = vadd.f32 %v2249_v54, %v748_v44 }
 0x1c8   : > { %v762_v38 = vmul.f32 0.25, %v749_v36 }
 0x1cd   : > { %v750_v40 = vpop.f32.mrf.mxu0 }
 0x1ce   : > { %v751_v37 = vadd.f32 %v2249_v54, %v750_v40 }
 0x1d0   : > { %v763_v42 = vmul.f32 0.25, %v751_v37  ;;  %v2638_v46 = vpack.c.bf16 %v751_v37, %v749_v36  ;;  %v797_v36 = vld [vmem:[%s3181_s5 + $0x38] sm:$0xff] }
 0x1d2   : > { %806 = vrot.lane.b32.xlu2 %v2638_v46, %s2378_s16  ;;  %v2641_v47 = vpack.c.bf16 %v763_v42, %v762_v38 }
 0x1da   : > { %802 = vrot.lane.b32.xlu2 %v2643_v45, %s2378_s16 }
 0x220   : > { %v753_v48 = vpop.f32.mrf.mxu0 }
 0x221   : > { %v754_v49 = vadd.f32 %v2249_v54, %v753_v48 }
 0x223   : > { %v764_v52 = vmul.f32 0.25, %v754_v49 }
 0x228   : > { %v755_v50 = vpop.f32.mrf.mxu0 }
 0x229   : > { %v756_v51 = vadd.f32 %v2249_v54, %v755_v50 }
 0x22b   : > { %v765_v53 = vmul.f32 0.25, %v756_v51  ;;  %v2646_v55 = vpack.c.bf16 %v756_v51, %v754_v49 }
 0x22c   : > { %v807_v59 = vpop.permute.xlu2 %806 }
 0x22d   : > { %808 = vrot.lane.b32.xlu1 %v2646_v55, %s2378_s16  ;;  %v2649_v56 = vpack.c.bf16 %v765_v53, %v764_v52  ;;  %v830_v60 = vsel %vm810_vm11, %v807_v59, 0 }
 0x234   : > { %v805_v61 = vpop.permute.xlu0 %804  ;;  %v803_v63 = vpop.permute.xlu2 %802 }
 0x235   : > { %v827_v62 = vsel %vm810_vm11, %v805_v61, 0  ;;  %v824_v0 = vsel %vm810_vm11, %v803_v63, 0 }
 0x29f   : > { %v809_v57 = vpop.permute.xlu1 %808 }
 0x2a0   : > { %v833_v43 = vsel %vm810_vm11, %v809_v57, 0 }
 0x2a1   : > { %839 = vmatpush.bf16.xpose.msra.mxu1 %v833_v43 }
 0x2a9   : > { %840 = vmatpush.bf16.xpose.msra.mxu1 %v830_v60 }
 0x2b1   : > { %841 = vmatpush.bf16.xpose.msra.mxu1 %v827_v62 }
 0x2b9   : > { %842 = vmatpush.bf16.xpose.msra.mxu1 %v824_v0 }
 0x2c0   : > { %2110 = vmatmul.msk.bf16.vlgmr.msra.gmra.mxu1 %vm810_vm11, %v2631_v28 }
 0x2d0   : > { %2111 = vmatmul.msk.bf16.gmra.mxu1 %vm810_vm11, %v2636_v30 }
 0x2e0   : > { %2112 = vmatmul.msk.bf16.gmra.mxu1 %vm810_vm11, %v2641_v47 }
 0x2f0   : > { %2113 = vmatmul.msk.bf16.gmra.mxu1 %vm810_vm11, %v2649_v56 }
 0x33d   : > { %v844_v2 = vpop.f32.mrf.mxu1 }
 0x33e   : > { %v845_v6 = vadd.f32 %v844_v2, %v790_v1 }
 0x340   : > { %v865_v7 = vsel %vm864_vm12, %v845_v6, -inf }
 0x341   : > { %866 = vmax.xlane.f32.xlu1 %v865_v7 }
 0x345   : > { %v846_v8 = vpop.f32.mrf.mxu1 }
 0x346   : > { %v847_v12 = vadd.f32 %v846_v8, %v791_v41 }
 0x348   : > { %v868_v13 = vsel %vm864_vm12, %v847_v12, -inf }
 0x349   : > { %869 = vmax.xlane.f32.xlu0 %v868_v13 }
 0x34d   : > { %v849_v17 = vpop.f32.mrf.mxu1 }
 0x34e   : > { %v850_v18 = vadd.f32 %v849_v17, %v792_v14 }
 0x350   : > { %v871_v20 = vsel %vm864_vm12, %v850_v18, -inf }
 0x351   : > { %872 = vmax.xlane.f32.xlu2 %v871_v20 }
 0x355   : > { %v851_v22 = vpop.f32.mrf.mxu1 }
 0x356   : > { %v2678_v15 = vadd.f32 %v851_v22, %v793_v21 }
 0x358   : > { %v874_v54 = vsel %vm864_vm12, %v2678_v15, -inf }
 0x359   : > { %875 = vmax.xlane.f32.xlu1 %v874_v54 }
 0x35d   : > { %v854_v25 = vpop.f32.mrf.mxu1 }
 0x35e   : > { %v2685_v26 = vadd.f32 %v854_v25, %v794_v23 }
 0x360   : > { %v877_v19 = vsel %vm864_vm12, %v2685_v26, -inf }
 0x361   : > { %878 = vmax.xlane.f32.xlu0 %v877_v19 }
 0x365   : > { %v856_v58 = vpop.f32.mrf.mxu1 }
 0x366   : > { %v857_v31 = vadd.f32 %v856_v58, %v795_v27 }
 0x368   : > { %v880_v32 = vsel %vm864_vm12, %v857_v31, -inf }
 0x369   : > { %881 = vmax.xlane.f32.xlu2 %v880_v32 }
 0x36d   : > { %v859_v29 = vpop.f32.mrf.mxu1 }
 0x36e   : > { %v860_v34 = vadd.f32 %v859_v29, %v796_v33 }
 0x370   : > { %v883_v44 = vsel %vm864_vm12, %v860_v34, -inf }
 0x371   : > { %884 = vmax.xlane.f32.xlu1 %v883_v44 }
 0x375   : > { %v861_v40 = vpop.f32.mrf.mxu1 }
 0x376   : > { %v862_v37 = vadd.f32 %v861_v40, %v797_v36 }
 0x378   : > { %v886_v38 = vsel %vm864_vm12, %v862_v37, -inf }
 0x379   : > { %887 = vmax.xlane.f32.xlu0 %v886_v38 }
 0x38a   : > { %1063 = vrot.lane.b32.xlu1 %v2633_v35, %s2379_s20 }
 0x38d   : > { %1067 = vrot.lane.b32.xlu0 %v2646_v55, %s2379_s20 }
 0x3b4   : > { %v867_v42 = vpop.xlane.xlu1 %866 }
 0x3b5   : > { %v889_v48 = vsub.f32 %v845_v6, %v867_v42 }
 0x3b7   : > { %v897_v49 = vmul.f32 1.442695, %v889_v48 }
 0x3b9   : > { %2273 = vpow2.f32 %v897_v49 }
 0x3bc   : > { %v870_v50 = vpop.xlane.xlu0 %869 }
 0x3bd   : > { %v890_v51 = vsub.f32 %v847_v12, %v870_v50 }
 0x3bf   : > { %v2703_v52 = vpop.eup %2273  ;;  %v899_v53 = vmul.f32 1.442695, %v890_v51 }
 0x3c0   : > { %v913_v57 = vsel %vm864_vm12, %v2703_v52, 0.0 }
 0x3c1   : > { %2275 = vpow2.f32 %v899_v53  ;;  %914 = vadd.xlane.f32.xlu2 %v913_v57 }
 0x3c4   : > { %v873_v43 = vpop.xlane.xlu2 %872 }
 0x3c5   : > { %v891_v59 = vsub.f32 %v850_v18, %v873_v43 }
 0x3c7   : > { %v2707_v60 = vpop.eup %2275  ;;  %v901_v61 = vmul.f32 1.442695, %v891_v59 }
 0x3c8   : > { %v916_v62 = vsel %vm864_vm12, %v2707_v60, 0.0 }
 0x3c9   : > { %2277 = vpow2.f32 %v901_v61  ;;  %917 = vadd.xlane.f32.xlu1 %v916_v62 }
 0x3cc   : > { %v876_v13 = vpop.xlane.xlu1 %875 }
 0x3cd   : > { %v892_v18 = vsub.f32 %v2678_v15, %v876_v13 }
 0x3cf   : > { %v2711_v63 = vpop.eup %2277  ;;  %v903_v20 = vmul.f32 1.442695, %v892_v18 }
 0x3d0   : > { %v919_v0 = vsel %vm864_vm12, %v2711_v63, 0.0 }
 0x3d1   : > { %920 = vadd.xlane.f32.xlu0 %v919_v0 }
 0x3d4   : > { %v879_v7 = vpop.xlane.xlu0 %878 }
 0x3d5   : > { %v893_v25 = vsub.f32 %v2685_v26, %v879_v7 }
 0x3d7   : > { %v905_v58 = vmul.f32 1.442695, %v893_v25 }
 0x3d9   : > { %1065 = vrot.lane.b32.xlu2 %v2638_v46, %s2379_s20 }
 0x3dc   : > { %v882_v1 = vpop.xlane.xlu2 %881 }
 0x3dd   : > { %v894_v2 = vsub.f32 %v857_v31, %v882_v1 }
 0x3df   : > { %v907_v6 = vmul.f32 1.442695, %v894_v2 }
 0x3e1   : > { %2279 = vpow2.f32 %v907_v6 }
 0x3e2   : > { %1061 = vrot.lane.b32.xlu1 %v2643_v45, %s2379_s20 }
 0x3e4   : > { %v885_v21 = vpop.xlane.xlu1 %884 }
 0x3e5   : > { %v895_v54 = vsub.f32 %v860_v34, %v885_v21 }
 0x3e7   : > { %v2717_v41 = vpop.eup %2279  ;;  %v909_v19 = vmul.f32 1.442695, %v895_v54 }
 0x3e8   : > { %v928_v8 = vsel %vm864_vm12, %v2717_v41, 0.0 }
 0x3e9   : > { %929 = vadd.xlane.f32.xlu0 %v928_v8 }
 0x3ec   : > { %v888_v12 = vpop.xlane.xlu0 %887 }
 0x3ed   : > { %v896_v14 = vsub.f32 %v862_v37, %v888_v12 }
 0x3ef   : > { %v911_v17 = vmul.f32 1.442695, %v896_v14  ;;  %v2200_v14 = vld [vmem:[%s3182_s6] sm:$0xff] }
 0x3f0   : > { %2232 = vmatpush.bf16.msra.mxu3 %v2200_v14  ;;  %1143 = vmatpush.bf16.msrb.mxu0 %v2200_v14 }
 0x3f1   : > { %2281 = vpow2.f32 %v911_v17 }
 0x3f2   : > { %2283 = vpow2.f32 %v903_v20 }
 0x3f3   : > { %2285 = vpow2.f32 %v909_v19 }
 0x3f4   : > { %2287 = vpow2.f32 %v905_v58 }
 0x3f7   : > { %v2722_v22 = vpop.eup %2281 }
 0x3f8   : > { %v934_v23 = vsel %vm864_vm12, %v2722_v22, 0.0  ;;  %v2727_v27 = vpop.eup %2283 }
 0x3f9   : > { %935 = vadd.xlane.f32.xlu0 %v934_v23  ;;  %v922_v15 = vsel %vm864_vm12, %v2727_v27, 0.0  ;;  %v2731_v32 = vpop.eup %2285 }
 0x3fa   : > { %v2733_v33 = vpop.eup %2287  ;;  %v931_v29 = vsel %vm864_vm12, %v2731_v32, 0.0 }
 0x3fb   : > { %v925_v26 = vsel %vm864_vm12, %v2733_v33, 0.0 }
 0x3fc   : > { %v1064_v34 = vpop.permute.xlu1 %1063 }
 0x3ff   : > { %v1068_v31 = vpop.permute.xlu0 %1067 }
 0x400   : > { %1089 = vmatpush.bf16.msra.mxu2 %v1068_v31 }
 0x402   : > { %923 = vadd.xlane.f32.xlu2 %v922_v15 }
 0x40a   : > { %932 = vadd.xlane.f32.xlu2 %v931_v29 }
 0x40c   : > { %926 = vadd.xlane.f32.xlu1 %v925_v26 }
 0x40d   : > { %1198 = vrot.lane.b32.xlu0 %v2638_v46, %s2380_s21 }
 0x415   : > { %1194 = vrot.lane.b32.xlu0 %v2643_v45, %s2380_s21 }
 0x41d   : > { %1190 = vrot.lane.b32.xlu0 %v2641_v47, %s2381_s22 }
 0x422   : > { %1200 = vrot.lane.b32.xlu2 %v2646_v55, %s2380_s21 }
 0x425   : > { %1196 = vrot.lane.b32.xlu1 %v2633_v35, %s2380_s21 }
 0x42a   : > { %1186 = vrot.lane.b32.xlu2 %v2631_v28, %s2381_s22 }
 0x42d   : > { %1188 = vrot.lane.b32.xlu1 %v2636_v30, %s2381_s22 }
 0x432   : > { %1192 = vrot.lane.b32.xlu2 %v2649_v56, %s2381_s22 }
 0x434   : > { %v915_v44 = vpop.xlane.xlu2 %914 }
 0x435   : > { %2289 = vrcp.f32 %v915_v44  ;;  %v948_v57 = vand.u32 2147483648, %v915_v44  ;;  %vm942_vm2 = vweird.f32 %v915_v44  ;;  %v946_v43 = vand.u32 2147483647, %v915_v44 }
 0x437   : > { %v949_v0 = vor.u32 1.1754944e-38, %v948_v57  ;;  %vm947_vm5 = vcmp.eq.f32.partialorder %v946_v43, 8.507059e+37 }
 0x43b   : > { %v2290_v36 = vpop.eup %2289 }
 0x43c   : > { %v1066_v40 = vpop.permute.xlu2 %1065  ;;  %v918_v37 = vpop.xlane.xlu1 %917  ;;  %v938_v38 = vmul.f32 %v2290_v36, %v915_v44  ;;  %vm943_vm14 = vweird.f32 %v2290_v36 }
 0x43d   : > { %2291 = vrcp.f32 %v918_v37  ;;  %1090 = vmatpush.bf16.msra.mxu2 %v1066_v40  ;;  %v963_v30 = vand.u32 2147483648, %v918_v37  ;;  %vm957_vm15 = vweird.f32 %v918_v37  ;;  %v961_v53 = vand.u32 2147483647, %v918_v37  ;;  %vm944_vm3 = vmor %vm942_vm2, %vm943_vm14 }
 0x43e   : > { %v939_v47 = vsub.f32 1.0, %v938_v38 }
 0x43f   : > { %v964_v61 = vor.u32 1.1754944e-38, %v963_v30  ;;  %vm962_vm4 = vcmp.eq.f32.partialorder %v961_v53, 8.507059e+37 }
 0x440   : > { %v940_v49 = vmul.f32 %v2290_v36, %v939_v47 }
 0x441   : > { %1091 = vmatpush.bf16.msra.mxu2 %v1064_v34 }
 0x442   : > { %v941_v56 = vadd.f32 %v2290_v36, %v940_v49 }
 0x443   : > { %v2292_v42 = vpop.eup %2291 }
 0x444   : > { %v953_v48 = vmul.f32 %v2292_v42, %v918_v37  ;;  %vm958_vm13 = vweird.f32 %v2292_v42  ;;  %v945_v62 = vsel %vm944_vm3, %v2290_v36, %v941_v56  ;;  %v921_v13 = vpop.xlane.xlu0 %920 }
 0x445   : > { %vm959_vm1 = vmor %vm957_vm15, %vm958_vm13  ;;  %v950_v2 = vsel %vm947_vm5, %v949_v0, %v945_v62  ;;  %2293 = vrcp.f32 %v921_v13  ;;  %vm972_vm7 = vweird.f32 %v921_v13  ;;  %v978_v31 = vand.u32 2147483648, %v921_v13 }
 0x446   : > { %v954_v50 = vsub.f32 1.0, %v953_v48  ;;  %v951_v8 = vmul.f32 %v2703_v52, %v950_v2  ;;  %v976_v29 = vand.u32 2147483647, %v921_v13 }
 0x447   : > { %v979_v47 = vor.u32 1.1754944e-38, %v978_v31 }
 0x448   : > { %v955_v28 = vmul.f32 %v2292_v42, %v954_v50  ;;  %vm977_vm10 = vcmp.eq.f32.partialorder %v976_v29, 8.507059e+37 }
 0x44a   : > { %v956_v51 = vadd.f32 %v2292_v42, %v955_v28 }
 0x44b   : > { %v2294_v17 = vpop.eup %2293 }
 0x44c   : > { %v960_v59 = vsel %vm959_vm1, %v2292_v42, %v956_v51  ;;  %v968_v18 = vmul.f32 %v2294_v17, %v921_v13  ;;  %vm973_vm6 = vweird.f32 %v2294_v17 }
 0x44d   : > { %v965_v1 = vsel %vm962_vm4, %v964_v61, %v960_v59  ;;  %vm2760_vm8 = vmor %vm972_vm7, %vm973_vm6 }
 0x44e   : > { %v966_v6 = vmul.f32 %v2707_v60, %v965_v1  ;;  %v969_v20 = vsub.f32 1.0, %v968_v18 }
 0x450   : > { %v1057_v12 = vpack.c.bf16 %v966_v6, %v951_v8  ;;  %v970_v52 = vmul.f32 %v2294_v17, %v969_v20 }
 0x452   : > { %v971_v23 = vadd.f32 %v2294_v17, %v970_v52 }
 0x454   : > { %v1062_v7 = vpop.permute.xlu1 %1061  ;;  %v975_v36 = vsel %vm2760_vm8, %v2294_v17, %v971_v23 }
 0x455   : > { %1092 = vmatpush.bf16.msra.mxu2 %v1062_v7  ;;  %v980_v50 = vsel %vm977_vm10, %v979_v47, %v975_v36 }
 0x456   : > { %v981_v59 = vmul.f32 %v2711_v63, %v980_v50 }
 0x458   : > { %2114 = vmatmul.msk.bf16.vlgmr.msra.gmra.mxu2 %vm864_vm12, %v1057_v12 }
 0x459   : > { %2231 = vmatpush.bf16.msrb.mxu2 %v2200_v14 }
 0x45c   : > { %v2753_v60 = vpop.xlane.xlu0 %929 }
 0x45d   : > { %v1023_v14 = vand.u32 2147483648, %v2753_v60  ;;  %vm1017_vm5 = vweird.f32 %v2753_v60  ;;  %v1021_v18 = vand.u32 2147483647, %v2753_v60 }
 0x45f   : > { %vm1022_vm8 = vcmp.eq.f32.partialorder %v1021_v18, 8.507059e+37 }
 0x46c   : > { %v2768_v42 = vpop.xlane.xlu0 %935 }
 0x46d   : > { %v1051_v50 = vand.u32 2147483647, %v2768_v42 }
 0x475   : > { %v924_v21 = vpop.xlane.xlu2 %923 }
 0x476   : > { %2295 = vrcp.f32 %v924_v21  ;;  %v993_v44 = vand.u32 2147483648, %v924_v21  ;;  %v991_v38 = vand.u32 2147483647, %v924_v21  ;;  %vm987_vm13 = vweird.f32 %v924_v21 }
 0x477   : > { %2297 = vrcp.f32 %v2753_v60 }
 0x478   : > { %v994_v49 = vor.u32 1.1754944e-38, %v993_v44  ;;  %vm992_vm15 = vcmp.eq.f32.partialorder %v991_v38, 8.507059e+37 }
 0x47c   : > { %v2296_v54 = vpop.eup %2295 }
 0x47d   : > { %v983_v25 = vmul.f32 %v2296_v54, %v924_v21  ;;  %v2756_v19 = vpop.xlane.xlu2 %932  ;;  %v2758_v58 = vpop.eup %2297  ;;  %vm988_vm9 = vweird.f32 %v2296_v54 }
 0x47e   : > { %v1013_v40 = vmul.f32 %v2758_v58, %v2753_v60  ;;  %vm989_vm14 = vmor %vm987_vm13, %vm988_vm9  ;;  %vm1018_vm2 = vweird.f32 %v2758_v58  ;;  %vm1032_vm13 = vweird.f32 %v2756_v19 }
 0x47f   : > { %v984_v26 = vsub.f32 1.0, %v983_v25  ;;  %v927_v34 = vpop.xlane.xlu1 %926  ;;  %v1199_v2 = vpop.permute.xlu0 %1198  ;;  %vm1019_vm6 = vmor %vm1017_vm5, %vm1018_vm2  ;;  %v1024_v25 = vor.u32 1.1754944e-38, %v1023_v14 }
 0x480   : > { %2299 = vrcp.f32 %v927_v34  ;;  %v1014_v28 = vsub.f32 1.0, %v1013_v40  ;;  %v1008_v8 = vand.u32 2147483648, %v927_v34  ;;  %vm1002_vm3 = vweird.f32 %v927_v34 }
 0x481   : > { %v985_v37 = vmul.f32 %v2296_v54, %v984_v26  ;;  %2301 = vrcp.f32 %v2756_v19  ;;  %v1221_v17 = vsel %vm810_vm11, %v1199_v2, 0 }
 0x482   : > { %2303 = vrcp.f32 %v2768_v42  ;;  %v1015_v62 = vmul.f32 %v2758_v58, %v1014_v28  ;;  %v1009_v52 = vor.u32 1.1754944e-38, %v1008_v8 }
 0x483   : > { %v986_v48 = vadd.f32 %v2296_v54, %v985_v37 }
 0x484   : > { %v1016_v12 = vadd.f32 %v2758_v58, %v1015_v62 }
 0x485   : > { %v1201_v30 = vpop.permute.xlu2 %1200  ;;  %v990_v56 = vsel %vm989_vm14, %v2296_v54, %v986_v48 }
 0x486   : > { %v2300_v51 = vpop.eup %2299  ;;  %v1224_v53 = vsel %vm810_vm11, %v1201_v30, 0  ;;  %v995_v57 = vsel %vm992_vm15, %v994_v49, %v990_v56  ;;  %v1020_v23 = vsel %vm1019_vm6, %v2758_v58, %v1016_v12  ;;  %v1038_v58 = vand.u32 2147483648, %v2756_v19 }
 0x487   : > { %v998_v43 = vmul.f32 %v2300_v51, %v927_v34  ;;  %1230 = vmatpush.bf16.xpose.msrb.mxu3 %v1224_v53  ;;  %v996_v61 = vmul.f32 %v2727_v27, %v995_v57  ;;  %vm1003_vm1 = vweird.f32 %v2300_v51  ;;  %v2302_v7 = vpop.eup %2301  ;;  %v1006_v27 = vand.u32 2147483647, %v927_v34  ;;  %v1195_v49 = vpop.permute.xlu0 %1194 }
 0x488   : > { %v2304_v13 = vpop.eup %2303  ;;  %vm1004_vm4 = vmor %vm1002_vm3, %vm1003_vm1  ;;  %v1028_v20 = vmul.f32 %v2302_v7, %v2756_v19  ;;  %v1025_v29 = vsel %vm1022_vm8, %v1024_v25, %v1020_v23  ;;  %vm1033_vm9 = vweird.f32 %v2302_v7  ;;  %vm1047_vm15 = vweird.f32 %v2768_v42 }
 0x489   : > { %v999_v0 = vsub.f32 1.0, %v998_v43  ;;  %v1058_v1 = vpack.c.bf16 %v996_v61, %v981_v59  ;;  %v1043_v54 = vmul.f32 %v2304_v13, %v2768_v42  ;;  %vm1007_vm7 = vcmp.eq.f32.partialorder %v1006_v27, 8.507059e+37  ;;  %vm1034_vm14 = vmor %vm1032_vm13, %vm1033_vm9 }
 0x48a   : > { %v1029_v15 = vsub.f32 1.0, %v1028_v20  ;;  %v1026_v36 = vmul.f32 %v2717_v41, %v1025_v29  ;;  %vm1048_vm10 = vweird.f32 %v2304_v13  ;;  %v1053_v41 = vand.u32 2147483648, %v2768_v42 }
 0x48b   : > { %v1000_v6 = vmul.f32 %v2300_v51, %v999_v0  ;;  %2115 = vmatmul.msk.bf16.gmra.mxu2 %vm864_vm12, %v1058_v1  ;;  %v1044_v26 = vsub.f32 1.0, %v1043_v54  ;;  %vm1049_vm1 = vmor %vm1047_vm15, %vm1048_vm10  ;;  %v1039_v30 = vor.u32 1.1754944e-38, %v1038_v58  ;;  %v1215_v56 = vsel %vm810_vm11, %v1195_v49, 0  ;;  %v2126_v54 = vld [vmem:[%s3181_s5 + $0x40] sm:$0xff] }
 0x48c   : > { %v1030_v34 = vmul.f32 %v2302_v7, %v1029_v15  ;;  %v1054_v53 = vor.u32 1.1754944e-38, %v1053_v41  ;;  %vm1052_vm3 = vcmp.eq.f32.partialorder %v1051_v50, 8.507059e+37  ;;  %v2127_v15 = vld [vmem:[%s3181_s5 + $0x48] sm:$0xff] }
 0x48d   : > { %v1001_v63 = vadd.f32 %v2300_v51, %v1000_v6  ;;  %v1045_v37 = vmul.f32 %v2304_v13, %v1044_v26  ;;  %v1187_v27 = vpop.permute.xlu2 %1186  ;;  %v2131_v50 = vld [vmem:[%s3181_s5 + $0x68] sm:$0xff] }
 0x48e   : > { %v1031_v47 = vadd.f32 %v2302_v7, %v1030_v34  ;;  %v2128_v34 = vld [vmem:[%s3181_s5 + $0x50] sm:$0xff] }
 0x48f   : > { %1231 = vmatpush.bf16.xpose.msrb.mxu3 %v1221_v17  ;;  %v1005_v21 = vsel %vm1004_vm4, %v2300_v51, %v1001_v63  ;;  %v1046_v48 = vadd.f32 %v2304_v13, %v1045_v37  ;;  %v1191_v14 = vpop.permute.xlu0 %1190  ;;  %v2129_v37 = vld [vmem:[%s3181_s5 + $0x58] sm:$0xff] }
 0x490   : > { %v1010_v31 = vsel %vm1007_vm7, %v1009_v52, %v1005_v21  ;;  %v1035_v28 = vsel %vm1034_vm14, %v2302_v7, %v1031_v47 }
 0x491   : > { %v1011_v60 = vmul.f32 %v2733_v33, %v1010_v31  ;;  %v1036_v33 = vand.u32 2147483647, %v2756_v19  ;;  %v1050_v51 = vsel %vm1049_vm1, %v2304_v13, %v1046_v48  ;;  %v2130_v48 = vld [vmem:[%s3181_s5 + $0x60] sm:$0xff] }
 0x492   : > { %v1055_v19 = vsel %vm1052_vm3, %v1054_v53, %v1050_v51  ;;  %v2132_v51 = vld [vmem:[%s3181_s5 + $0x70] sm:$0xff] }
 0x493   : > { %v1059_v38 = vpack.c.bf16 %v1026_v36, %v1011_v60  ;;  %vm1037_vm2 = vcmp.eq.f32.partialorder %v1036_v33, 8.507059e+37  ;;  %v1056_v59 = vmul.f32 %v2722_v22, %v1055_v19 }
 0x494   : > { %v1040_v57 = vsel %vm1037_vm2, %v1039_v30, %v1035_v28 }
 0x495   : > { %v1041_v43 = vmul.f32 %v2731_v32, %v1040_v57  ;;  %v1193_v17 = vpop.permute.xlu2 %1192 }
 0x497   : > { %v1197_v44 = vpop.permute.xlu1 %1196  ;;  %v1060_v61 = vpack.c.bf16 %v1056_v59, %v1041_v43  ;;  %v2133_v43 = vld [vmem:[%s3181_s5 + $0x78] sm:$0xff] }
 0x498   : > { %v1218_v40 = vsel %vm810_vm11, %v1197_v44, 0 }
 0x499   : > { %1232 = vmatpush.bf16.xpose.msrb.mxu3 %v1218_v40 }
 0x49b   : > { %2116 = vmatmul.msk.bf16.gmra.mxu2 %vm864_vm12, %v1059_v38 }
 0x49f   : > { %v1189_v13 = vpop.permute.xlu1 %1188 }
 0x4a1   : > { %1233 = vmatpush.bf16.xpose.msrb.mxu3 %v1215_v56 }
 0x4ab   : > { %2117 = vmatmul.msk.bf16.gmra.mxu2 %vm864_vm12, %v1060_v61 }
 0x4db   : > { %v1094_v42 = vpop.f32.mrf.mxu2 }
 0x4e3   : > { %v1096_v62 = vpop.f32.mrf.mxu2 }
 0x4e4   : > { %v1114_v0 = vpack.c.bf16 %v1096_v62, %v1094_v42 }
 0x4e6   : > { %2122 = vmatmul.msk.bf16.vlgmr.msrb.gmra.mxu0 %vm810_vm11, %v1114_v0 }
 0x50e   : > { %v1099_v1 = vpop.f32.mrf.mxu2 }
 0x516   : > { %v1101_v2 = vpop.f32.mrf.mxu2 }
 0x517   : > { %v1115_v6 = vpack.c.bf16 %v1101_v2, %v1099_v1 }
 0x519   : > { %2123 = vmatmul.msk.bf16.vlgmr.msrb.gmra.mxu2 %vm810_vm11, %v1115_v6 }
 0x51e   : > { %v1104_v7 = vpop.f32.mrf.mxu2 }
 0x526   : > { %v1106_v8 = vpop.f32.mrf.mxu2 }
 0x527   : > { %v1116_v12 = vpack.c.bf16 %v1106_v8, %v1104_v7 }
 0x529   : > { %2124 = vmatmul.msk.bf16.vlgmr.msra.gmra.mxu3 %vm810_vm11, %v1116_v12 }
 0x52e   : > { %v1109_v32 = vpop.f32.mrf.mxu2 }
 0x536   : > { %v1111_v22 = vpop.f32.mrf.mxu2 }
 0x537   : > { %v1117_v63 = vpack.c.bf16 %v1111_v22, %v1109_v32 }
 0x539   : > { %2125 = vmatmul.msk.bf16.gmra.mxu3 %vm810_vm11, %v1117_v63 }
 0x549   : > { %2134 = vmatmul.msk.bf16.vlgmr.msrb.gmra.mxu3 %vm810_vm11, %v1187_v27 }
 0x559   : > { %2135 = vmatmul.msk.bf16.gmra.mxu3 %vm810_vm11, %v1189_v13 }
 0x569   : > { %2136 = vmatmul.msk.bf16.gmra.mxu3 %vm810_vm11, %v1191_v14 }
 0x579   : > { %2137 = vmatmul.msk.bf16.gmra.mxu3 %vm810_vm11, %v1193_v17 }
 0x5ac   : > { %v2810_v18 = vpop.f32.mrf.mxu3 }
 0x5b4   : > { %v2812_v20 = vpop.f32.mrf.mxu3 }
 0x5bc   : > { %v2814_v21 = vpop.f32.mrf.mxu3 }
 0x5c4   : > { %v2816_v52 = vpop.f32.mrf.mxu3 }
 0x5cc   : > { %v1235_v23 = vpop.f32.mrf.mxu3 }
 0x5cd   : > { %v1236_v25 = vadd.f32 %v2126_v54, %v1235_v23 }
 0x5cf   : > { %v1255_v31 = vsel %vm864_vm12, %v1236_v25, -inf }
 0x5d0   : > { %1256 = vmax.xlane.f32.xlu1 %v1255_v31 }
 0x5d4   : > { %v1237_v29 = vpop.f32.mrf.mxu3 }
 0x5d5   : > { %v1238_v26 = vadd.f32 %v2127_v15, %v1237_v29 }
 0x5d7   : > { %v1258_v60 = vsel %vm864_vm12, %v1238_v26, -inf }
 0x5d8   : > { %1259 = vmax.xlane.f32.xlu0 %v1258_v60 }
 0x5dc   : > { %v1240_v44 = vpop.f32.mrf.mxu3 }
 0x5dd   : > { %v1241_v36 = vadd.f32 %v2128_v34, %v1240_v44 }
 0x5df   : > { %v1261_v40 = vsel %vm864_vm12, %v1241_v36, -inf }
 0x5e0   : > { %1262 = vmax.xlane.f32.xlu2 %v1261_v40 }
 0x5e4   : > { %v1242_v38 = vpop.f32.mrf.mxu3 }
 0x5e5   : > { %v2833_v47 = vadd.f32 %v2129_v37, %v1242_v38 }
 0x5e7   : > { %v1264_v58 = vsel %vm864_vm12, %v2833_v47, -inf }
 0x5e8   : > { %1265 = vmax.xlane.f32.xlu1 %v1264_v58 }
 0x5ec   : > { %v1245_v33 = vpop.f32.mrf.mxu3 }
 0x5ed   : > { %v2840_v49 = vadd.f32 %v2130_v48, %v1245_v33 }
 0x5ef   : > { %v1267_v41 = vsel %vm864_vm12, %v2840_v49, -inf }
 0x5f0   : > { %1268 = vmax.xlane.f32.xlu0 %v1267_v41 }
 0x5f4   : > { %v1247_v28 = vpop.f32.mrf.mxu3 }
 0x5f5   : > { %v1248_v30 = vadd.f32 %v2131_v50, %v1247_v28 }
 0x5f7   : > { %v1270_v56 = vsel %vm864_vm12, %v1248_v30, -inf }
 0x5f8   : > { %1271 = vmax.xlane.f32.xlu2 %v1270_v56 }
 0x5fc   : > { %v1250_v53 = vpop.f32.mrf.mxu3 }
 0x5fd   : > { %v1251_v57 = vadd.f32 %v2132_v51, %v1250_v53 }
 0x5ff   : > { %v1273_v19 = vsel %vm864_vm12, %v1251_v57, -inf }
 0x600   : > { %1274 = vmax.xlane.f32.xlu1 %v1273_v19 }
 0x604   : > { %v1252_v59 = vpop.f32.mrf.mxu3 }
 0x605   : > { %v1253_v61 = vadd.f32 %v2133_v43, %v1252_v59 }
 0x607   : > { %v1276_v42 = vsel %vm864_vm12, %v1253_v61, -inf }
 0x608   : > { %1277 = vmax.xlane.f32.xlu0 %v1276_v42 }
 0x619   : > { %1453 = vrot.lane.b32.xlu1 %v2633_v35, %s2382_s28 }
 0x61c   : > { %1457 = vrot.lane.b32.xlu0 %v2646_v55, %s2382_s28 }
 0x643   : > { %v1257_v62 = vpop.xlane.xlu1 %1256 }
 0x644   : > { %v1279_v0 = vsub.f32 %v1236_v25, %v1257_v62 }
 0x646   : > { %v1287_v1 = vmul.f32 1.442695, %v1279_v0 }
 0x648   : > { %2305 = vpow2.f32 %v1287_v1 }
 0x64b   : > { %v1260_v2 = vpop.xlane.xlu0 %1259 }
 0x64c   : > { %v1280_v6 = vsub.f32 %v1238_v26, %v1260_v2 }
 0x64e   : > { %v2858_v7 = vpop.eup %2305  ;;  %v1289_v8 = vmul.f32 1.442695, %v1280_v6 }
 0x64f   : > { %v1303_v12 = vsel %vm864_vm12, %v2858_v7, 0.0 }
 0x650   : > { %2307 = vpow2.f32 %v1289_v8  ;;  %1304 = vadd.xlane.f32.xlu2 %v1303_v12 }
 0x653   : > { %v1263_v32 = vpop.xlane.xlu2 %1262 }
 0x654   : > { %v1281_v22 = vsub.f32 %v1241_v36, %v1263_v32 }
 0x656   : > { %v2862_v63 = vpop.eup %2307  ;;  %v1291_v35 = vmul.f32 1.442695, %v1281_v22 }
 0x657   : > { %v1306_v55 = vsel %vm864_vm12, %v2862_v63, 0.0 }
 0x658   : > { %2309 = vpow2.f32 %v1291_v35  ;;  %1307 = vadd.xlane.f32.xlu1 %v1306_v55 }
 0x65b   : > { %v1266_v29 = vpop.xlane.xlu1 %1265 }
 0x65c   : > { %v1282_v34 = vsub.f32 %v2833_v47, %v1266_v29 }
 0x65e   : > { %v2866_v27 = vpop.eup %2309 }
 0x65f   : > { %v1309_v13 = vsel %vm864_vm12, %v2866_v27, 0.0 }
 0x660   : > { %1310 = vadd.xlane.f32.xlu0 %v1309_v13 }
 0x663   : > { %v1269_v23 = vpop.xlane.xlu0 %1268 }
 0x664   : > { %v1283_v37 = vsub.f32 %v2840_v49, %v1269_v23 }
 0x666   : > { %v1295_v48 = vmul.f32 1.442695, %v1283_v37 }
 0x668   : > { %1455 = vrot.lane.b32.xlu2 %v2638_v46, %s2382_s28  ;;  %v1293_v46 = vmul.f32 1.442695, %v1282_v34 }
 0x66b   : > { %v1272_v14 = vpop.xlane.xlu2 %1271 }
 0x66c   : > { %v1284_v17 = vsub.f32 %v1248_v30, %v1272_v14 }
 0x66e   : > { %v1297_v54 = vmul.f32 1.442695, %v1284_v17 }
 0x670   : > { %2311 = vpow2.f32 %v1297_v54 }
 0x671   : > { %1451 = vrot.lane.b32.xlu1 %v2643_v45, %s2382_s28 }
 0x673   : > { %v1275_v44 = vpop.xlane.xlu1 %1274 }
 0x674   : > { %v1285_v45 = vsub.f32 %v1251_v57, %v1275_v44 }
 0x676   : > { %v2872_v25 = vpop.eup %2311  ;;  %v1299_v38 = vmul.f32 1.442695, %v1285_v45 }
 0x677   : > { %v1318_v31 = vsel %vm864_vm12, %v2872_v25, 0.0 }
 0x678   : > { %1319 = vadd.xlane.f32.xlu0 %v1318_v31 }
 0x67b   : > { %v1278_v15 = vpop.xlane.xlu0 %1277 }
 0x67c   : > { %v1286_v26 = vsub.f32 %v1253_v61, %v1278_v15 }
 0x67e   : > { %v1301_v60 = vmul.f32 1.442695, %v1286_v26 }
 0x680   : > { %2313 = vpow2.f32 %v1301_v60 }
 0x681   : > { %2315 = vpow2.f32 %v1293_v46 }
 0x682   : > { %2317 = vpow2.f32 %v1299_v38 }
 0x683   : > { %2319 = vpow2.f32 %v1295_v48 }
 0x686   : > { %v2877_v36 = vpop.eup %2313 }
 0x687   : > { %v1324_v40 = vsel %vm864_vm12, %v2877_v36, 0.0  ;;  %v2882_v58 = vpop.eup %2315 }
 0x688   : > { %1325 = vadd.xlane.f32.xlu0 %v1324_v40  ;;  %v1312_v47 = vsel %vm864_vm12, %v2882_v58, 0.0  ;;  %v2886_v41 = vpop.eup %2317 }
 0x689   : > { %v2888_v50 = vpop.eup %2319  ;;  %v1321_v28 = vsel %vm864_vm12, %v2886_v41, 0.0 }
 0x68a   : > { %v1315_v49 = vsel %vm864_vm12, %v2888_v50, 0.0 }
 0x68b   : > { %v1454_v30 = vpop.permute.xlu1 %1453 }
 0x68e   : > { %v1458_v33 = vpop.permute.xlu0 %1457 }
 0x68f   : > { %1479 = vmatpush.bf16.msra.mxu0 %v1458_v33 }
 0x691   : > { %1313 = vadd.xlane.f32.xlu2 %v1312_v47 }
 0x699   : > { %1322 = vadd.xlane.f32.xlu2 %v1321_v28 }
 0x69b   : > { %1316 = vadd.xlane.f32.xlu1 %v1315_v49 }
 0x6c3   : > { %v1305_v56 = vpop.xlane.xlu2 %1304 }
 0x6c4   : > { %2321 = vrcp.f32 %v1305_v56  ;;  %v1338_v12 = vand.u32 2147483648, %v1305_v56  ;;  %vm1332_vm8 = vweird.f32 %v1305_v56  ;;  %v1336_v32 = vand.u32 2147483647, %v1305_v56 }
 0x6c6   : > { %v1339_v13 = vor.u32 1.1754944e-38, %v1338_v12  ;;  %vm1337_vm13 = vcmp.eq.f32.partialorder %v1336_v32, 8.507059e+37 }
 0x6ca   : > { %v2322_v51 = vpop.eup %2321 }
 0x6cb   : > { %v1456_v53 = vpop.permute.xlu2 %1455  ;;  %v1308_v57 = vpop.xlane.xlu1 %1307  ;;  %v1328_v19 = vmul.f32 %v2322_v51, %v1305_v56  ;;  %vm1333_vm5 = vweird.f32 %v2322_v51 }
 0x6cc   : > { %2323 = vrcp.f32 %v1308_v57  ;;  %1480 = vmatpush.bf16.msra.mxu0 %v1456_v53  ;;  %v1353_v1 = vand.u32 2147483648, %v1308_v57  ;;  %vm1347_vm6 = vweird.f32 %v1308_v57  ;;  %v1351_v8 = vand.u32 2147483647, %v1308_v57  ;;  %vm1334_vm9 = vmor %vm1332_vm8, %vm1333_vm5 }
 0x6cd   : > { %v1329_v43 = vsub.f32 1.0, %v1328_v19 }
 0x6ce   : > { %v1354_v35 = vor.u32 1.1754944e-38, %v1353_v1  ;;  %vm1352_vm10 = vcmp.eq.f32.partialorder %v1351_v8, 8.507059e+37 }
 0x6cf   : > { %v1330_v42 = vmul.f32 %v2322_v51, %v1329_v43 }
 0x6d0   : > { %1481 = vmatpush.bf16.msra.mxu0 %v1454_v30 }
 0x6d1   : > { %v1331_v2 = vadd.f32 %v2322_v51, %v1330_v42 }
 0x6d2   : > { %v2324_v59 = vpop.eup %2323 }
 0x6d3   : > { %v1343_v61 = vmul.f32 %v2324_v59, %v1308_v57  ;;  %vm1348_vm4 = vweird.f32 %v2324_v59  ;;  %v1335_v55 = vsel %vm1334_vm9, %v2322_v51, %v1331_v2  ;;  %v1311_v29 = vpop.xlane.xlu0 %1310 }
 0x6d4   : > { %vm1349_vm7 = vmor %vm1347_vm6, %vm1348_vm4  ;;  %v1340_v17 = vsel %vm1337_vm13, %v1339_v13, %v1335_v55  ;;  %2325 = vrcp.f32 %v1311_v29  ;;  %vm1362_vm15 = vweird.f32 %v1311_v29  ;;  %v1368_v38 = vand.u32 2147483648, %v1311_v29  ;;  %v2201_v13 = vld [vmem:[%s3182_s6 + $0x8] sm:$0xff] }
 0x6d5   : > { %v1344_v62 = vsub.f32 1.0, %v1343_v61  ;;  %v1341_v23 = vmul.f32 %v2858_v7, %v1340_v17  ;;  %v1366_v33 = vand.u32 2147483647, %v1311_v29  ;;  %1533 = vmatpush.bf16.msra.mxu2 %v2201_v13 }
 0x6d6   : > { %v1369_v57 = vor.u32 1.1754944e-38, %v1368_v38 }
 0x6d7   : > { %v1345_v0 = vmul.f32 %v2324_v59, %v1344_v62  ;;  %vm1367_vm3 = vcmp.eq.f32.partialorder %v1366_v33, 8.507059e+37 }
 0x6d9   : > { %v1346_v6 = vadd.f32 %v2324_v59, %v1345_v0 }
 0x6da   : > { %v2326_v26 = vpop.eup %2325 }
 0x6db   : > { %v1350_v22 = vsel %vm1349_vm7, %v2324_v59, %v1346_v6  ;;  %v1358_v60 = vmul.f32 %v2326_v26, %v1311_v29  ;;  %vm1363_vm14 = vweird.f32 %v2326_v26 }
 0x6dc   : > { %v1355_v14 = vsel %vm1352_vm10, %v1354_v35, %v1350_v22  ;;  %vm2902_vm1 = vmor %vm1362_vm15, %vm1363_vm14 }
 0x6dd   : > { %v1356_v54 = vmul.f32 %v2862_v63, %v1355_v14  ;;  %v1359_v34 = vsub.f32 1.0, %v1358_v60 }
 0x6df   : > { %v1447_v15 = vpack.c.bf16 %v1356_v54, %v1341_v23  ;;  %v1360_v45 = vmul.f32 %v2326_v26, %v1359_v34 }
 0x6e1   : > { %v1361_v40 = vadd.f32 %v2326_v26, %v1360_v45 }
 0x6e3   : > { %v1452_v31 = vpop.permute.xlu1 %1451  ;;  %v1365_v30 = vsel %vm2902_vm1, %v2326_v26, %v1361_v40 }
 0x6e4   : > { %1482 = vmatpush.bf16.msra.mxu0 %v1452_v31  ;;  %v1370_v61 = vsel %vm1367_vm3, %v1369_v57, %v1365_v30 }
 0x6e5   : > { %v1371_v8 = vmul.f32 %v2866_v27, %v1370_v61 }
 0x6e7   : > { %2138 = vmatmul.msk.bf16.vlgmr.msra.gmra.mxu0 %vm864_vm12, %v1447_v15 }
 0x6eb   : > { %v2897_v46 = vpop.xlane.xlu0 %1319 }
 0x6ec   : > { %v1413_v31 = vand.u32 2147483648, %v2897_v46  ;;  %vm1407_vm13 = vweird.f32 %v2897_v46  ;;  %v1411_v15 = vand.u32 2147483647, %v2897_v46 }
 0x6ee   : > { %v1414_v45 = vor.u32 1.1754944e-38, %v1413_v31  ;;  %vm1412_vm1 = vcmp.eq.f32.partialorder %v1411_v15, 8.507059e+37 }
 0x6fb   : > { %v2912_v62 = vpop.xlane.xlu0 %1325 }
 0x704   : > { %v1314_v44 = vpop.xlane.xlu2 %1313 }
 0x705   : > { %2327 = vrcp.f32 %v1314_v44  ;;  %v1383_v49 = vand.u32 2147483648, %v1314_v44  ;;  %v1381_v53 = vand.u32 2147483647, %v1314_v44  ;;  %vm1377_vm4 = vweird.f32 %v1314_v44 }
 0x706   : > { %2329 = vrcp.f32 %v2897_v46 }
 0x707   : > { %v1384_v59 = vor.u32 1.1754944e-38, %v1383_v49  ;;  %vm1382_vm6 = vcmp.eq.f32.partialorder %v1381_v53, 8.507059e+37 }
 0x70b   : > { %v2328_v63 = vpop.eup %2327 }
 0x70c   : > { %v1373_v7 = vmul.f32 %v2328_v63, %v1314_v44  ;;  %v2900_v37 = vpop.eup %2329  ;;  %vm1378_vm2 = vweird.f32 %v2328_v63  ;;  %v2910_v43 = vpop.xlane.xlu2 %1322 }
 0x70d   : > { %v1403_v56 = vmul.f32 %v2900_v37, %v2897_v46  ;;  %vm1379_vm5 = vmor %vm1377_vm4, %vm1378_vm2  ;;  %vm1408_vm8 = vweird.f32 %v2900_v37  ;;  %v1428_v30 = vand.u32 2147483648, %v2910_v43  ;;  %vm1422_vm4 = vweird.f32 %v2910_v43 }
 0x70e   : > { %v1374_v47 = vsub.f32 1.0, %v1373_v7  ;;  %v1317_v28 = vpop.xlane.xlu1 %1316  ;;  %vm1409_vm14 = vmor %vm1407_vm13, %vm1408_vm8 }
 0x70f   : > { %2331 = vrcp.f32 %v1317_v28  ;;  %v1404_v42 = vsub.f32 1.0, %v1403_v56  ;;  %v1398_v27 = vand.u32 2147483648, %v1317_v28  ;;  %vm1392_vm9 = vweird.f32 %v1317_v28 }
 0x710   : > { %v1375_v51 = vmul.f32 %v2328_v63, %v1374_v47  ;;  %2333 = vrcp.f32 %v2910_v43  ;;  %v1396_v54 = vand.u32 2147483647, %v1317_v28  ;;  %v1426_v56 = vand.u32 2147483647, %v2910_v43 }
 0x711   : > { %2335 = vrcp.f32 %v2912_v62  ;;  %v1405_v32 = vmul.f32 %v2900_v37, %v1404_v42  ;;  %v1399_v60 = vor.u32 1.1754944e-38, %v1398_v27  ;;  %v1429_v53 = vor.u32 1.1754944e-38, %v1428_v30  ;;  %v1150_v27 = vpop.f32.mrf.mxu2 }
 0x712   : > { %v1376_v19 = vadd.f32 %v2328_v63, %v1375_v51  ;;  %vm1397_vm15 = vcmp.eq.f32.partialorder %v1396_v54, 8.507059e+37  ;;  %v1443_v51 = vand.u32 2147483648, %v2912_v62  ;;  %vm1427_vm8 = vcmp.eq.f32.partialorder %v1426_v56, 8.507059e+37 }
 0x714   : > { %v1380_v0 = vsel %vm1379_vm5, %v2328_v63, %v1376_v19  ;;  %v1444_v19 = vor.u32 1.1754944e-38, %v1443_v51 }
 0x715   : > { %v2332_v1 = vpop.eup %2331  ;;  %v1385_v2 = vsel %vm1382_vm6, %v1384_v59, %v1380_v0  ;;  %vm1437_vm6 = vweird.f32 %v2912_v62 }
 0x716   : > { %v1388_v6 = vmul.f32 %v2332_v1, %v1317_v28  ;;  %v1386_v12 = vmul.f32 %v2882_v58, %v1385_v2  ;;  %vm1393_vm7 = vweird.f32 %v2332_v1  ;;  %v2334_v14 = vpop.eup %2333  ;;  %v1406_v58 = vadd.f32 %v2900_v37, %v1405_v32 }
 0x717   : > { %v2336_v23 = vpop.eup %2335  ;;  %vm1394_vm10 = vmor %vm1392_vm9, %vm1393_vm7  ;;  %v1418_v29 = vmul.f32 %v2334_v14, %v2910_v43  ;;  %vm1423_vm2 = vweird.f32 %v2334_v14 }
 0x718   : > { %v1389_v22 = vsub.f32 1.0, %v1388_v6  ;;  %v1448_v35 = vpack.c.bf16 %v1386_v12, %v1371_v8  ;;  %v1433_v34 = vmul.f32 %v2336_v23, %v2912_v62  ;;  %v1410_v44 = vsel %vm1409_vm14, %v2900_v37, %v1406_v58  ;;  %vm1424_vm5 = vmor %vm1422_vm4, %vm1423_vm2  ;;  %v2250_v58 = vld [vmem:[%s3183_s7] ss:$0 sm:$0xff] }
 0x719   : > { %v1419_v40 = vsub.f32 1.0, %v1418_v29  ;;  %v1415_v7 = vsel %vm1412_vm1, %v1414_v45, %v1410_v44  ;;  %vm1438_vm3 = vweird.f32 %v2336_v23  ;;  %v774_v54 = vadd.f32 %v2250_v58, %v2478_v5 }
 0x71a   : > { %v1390_v55 = vmul.f32 %v2332_v1, %v1389_v22  ;;  %2139 = vmatmul.msk.bf16.gmra.mxu0 %vm864_vm12, %v1448_v35  ;;  %v1434_v38 = vsub.f32 1.0, %v1433_v34  ;;  %v1416_v46 = vmul.f32 %v2872_v25, %v1415_v7  ;;  %v1441_v25 = vand.u32 2147483647, %v2912_v62  ;;  %vm1439_vm7 = vmor %vm1437_vm6, %vm1438_vm3 }
 0x71b   : > { %v1420_v33 = vmul.f32 %v2334_v14, %v1419_v40  ;;  %v775_v29 = vadd.f32 %v2250_v58, %v2490_v11  ;;  %v776_v5 = vadd.f32 %v2250_v58, %v2476_v4  ;;  %v777_v11 = vadd.f32 %v2250_v58, %v2488_v10 }
 0x71c   : > { %v1391_v17 = vadd.f32 %v2332_v1, %v1390_v55  ;;  %v1435_v47 = vmul.f32 %v2336_v23, %v1434_v38  ;;  %vm1442_vm9 = vcmp.eq.f32.partialorder %v1441_v25, 8.507059e+37  ;;  %v779_v10 = vadd.f32 %v2250_v58, %v2486_v9 }
 0x71d   : > { %v1421_v49 = vadd.f32 %v2334_v14, %v1420_v33 }
 0x71e   : > { %v1395_v26 = vsel %vm1394_vm10, %v2332_v1, %v1391_v17  ;;  %v1436_v37 = vadd.f32 %v2336_v23, %v1435_v47  ;;  %v1145_v1 = vpop.f32.mrf.mxu0  ;;  %v1152_v17 = vpop.f32.mrf.mxu2  ;;  %v778_v47 = vadd.f32 %v2250_v58, %v2474_v3  ;;  %v1170_v56 = vadd.f32 %v2812_v20, %v779_v10 }
 0x71f   : > { %v1400_v63 = vsel %vm1397_vm15, %v1399_v60, %v1395_v26  ;;  %v780_v3 = vadd.f32 %v2250_v58, %v2498_v16  ;;  %v781_v16 = vadd.f32 %v2250_v58, %v2515_v39 }
 0x720   : > { %v1401_v48 = vmul.f32 %v2888_v50, %v1400_v63  ;;  %v1425_v50 = vsel %vm1424_vm5, %v2334_v14, %v1421_v49  ;;  %v1440_v57 = vsel %vm1439_vm7, %v2336_v23, %v1436_v37  ;;  %v1165_v23 = vadd.f32 %v1145_v1, %v774_v54 }
 0x721   : > { %v1430_v59 = vsel %vm1427_vm8, %v1429_v53, %v1425_v50  ;;  %v1445_v61 = vsel %vm1442_vm9, %v1444_v19, %v1440_v57  ;;  %v1167_v63 = vadd.f32 %v1150_v27, %v776_v5  ;;  %v1169_v4 = vadd.f32 %v2810_v18, %v778_v47  ;;  %v2202_v47 = vld [vmem:[%s3186_s10] sm:$0xff] }
 0x722   : > { %v1449_v28 = vpack.c.bf16 %v1416_v46, %v1401_v48  ;;  %v1431_v42 = vmul.f32 %v2886_v41, %v1430_v59  ;;  %v1446_v43 = vmul.f32 %v2877_v36, %v1445_v61  ;;  %v1168_v48 = vadd.f32 %v1152_v17, %v777_v11 }
 0x723   : > { %v1171_v18 = vadd.f32 %v2814_v21, %v780_v3 }
 0x724   : > { %v1450_v0 = vpack.c.bf16 %v1446_v43, %v1431_v42 }
 0x726   : > { %v1147_v2 = vpop.f32.mrf.mxu0 }
 0x727   : > { %v1166_v60 = vadd.f32 %v1147_v2, %v775_v29 }
 0x72a   : > { %2140 = vmatmul.msk.bf16.gmra.mxu0 %vm864_vm12, %v1449_v28 }
 0x73a   : > { %2141 = vmatmul.msk.bf16.gmra.mxu0 %vm864_vm12, %v1450_v0  ;;  %v1172_v0 = vadd.f32 %v2816_v52, %v781_v16 }
 0x764   : > { %v1484_v6 = vpop.f32.mrf.mxu0 }
 0x76c   : > { %v1486_v62 = vpop.f32.mrf.mxu0 }
 0x76d   : > { %v1504_v8 = vpack.c.bf16 %v1486_v62, %v1484_v6 }
 0x76f   : > { %2146 = vmatmul.msk.bf16.vlgmr.msra.gmra.mxu2 %vm810_vm11, %v1504_v8 }
 0x797   : > { %v1489_v12 = vpop.f32.mrf.mxu0 }
 0x79f   : > { %v1491_v32 = vpop.f32.mrf.mxu0 }
 0x7a0   : > { %v1505_v22 = vpack.c.bf16 %v1491_v32, %v1489_v12 }
 0x7a2   : > { %2147 = vmatmul.msk.bf16.gmra.mxu2 %vm810_vm11, %v1505_v22 }
 0x7a7   : > { %v1494_v35 = vpop.f32.mrf.mxu0 }
 0x7af   : > { %v1496_v55 = vpop.f32.mrf.mxu0 }
 0x7b0   : > { %v1506_v41 = vpack.c.bf16 %v1496_v55, %v1494_v35 }
 0x7b2   : > { %2148 = vmatmul.msk.bf16.gmra.mxu2 %vm810_vm11, %v1506_v41 }
 0x7b7   : > { %v1499_v36 = vpop.f32.mrf.mxu0 }
 0x7bf   : > { %v1501_v13 = vpop.f32.mrf.mxu0 }
 0x7c0   : > { %v1507_v14 = vpack.c.bf16 %v1501_v13, %v1499_v36 }
 0x7c2   : > { %2149 = vmatmul.msk.bf16.gmra.mxu2 %vm810_vm11, %v1507_v14 }
 0x7f2   : > { %v1535_v31 = vpop.f32.mrf.mxu2 }
 0x7f3   : > { %v2951_v15 = vadd.f32 %v1535_v31, %v1165_v23 }
 0x7f5   : > { %v1565_v26 = vsel %vm487_vm0, %v2951_v15, 0.0 }
 0x7f6   : > { %1566 = vadd.xlane.f32.xlu2 %v1565_v26 }
 0x7fa   : > { %v1537_v34 = vpop.f32.mrf.mxu2 }
 0x7fb   : > { %v2956_v44 = vadd.f32 %v1537_v34, %v1166_v60 }
 0x7fd   : > { %v1568_v45 = vsel %vm487_vm0, %v2956_v44, 0.0 }
 0x7fe   : > { %1569 = vadd.xlane.f32.xlu0 %v1568_v45 }
 0x825   : > { %v1540_v40 = vpop.f32.mrf.mxu2 }
 0x826   : > { %v2961_v7 = vadd.f32 %v1540_v40, %v1167_v63 }
 0x828   : > { %v1571_v38 = vsel %vm487_vm0, %v2961_v7, 0.0 }
 0x829   : > { %1572 = vadd.xlane.f32.xlu1 %v1571_v38  ;;  %v2203_v38 = vld [vmem:[%s3186_s10 + $0x8] sm:$0xff] }
 0x82a   : > { %1805 = vmatpush.bf16.msrb.mxu1 %v2203_v38 }
 0x82d   : > { %v1542_v33 = vpop.f32.mrf.mxu2 }
 0x82e   : > { %v2966_v46 = vadd.f32 %v1542_v33, %v1168_v48  ;;  %1806 = vmatpush.bf16.msrb.mxu1 %v2202_v47 }
 0x830   : > { %v1574_v28 = vsel %vm487_vm0, %v2966_v46, 0.0 }
 0x831   : > { %1575 = vadd.xlane.f32.xlu2 %v1574_v28 }
 0x835   : > { %v1545_v49 = vpop.f32.mrf.mxu2 }
 0x836   : > { %v2972_v30 = vadd.f32 %v1545_v49, %v1169_v4 }
 0x838   : > { %v1577_v37 = vsel %vm487_vm0, %v2972_v30, 0.0 }
 0x839   : > { %1578 = vadd.xlane.f32.xlu0 %v1577_v37 }
 0x83d   : > { %v1547_v51 = vpop.f32.mrf.mxu2 }
 0x83e   : > { %v2978_v25 = vadd.f32 %v1547_v51, %v1170_v56 }
 0x840   : > { %v1580_v50 = vsel %vm487_vm0, %v2978_v25, 0.0 }
 0x841   : > { %1581 = vadd.xlane.f32.xlu1 %v1580_v50 }
 0x845   : > { %v1550_v53 = vpop.f32.mrf.mxu2 }
 0x846   : > { %v2984_v57 = vadd.f32 %v1550_v53, %v1171_v18 }
 0x848   : > { %v1583_v9 = vsel %vm487_vm0, %v2984_v57, 0.0 }
 0x849   : > { %1584 = vadd.xlane.f32.xlu1 %v1583_v9 }
 0x84d   : > { %v1552_v42 = vpop.f32.mrf.mxu2 }
 0x84e   : > { %v2998_v2 = vadd.f32 %v1552_v42, %v1172_v0 }
 0x850   : > { %v1586_v8 = vsel %vm487_vm0, %v2998_v2, 0.0 }
 0x869   : > { %v1567_v19 = vpop.xlane.xlu2 %1566 }
 0x86a   : > { %v1589_v20 = vmul.f32 %v1567_v19, %v2502_v24 }
 0x86c   : > { %v2990_v59 = vsub.f32 %v2951_v15, %v1589_v20 }
 0x86e   : > { %v1605_v61 = vmul.f32 %v2990_v59, %v2990_v59 }
 0x870   : > { %v1613_v21 = vsel %vm487_vm0, %v1605_v61, 0.0 }
 0x871   : > { %v1570_v43 = vpop.xlane.xlu0 %1569  ;;  %1614 = vadd.xlane.f32.xlu2 %v1613_v21 }
 0x872   : > { %v1590_v1 = vmul.f32 %v1570_v43, %v2502_v24 }
 0x874   : > { %v3001_v6 = vsub.f32 %v2956_v44, %v1590_v1 }
 0x876   : > { %v1606_v39 = vmul.f32 %v3001_v6, %v3001_v6 }
 0x878   : > { %v1616_v62 = vsel %vm487_vm0, %v1606_v39, 0.0 }
 0x879   : > { %1617 = vadd.xlane.f32.xlu0 %v1616_v62  ;;  %1587 = vadd.xlane.f32.xlu2 %v1586_v8  ;;  %v3062_v62 = vld [vmem:[%s3184_s8] ss:$0 sm:$0xff] }
 0x89c   : > { %v1573_v12 = vpop.xlane.xlu1 %1572 }
 0x89d   : > { %v1591_v52 = vmul.f32 %v1573_v12, %v2502_v24 }
 0x89f   : > { %v3010_v32 = vsub.f32 %v2961_v7, %v1591_v52 }
 0x8a1   : > { %v1607_v22 = vmul.f32 %v3010_v32, %v3010_v32 }
 0x8a3   : > { %v1619_v35 = vsel %vm487_vm0, %v1607_v22, 0.0 }
 0x8a4   : > { %v1576_v55 = vpop.xlane.xlu2 %1575  ;;  %1620 = vadd.xlane.f32.xlu0 %v1619_v35  ;;  %v3069_v35 = vld [vmem:[%s3185_s9] ss:$0 sm:$0xff] }
 0x8a5   : > { %v1592_v41 = vmul.f32 %v1576_v55, %v2502_v24 }
 0x8a7   : > { %v3017_v36 = vsub.f32 %v2966_v46, %v1592_v41 }
 0x8a9   : > { %v1608_v13 = vmul.f32 %v3017_v36, %v3017_v36 }
 0x8ab   : > { %v1622_v14 = vsel %vm487_vm0, %v1608_v13, 0.0 }
 0x8ac   : > { %v1579_v27 = vpop.xlane.xlu0 %1578  ;;  %1623 = vadd.xlane.f32.xlu1 %v1622_v14 }
 0x8ad   : > { %v1593_v58 = vmul.f32 %v1579_v27, %v2502_v24 }
 0x8af   : > { %v3024_v17 = vsub.f32 %v2972_v30, %v1593_v58 }
 0x8b1   : > { %v1609_v54 = vmul.f32 %v3024_v17, %v3024_v17 }
 0x8b3   : > { %v1625_v23 = vsel %vm487_vm0, %v1609_v54, 0.0 }
 0x8b4   : > { %1626 = vadd.xlane.f32.xlu2 %v1625_v23  ;;  %v1582_v31 = vpop.xlane.xlu1 %1581 }
 0x8b5   : > { %v1594_v29 = vmul.f32 %v1582_v31, %v2502_v24 }
 0x8b7   : > { %v3031_v26 = vsub.f32 %v2978_v25, %v1594_v29 }
 0x8b9   : > { %v1610_v60 = vmul.f32 %v3031_v26, %v3031_v26 }
 0x8bb   : > { %v1628_v34 = vsel %vm487_vm0, %v1610_v60, 0.0 }
 0x8bc   : > { %1629 = vadd.xlane.f32.xlu0 %v1628_v34  ;;  %v1585_v45 = vpop.xlane.xlu1 %1584 }
 0x8bd   : > { %v1595_v5 = vmul.f32 %v1585_v45, %v2502_v24 }
 0x8bf   : > { %v3038_v63 = vsub.f32 %v2984_v57, %v1595_v5 }
 0x8c1   : > { %v1611_v40 = vmul.f32 %v3038_v63, %v3038_v63 }
 0x8c3   : > { %v1631_v11 = vsel %vm487_vm0, %v1611_v40, 0.0 }
 0x8c4   : > { %1632 = vadd.xlane.f32.xlu1 %v1631_v11 }
 0x8e4   : > { %v1615_v48 = vpop.xlane.xlu2 %1614 }
 0x8e5   : > { %v1637_v33 = vmul.f32 %v1615_v48, %v2502_v24 }
 0x8e7   : > { %v1645_v28 = vadd.f32 1e-05, %v1637_v33 }
 0x8e9   : > { %2337 = vrsqrt.f32 %v1645_v28  ;;  %vm1659_vm12 = vweird.f32 %v1645_v28 }
 0x8ec   : > { %v1618_v4 = vpop.xlane.xlu0 %1617  ;;  %v1588_v49 = vpop.xlane.xlu2 %1587 }
 0x8ed   : > { %v1638_v10 = vmul.f32 %v1618_v4, %v2502_v24  ;;  %v1596_v37 = vmul.f32 %v1588_v49, %v2502_v24 }
 0x8ef   : > { %v2338_v56 = vpop.eup %2337  ;;  %v1646_v51 = vadd.f32 1e-05, %v1638_v10  ;;  %v3053_v3 = vsub.f32 %v2998_v2, %v1596_v37 }
 0x8f0   : > { %v1654_v50 = vmul.f32 %v2338_v56, %v1645_v28  ;;  %vm1660_vm11 = vweird.f32 %v2338_v56 }
 0x8f1   : > { %2339 = vrsqrt.f32 %v1646_v51  ;;  %v1612_v18 = vmul.f32 %v3053_v3, %v3053_v3  ;;  %vm1661_vm10 = vmor %vm1659_vm12, %vm1660_vm11  ;;  %vm1669_vm14 = vweird.f32 %v1646_v51 }
 0x8f2   : > { %v1655_v53 = vmul.f32 %v2338_v56, %v1654_v50 }
 0x8f3   : > { %v1634_v9 = vsel %vm487_vm0, %v1612_v18, 0.0 }
 0x8f4   : > { %v1656_v19 = vmul.f32 0.5, %v1655_v53  ;;  %1635 = vadd.xlane.f32.xlu2 %v1634_v9 }
 0x8f6   : > { %v1657_v20 = vsub.f32 1.5, %v1656_v19 }
 0x8f7   : > { %v2340_v16 = vpop.eup %2339 }
 0x8f8   : > { %v1658_v61 = vmul.f32 %v2338_v56, %v1657_v20  ;;  %v1664_v21 = vmul.f32 %v2340_v16, %v1646_v51  ;;  %vm1670_vm13 = vweird.f32 %v2340_v16 }
 0x8f9   : > { %vm1671_vm15 = vmor %vm1669_vm14, %vm1670_vm13 }
 0x8fa   : > { %v1665_v42 = vmul.f32 %v2340_v16, %v1664_v21  ;;  %v1662_v43 = vsel %vm1661_vm10, %v2338_v56, %v1658_v61 }
 0x8fb   : > { %v1733_v39 = vmul.f32 %v1662_v43, %v2990_v59 }
 0x8fc   : > { %v1666_v0 = vmul.f32 0.5, %v1665_v42 }
 0x8fd   : > { %v1744_v22 = vmul.f32 %v3062_v62, %v1733_v39 }
 0x8fe   : > { %v1667_v1 = vsub.f32 1.5, %v1666_v0 }
 0x8ff   : > { %v1755_v55 = vadd.f32 %v3069_v35, %v1744_v22 }
 0x900   : > { %v1668_v8 = vmul.f32 %v2340_v16, %v1667_v1 }
 0x902   : > { %v1672_v12 = vsel %vm1671_vm15, %v2340_v16, %v1668_v8 }
 0x903   : > { %v1734_v52 = vmul.f32 %v1672_v12, %v3001_v6 }
 0x905   : > { %v1745_v59 = vmul.f32 %v3062_v62, %v1734_v52 }
 0x907   : > { %v1756_v41 = vadd.f32 %v3069_v35, %v1745_v59 }
 0x909   : > { %v1763_v13 = vpack.c.bf16 %v1756_v41, %v1755_v55 }
 0x90b   : > { %2158 = vmatmul.msk.bf16.vlgmr.msrb.gmra.mxu1 %vm487_vm0, %v1763_v13 }
 0x917   : > { %v1621_v14 = vpop.xlane.xlu0 %1620 }
 0x918   : > { %v1639_v27 = vmul.f32 %v1621_v14, %v2502_v24 }
 0x91a   : > { %v1647_v6 = vadd.f32 1e-05, %v1639_v27 }
 0x91c   : > { %2341 = vrsqrt.f32 %v1647_v6  ;;  %vm1679_vm2 = vweird.f32 %v1647_v6 }
 0x91f   : > { %v1624_v58 = vpop.xlane.xlu1 %1623 }
 0x920   : > { %v1640_v54 = vmul.f32 %v1624_v58, %v2502_v24 }
 0x922   : > { %v2342_v23 = vpop.eup %2341  ;;  %v1648_v31 = vadd.f32 1e-05, %v1640_v54 }
 0x923   : > { %v1674_v29 = vmul.f32 %v2342_v23, %v1647_v6  ;;  %vm1680_vm1 = vweird.f32 %v2342_v23 }
 0x924   : > { %2343 = vrsqrt.f32 %v1648_v31  ;;  %vm1681_vm3 = vmor %vm1679_vm2, %vm1680_vm1  ;;  %vm1689_vm5 = vweird.f32 %v1648_v31 }
 0x925   : > { %v1675_v60 = vmul.f32 %v2342_v23, %v1674_v29 }
 0x927   : > { %v1676_v34 = vmul.f32 0.5, %v1675_v60  ;;  %v1627_v45 = vpop.xlane.xlu2 %1626 }
 0x928   : > { %v1641_v5 = vmul.f32 %v1627_v45, %v2502_v24 }
 0x929   : > { %v1677_v40 = vsub.f32 1.5, %v1676_v34 }
 0x92a   : > { %v2344_v11 = vpop.eup %2343  ;;  %v1649_v38 = vadd.f32 1e-05, %v1641_v5 }
 0x92b   : > { %v1678_v48 = vmul.f32 %v2342_v23, %v1677_v40  ;;  %v1684_v33 = vmul.f32 %v2344_v11, %v1648_v31  ;;  %vm1690_vm4 = vweird.f32 %v2344_v11  ;;  %v2211_v40 = vld [vmem:[%s3188_s12 + $0x38] sm:$0xff] }
 0x92c   : > { %2345 = vrsqrt.f32 %v1649_v38  ;;  %vm1691_vm6 = vmor %vm1689_vm5, %vm1690_vm4  ;;  %vm1699_vm8 = vweird.f32 %v1649_v38  ;;  %1968 = vmatpush.bf16.msra.mxu3 %v2211_v40 }
 0x92d   : > { %v1685_v47 = vmul.f32 %v2344_v11, %v1684_v33  ;;  %v1682_v28 = vsel %vm1681_vm3, %v2342_v23, %v1678_v48 }
 0x92e   : > { %v1735_v51 = vmul.f32 %v1682_v28, %v3010_v32 }
 0x92f   : > { %v1686_v4 = vmul.f32 0.5, %v1685_v47  ;;  %v1630_v49 = vpop.xlane.xlu0 %1629  ;;  %v2209_v47 = vld [vmem:[%s3188_s12 + $0x28] sm:$0xff] }
 0x930   : > { %v1642_v10 = vmul.f32 %v1630_v49, %v2502_v24  ;;  %v1746_v16 = vmul.f32 %v3062_v62, %v1735_v51  ;;  %v2208_v49 = vld [vmem:[%s3188_s12 + $0x20] sm:$0xff] }
 0x931   : > { %v1687_v37 = vsub.f32 1.5, %v1686_v4 }
 0x932   : > { %v2346_v56 = vpop.eup %2345  ;;  %v1650_v50 = vadd.f32 1e-05, %v1642_v10  ;;  %v1757_v0 = vadd.f32 %v3069_v35, %v1746_v16 }
 0x933   : > { %v1688_v18 = vmul.f32 %v2344_v11, %v1687_v37  ;;  %v1694_v53 = vmul.f32 %v2346_v56, %v1649_v38  ;;  %vm1700_vm7 = vweird.f32 %v2346_v56  ;;  %v2210_v38 = vld [vmem:[%s3188_s12 + $0x30] sm:$0xff] }
 0x934   : > { %2347 = vrsqrt.f32 %v1650_v50  ;;  %vm1701_vm9 = vmor %vm1699_vm8, %vm1700_vm7  ;;  %vm1709_vm12 = vweird.f32 %v1650_v50  ;;  %1969 = vmatpush.bf16.msra.mxu3 %v2210_v38 }
 0x935   : > { %v1692_v9 = vsel %vm1691_vm6, %v2344_v11, %v1688_v18  ;;  %v1695_v19 = vmul.f32 %v2346_v56, %v1694_v53  ;;  %v2206_v53 = vld [vmem:[%s3188_s12 + $0x10] sm:$0xff] }
 0x936   : > { %v1736_v20 = vmul.f32 %v1692_v9, %v3017_v36 }
 0x937   : > { %v1696_v61 = vmul.f32 0.5, %v1695_v19  ;;  %v1633_v23 = vpop.xlane.xlu1 %1632 }
 0x938   : > { %v1747_v21 = vmul.f32 %v3062_v62, %v1736_v20  ;;  %1970 = vmatpush.bf16.msra.mxu3 %v2209_v47 }
 0x939   : > { %v1697_v42 = vsub.f32 1.5, %v1696_v61 }
 0x93a   : > { %v2348_v43 = vpop.eup %2347  ;;  %v1758_v32 = vadd.f32 %v3069_v35, %v1747_v21 }
 0x93b   : > { %v1698_v1 = vmul.f32 %v2346_v56, %v1697_v42  ;;  %v1704_v39 = vmul.f32 %v2348_v43, %v1650_v50  ;;  %vm1710_vm11 = vweird.f32 %v2348_v43  ;;  %v2207_v50 = vld [vmem:[%s3188_s12 + $0x18] sm:$0xff] }
 0x93c   : > { %v1764_v8 = vpack.c.bf16 %v1758_v32, %v1757_v0  ;;  %vm1711_vm10 = vmor %vm1709_vm12, %vm1710_vm11  ;;  %1971 = vmatpush.bf16.msra.mxu3 %v2208_v49 }
 0x93d   : > { %v1705_v12 = vmul.f32 %v2348_v43, %v1704_v39  ;;  %v1702_v36 = vsel %vm1701_vm9, %v2346_v56, %v1698_v1 }
 0x93e   : > { %2159 = vmatmul.msk.bf16.gmra.mxu1 %vm487_vm0, %v1764_v8  ;;  %v1737_v59 = vmul.f32 %v1702_v36, %v3024_v17  ;;  %v1643_v17 = vmul.f32 %v1633_v23, %v2502_v24 }
 0x93f   : > { %v1706_v52 = vmul.f32 0.5, %v1705_v12 }
 0x940   : > { %v1748_v14 = vmul.f32 %v3062_v62, %v1737_v59  ;;  %v1651_v31 = vadd.f32 1e-05, %v1643_v17  ;;  %1972 = vmatpush.bf16.msra.mxu3 %v2207_v50 }
 0x941   : > { %v1707_v22 = vsub.f32 1.5, %v1706_v52 }
 0x942   : > { %v1759_v6 = vadd.f32 %v3069_v35, %v1748_v14  ;;  %2349 = vrsqrt.f32 %v1651_v31  ;;  %vm1719_vm14 = vweird.f32 %v1651_v31 }
 0x943   : > { %v1708_v55 = vmul.f32 %v2348_v43, %v1707_v22 }
 0x944   : > { %1973 = vmatpush.bf16.msra.mxu3 %v2206_v53 }
 0x945   : > { %v1712_v41 = vsel %vm1711_vm10, %v2348_v43, %v1708_v55  ;;  %v2204_v43 = vld [vmem:[%s3188_s12] sm:$0xff] }
 0x946   : > { %v1738_v13 = vmul.f32 %v1712_v41, %v3031_v26 }
 0x948   : > { %v1749_v27 = vmul.f32 %v3062_v62, %v1738_v13  ;;  %v2350_v29 = vpop.eup %2349 }
 0x949   : > { %v1714_v60 = vmul.f32 %v2350_v29, %v1651_v31  ;;  %vm1720_vm13 = vweird.f32 %v2350_v29 }
 0x94a   : > { %v1760_v58 = vadd.f32 %v3069_v35, %v1749_v27  ;;  %vm1721_vm15 = vmor %vm1719_vm14, %vm1720_vm13 }
 0x94b   : > { %v1715_v34 = vmul.f32 %v2350_v29, %v1714_v60 }
 0x94c   : > { %v1765_v54 = vpack.c.bf16 %v1760_v58, %v1759_v6 }
 0x94d   : > { %v1716_v11 = vmul.f32 0.5, %v1715_v34 }
 0x94e   : > { %2160 = vmatmul.msk.bf16.gmra.mxu1 %vm487_vm0, %v1765_v54 }
 0x94f   : > { %v1717_v48 = vsub.f32 1.5, %v1716_v11 }
 0x967   : > { %v1636_v26 = vpop.xlane.xlu2 %1635 }
 0x968   : > { %v1644_v45 = vmul.f32 %v1636_v26, %v2502_v24  ;;  %v1718_v24 = vmul.f32 %v2350_v29, %v1717_v48 }
 0x96a   : > { %v1652_v5 = vadd.f32 1e-05, %v1644_v45  ;;  %v1722_v10 = vsel %vm1721_vm15, %v2350_v29, %v1718_v24 }
 0x96b   : > { %v1739_v51 = vmul.f32 %v1722_v10, %v3038_v63  ;;  %v2205_v63 = vld [vmem:[%s3188_s12 + $0x8] sm:$0xff] }
 0x96c   : > { %2351 = vrsqrt.f32 %v1652_v5  ;;  %vm1729_vm2 = vweird.f32 %v1652_v5  ;;  %1974 = vmatpush.bf16.msra.mxu3 %v2205_v63 }
 0x96d   : > { %v1750_v20 = vmul.f32 %v3062_v62, %v1739_v51 }
 0x96f   : > { %v1761_v61 = vadd.f32 %v3069_v35, %v1750_v20 }
 0x970   : > { %1975 = vmatpush.bf16.msra.mxu3 %v2204_v43 }
 0x972   : > { %v2352_v33 = vpop.eup %2351 }
 0x973   : > { %v1724_v28 = vmul.f32 %v2352_v33, %v1652_v5  ;;  %vm1730_vm1 = vweird.f32 %v2352_v33 }
 0x974   : > { %vm1731_vm3 = vmor %vm1729_vm2, %vm1730_vm1 }
 0x975   : > { %v1725_v4 = vmul.f32 %v2352_v33, %v1724_v28 }
 0x977   : > { %v1726_v37 = vmul.f32 0.5, %v1725_v4 }
 0x979   : > { %v1727_v56 = vsub.f32 1.5, %v1726_v37 }
 0x97b   : > { %v1728_v18 = vmul.f32 %v2352_v33, %v1727_v56 }
 0x97d   : > { %v1732_v9 = vsel %vm1731_vm3, %v2352_v33, %v1728_v18 }
 0x97e   : > { %v1740_v19 = vmul.f32 %v1732_v9, %v3053_v3  ;;  %v3128_v3 = vld [vmem:[%s3187_s11] ss:$0 sm:$0xff] }
 0x980   : > { %v1751_v16 = vmul.f32 %v3062_v62, %v1740_v19 }
 0x982   : > { %v1762_v21 = vadd.f32 %v3069_v35, %v1751_v16 }
 0x984   : > { %v1766_v42 = vpack.c.bf16 %v1762_v21, %v1761_v61 }
 0x986   : > { %2161 = vmatmul.msk.bf16.gmra.mxu1 %vm487_vm0, %v1766_v42  ;;  %vm2025_vm0 = vcmask 257024  }
 0x988   : > { %v1808_v62 = vpop.f32.mrf.mxu1 }
 0x989   : > { %v1809_v0 = vadd.f32 %v3128_v3, %v1808_v62 }
 0x98b   : > { %v1836_v32 = vmul.f32 0.044715, %v1809_v0  ;;  %v1828_v6 = vmul.f32 0.5, %v1809_v0 }
 0x98d   : > { %v1844_v1 = vmul.f32 %v1836_v32, %v1809_v0 }
 0x98f   : > { %v1852_v35 = vmul.f32 %v1844_v1, %v1809_v0 }
 0x990   : > { %v1810_v39 = vpop.f32.mrf.mxu1 }
 0x991   : > { %v1860_v8 = vadd.f32 %v1852_v35, %v1809_v0  ;;  %v1811_v12 = vadd.f32 %v3128_v3, %v1810_v39 }
 0x993   : > { %v1837_v36 = vmul.f32 0.044715, %v1811_v12  ;;  %v1868_v52 = vmul.f32 0.7978846, %v1860_v8  ;;  %v1829_v58 = vmul.f32 0.5, %v1811_v12 }
 0x995   : > { %v1845_v22 = vmul.f32 %v1837_v36, %v1811_v12  ;;  %2353 = vtanh.f32 %v1868_v52 }
 0x997   : > { %v1853_v59 = vmul.f32 %v1845_v22, %v1811_v12 }
 0x999   : > { %v1861_v55 = vadd.f32 %v1853_v59, %v1811_v12 }
 0x99b   : > { %v1869_v41 = vmul.f32 0.7978846, %v1861_v55  ;;  %v2354_v13 = vpop.eup %2353 }
 0x99c   : > { %v1884_v14 = vadd.f32 1.0, %v2354_v13 }
 0x99d   : > { %2355 = vtanh.f32 %v1869_v41 }
 0x99e   : > { %v1892_v23 = vmul.f32 %v1884_v14, %v1828_v6 }
 0x9a3   : > { %v2356_v27 = vpop.eup %2355 }
 0x9a4   : > { %v1885_v54 = vadd.f32 1.0, %v2356_v27 }
 0x9a6   : > { %v1893_v17 = vmul.f32 %v1885_v54, %v1829_v58 }
 0x9a8   : > { %v1900_v31 = vpack.c.bf16 %v1893_v17, %v1892_v23 }
 0x9aa   : > { %1976 = vmatmul.bf16.vlgmr.msra.gmra.mxu3 %v1900_v31 }
 0x9bb   : > { %v1813_v29 = vpop.f32.mrf.mxu1 }
 0x9bc   : > { %v1814_v60 = vadd.f32 %v3128_v3, %v1813_v29 }
 0x9be   : > { %v1838_v34 = vmul.f32 0.044715, %v1814_v60  ;;  %v1830_v16 = vmul.f32 0.5, %v1814_v60 }
 0x9c0   : > { %v1846_v26 = vmul.f32 %v1838_v34, %v1814_v60 }
 0x9c2   : > { %v1854_v45 = vmul.f32 %v1846_v26, %v1814_v60 }
 0x9c3   : > { %v1815_v5 = vpop.f32.mrf.mxu1 }
 0x9c4   : > { %v1816_v40 = vadd.f32 %v3128_v3, %v1815_v5  ;;  %v1862_v11 = vadd.f32 %v1854_v45, %v1814_v60 }
 0x9c6   : > { %v1839_v38 = vmul.f32 0.044715, %v1816_v40  ;;  %v1870_v33 = vmul.f32 0.7978846, %v1862_v11  ;;  %v1831_v63 = vmul.f32 0.5, %v1816_v40 }
 0x9c8   : > { %v1847_v48 = vmul.f32 %v1839_v38, %v1816_v40  ;;  %2357 = vtanh.f32 %v1870_v33 }
 0x9ca   : > { %v1855_v47 = vmul.f32 %v1847_v48, %v1816_v40 }
 0x9cb   : > { %v1818_v24 = vpop.f32.mrf.mxu1 }
 0x9cc   : > { %v1819_v28 = vadd.f32 %v3128_v3, %v1818_v24  ;;  %v1863_v4 = vadd.f32 %v1855_v47, %v1816_v40 }
 0x9ce   : > { %v1840_v49 = vmul.f32 0.044715, %v1819_v28  ;;  %v1871_v10 = vmul.f32 0.7978846, %v1863_v4  ;;  %v2358_v56 = vpop.eup %2357  ;;  %v1832_v36 = vmul.f32 0.5, %v1819_v28 }
 0x9cf   : > { %v1886_v9 = vadd.f32 1.0, %v2358_v56 }
 0x9d0   : > { %2359 = vtanh.f32 %v1871_v10  ;;  %v1848_v37 = vmul.f32 %v1840_v49, %v1819_v28 }
 0x9d1   : > { %v1894_v43 = vmul.f32 %v1886_v9, %v1830_v16 }
 0x9d2   : > { %v1856_v51 = vmul.f32 %v1848_v37, %v1819_v28 }
 0x9d3   : > { %v1820_v50 = vpop.f32.mrf.mxu1 }
 0x9d4   : > { %v1821_v18 = vadd.f32 %v3128_v3, %v1820_v50  ;;  %v1864_v53 = vadd.f32 %v1856_v51, %v1819_v28 }
 0x9d6   : > { %v2360_v19 = vpop.eup %2359  ;;  %v1841_v20 = vmul.f32 0.044715, %v1821_v18  ;;  %v1872_v42 = vmul.f32 0.7978846, %v1864_v53  ;;  %v1833_v52 = vmul.f32 0.5, %v1821_v18 }
 0x9d7   : > { %v1887_v61 = vadd.f32 1.0, %v2360_v19 }
 0x9d8   : > { %v1849_v21 = vmul.f32 %v1841_v20, %v1821_v18  ;;  %2361 = vtanh.f32 %v1872_v42 }
 0x9d9   : > { %v1895_v62 = vmul.f32 %v1887_v61, %v1831_v63 }
 0x9da   : > { %v1857_v0 = vmul.f32 %v1849_v21, %v1821_v18 }
 0x9db   : > { %v1901_v32 = vpack.c.bf16 %v1895_v62, %v1894_v43 }
 0x9dc   : > { %v1865_v1 = vadd.f32 %v1857_v0, %v1821_v18 }
 0x9dd   : > { %1981 = vmatmul.bf16.gmra.mxu3 %v1901_v32 }
 0x9de   : > { %v1873_v35 = vmul.f32 0.7978846, %v1865_v1  ;;  %v2362_v39 = vpop.eup %2361 }
 0x9df   : > { %v1888_v8 = vadd.f32 1.0, %v2362_v39 }
 0x9e0   : > { %2363 = vtanh.f32 %v1873_v35 }
 0x9e1   : > { %v1896_v59 = vmul.f32 %v1888_v8, %v1832_v36 }
 0x9e6   : > { %v2364_v12 = vpop.eup %2363 }
 0x9e7   : > { %v1889_v22 = vadd.f32 1.0, %v2364_v12 }
 0x9e9   : > { %v1897_v55 = vmul.f32 %v1889_v22, %v1833_v52 }
 0x9eb   : > { %v1902_v41 = vpack.c.bf16 %v1897_v55, %v1896_v59 }
 0x9ed   : > { %1986 = vmatmul.bf16.gmra.mxu3 %v1902_v41 }
 0xa03   : > { %v1823_v13 = vpop.f32.mrf.mxu1 }
 0xa04   : > { %v1824_v14 = vadd.f32 %v3128_v3, %v1823_v13 }
 0xa06   : > { %v1842_v27 = vmul.f32 0.044715, %v1824_v14  ;;  %v1834_v38 = vmul.f32 0.5, %v1824_v14 }
 0xa08   : > { %v1850_v6 = vmul.f32 %v1842_v27, %v1824_v14 }
 0xa0a   : > { %v1858_v58 = vmul.f32 %v1850_v6, %v1824_v14 }
 0xa0b   : > { %v1825_v54 = vpop.f32.mrf.mxu1 }
 0xa0c   : > { %v1826_v23 = vadd.f32 %v3128_v3, %v1825_v54  ;;  %v1866_v17 = vadd.f32 %v1858_v58, %v1824_v14  ;;  %v2254_v3 = vld [vmem:[%s3189_s13] ss:$0 sm:$0xff] }
 0xa0e   : > { %v1843_v31 = vmul.f32 0.044715, %v1826_v23  ;;  %v1874_v60 = vmul.f32 0.7978846, %v1866_v17  ;;  %v1835_v48 = vmul.f32 0.5, %v1826_v23 }
 0xa10   : > { %v1851_v29 = vmul.f32 %v1843_v31, %v1826_v23  ;;  %2365 = vtanh.f32 %v1874_v60 }
 0xa12   : > { %v1859_v34 = vmul.f32 %v1851_v29, %v1826_v23 }
 0xa14   : > { %v1867_v26 = vadd.f32 %v1859_v34, %v1826_v23 }
 0xa16   : > { %v1875_v45 = vmul.f32 0.7978846, %v1867_v26  ;;  %v2366_v5 = vpop.eup %2365 }
 0xa17   : > { %v1890_v40 = vadd.f32 1.0, %v2366_v5 }
 0xa18   : > { %2367 = vtanh.f32 %v1875_v45 }
 0xa19   : > { %v1898_v47 = vmul.f32 %v1890_v40, %v1834_v38 }
 0xa1e   : > { %v2368_v11 = vpop.eup %2367 }
 0xa1f   : > { %v1891_v33 = vadd.f32 1.0, %v2368_v11 }
 0xa21   : > { %v1899_v24 = vmul.f32 %v1891_v33, %v1835_v48 }
 0xa23   : > { %v1903_v28 = vpack.c.bf16 %v1899_v24, %v1898_v47 }
 0xa25   : > { %1991 = vmatmul.bf16.gmra.mxu3 %v1903_v28 }
 0xa2d   : > { %v1977_v4 = vpop.f32.mrf.mxu3 }
 0xa2e   : > { %v1997_v49 = vadd.f32 %v1977_v4, %v2951_v15 }
 0xa30   : > { %v2009_v10 = vadd.f32 %v2254_v3, %v1997_v49 }
 0xa32   : > { %v2017_v37 = vpack.c.bf16 %v2009_v10, %v2009_v10 }
 0xa34   : > { %2026 = vst.msk [vmem:[%s3148_s24] sm:$0xf] %vm2025_vm0, %v2017_v37 }
 0xa35   : > { %v1979_v56 = vpop.f32.mrf.mxu3 }
 0xa36   : > { %v1998_v51 = vadd.f32 %v1979_v56, %v2956_v44 }
 0xa38   : > { %v2010_v50 = vadd.f32 %v2254_v3, %v1998_v51 }
 0xa3a   : > { %v2018_v15 = vpack.c.bf16 %v2010_v50, %v2010_v50 }
 0xa3c   : > { %2027 = vst.msk [vmem:[%s3148_s24 + $0x4] sm:$0xf] %vm2025_vm0, %v2018_v15 }
 0xa60   : > { %v1982_v18 = vpop.f32.mrf.mxu3 }
 0xa61   : > { %v1999_v53 = vadd.f32 %v1982_v18, %v2961_v7 }
 0xa63   : > { %v2011_v9 = vadd.f32 %v2254_v3, %v1999_v53 }
 0xa65   : > { %v2019_v19 = vpack.c.bf16 %v2011_v9, %v2011_v9 }
 0xa67   : > { %2028 = vst.msk [vmem:[%s3148_s24 + $0x8] sm:$0xf] %vm2025_vm0, %v2019_v19 }
 0xa68   : > { %v1984_v20 = vpop.f32.mrf.mxu3 }
 0xa69   : > { %v2000_v16 = vadd.f32 %v1984_v20, %v2966_v46 }
 0xa6b   : > { %v2012_v63 = vadd.f32 %v2254_v3, %v2000_v16 }
 0xa6d   : > { %v2020_v61 = vpack.c.bf16 %v2012_v63, %v2012_v63 }
 0xa6f   : > { %2029 = vst.msk [vmem:[%s3148_s24 + $0xc] sm:$0xf] %vm2025_vm0, %v2020_v61 }
 0xa70   : > { %v1987_v44 = vpop.f32.mrf.mxu3 }
 0xa71   : > { %v2001_v21 = vadd.f32 %v1987_v44, %v2972_v30 }
 0xa73   : > { %v2013_v42 = vadd.f32 %v2254_v3, %v2001_v21 }
 0xa75   : > { %v2021_v43 = vpack.c.bf16 %v2013_v42, %v2013_v42 }
 0xa77   : > { %2030 = vst.msk [vmem:[%s3148_s24 + $0x10] sm:$0xf] %vm2025_vm0, %v2021_v43 }
 0xa78   : > { %v1989_v7 = vpop.f32.mrf.mxu3 }
 0xa79   : > { %v2002_v62 = vadd.f32 %v1989_v7, %v2978_v25 }
 0xa7b   : > { %v2014_v0 = vadd.f32 %v2254_v3, %v2002_v62 }
 0xa7d   : > { %v2022_v32 = vpack.c.bf16 %v2014_v0, %v2014_v0 }
 0xa7f   : > { %2031 = vst.msk [vmem:[%s3148_s24 + $0x14] sm:$0xf] %vm2025_vm0, %v2022_v32 }
 0xaa8   : > { %v1992_v46 = vpop.f32.mrf.mxu3 }
 0xaa9   : > { %v2003_v1 = vadd.f32 %v1992_v46, %v2984_v57 }
 0xaab   : > { %v2015_v35 = vadd.f32 %v2254_v3, %v2003_v1 }
 0xaad   : > { %v2023_v39 = vpack.c.bf16 %v2015_v35, %v2015_v35 }
 0xaaf   : > { %2032 = vst.msk [vmem:[%s3148_s24 + $0x18] sm:$0xf] %vm2025_vm0, %v2023_v39 }
 0xab0   : > { %v1994_v30 = vpop.f32.mrf.mxu3 }
 0xab1   : > { %v2004_v8 = vadd.f32 %v1994_v30, %v2998_v2 }
 0xab3   : > { %v2016_v12 = vadd.f32 %v2254_v3, %v2004_v8 }
 0xab5   : > { %v2024_v36 = vpack.c.bf16 %v2016_v12, %v2016_v12 }
 0xab7   : > { %2033 = vst.msk [vmem:[%s3148_s24 + $0x1c] sm:$0xf] %vm2025_vm0, %v2024_v36 }
 0xab8 PF: > { %s24_s29 = sadd.s32 1, %s2375_s29  }
 0xab9   : > { %p21_p4 = scmp.ge.s32.totalorder %s24_s29, 4  }
 0xabb   :  { %23 = sbr.rel (!%p21_p4) target bundleno = 1 (0x1), region = 107 }

// kernel: swint_forward.10
= control target key start
LH: loop header
LB: loop body
LE: loop exit
PB: predicated region body
PF: predicated region fallthrough
CT: control target
= control target key end

     0   :  { %s547_s18 = smov 0   ;;  %s604_s0 = inlined_call_operand.vmem [shape: bf16[32,128], index: 0, kind: input, shape index: {}]   ;;  %s605_s1 = inlined_call_operand.vmem [shape: f32[1,128], index: 1, kind: input, shape index: {}]   ;;  %s606_s2 = inlined_call_operand.vmem [shape: f32[1,128], index: 2, kind: input, shape index: {}]   ;;  %s607_s3 = inlined_call_operand.vmem [shape: bf16[128,64], index: 3, kind: input, shape index: {}]   ;;  %s608_s4 = inlined_call_operand.vmem [shape: f32[1,64], index: 4, kind: input, shape index: {}]   ;;  %s609_s5 = inlined_call_operand.vmem [shape: bf16[32,64], index: 5, kind: output, shape index: {}]  }
   0x1 LB: > { %s435_s19 = sadd.s32 4294967295, %s514_s18   ;;  %p439_p0 = scmp.ge.s32.totalorder %s514_s18, 1  ;;  %s514_s18 = sphi %s547_s18, %s15_s18  }
   0x2   : > { %p188_p1 = scmp.lt.s32.totalorder %s514_s18, 3 }
   0x4   : > { %p189_p2 = pnand %p439_p0, %p188_p1 }
   0x5   : > { %s440_s20 = sshll.u32 (!%p189_p2), %s435_s19, 1 }
   0x6   : > { %192 = sbr.rel (%p189_p2) target bundleno = 432 (0x1b0), region = 40  ;;  %p217_p3 = scmp.lt.s32.totalorder (!%p189_p2), %s440_s20, 3 }
   0xb   : > { %s611_s20 = smov (!%p217_p3, %s440_s20), 3  ;;  %v516_v3 = vmov 128.0   ;;  %v485_v18 = vld [vmem:[%s607_s3 + $0x38] sm:$0xff]  ;;  %v484_v19 = vld [vmem:[%s607_s3 + $0x30] sm:$0xff]  ;;  %v483_v20 = vld [vmem:[%s607_s3 + $0x28] sm:$0xff]  ;;  %vm376_vm7 = vcmask 519168  }
   0xc   : > { %s441_s21 = sshll.u32 %s611_s20, 2  ;;  %502 = vrcp.f32 %v516_v3  ;;  %360 = vmatpush.bf16.msra.mxu0 %v485_v18  ;;  %v482_v21 = vld [vmem:[%s607_s3 + $0x20] sm:$0xff]  ;;  %v481_v22 = vld [vmem:[%s607_s3 + $0x18] sm:$0xff]  ;;  %v480_v23 = vld [vmem:[%s607_s3 + $0x10] sm:$0xff] }
   0xd   : > { %s220_s24 = scalar_lea.vmem %s604_s0, %s441_s21  ;;  %v479_v24 = vld [vmem:[%s607_s3 + $0x8] sm:$0xff]  ;;  %v478_v26 = vld [vmem:[%s607_s3] sm:$0xff]  ;;  %s226_s27 = scalar_lea.vmem %s609_s5, %s441_s21 }
   0xe   : > { %v487_v0 = vld [vmem:[%s220_s24] sm:$0xff]  }
   0xf   : > { %v488_v1 = vunpack.c.l.bf16 %v487_v0  ;;  %v489_v2 = vunpack.c.h.bf16 %v487_v0  ;;  %v499_v45 = vld [vmem:[%s605_s1] ss:$0 sm:$0xff] }
  0x10   : > { %361 = vmatpush.bf16.msra.mxu0 %v484_v19  ;;  %v500_v50 = vld [vmem:[%s606_s2] ss:$0 sm:$0xff] }
  0x11   : > { %234 = vadd.xlane.f32.xlu0 %v488_v1  ;;  %v501_v55 = vld [vmem:[%s608_s4] ss:$0 sm:$0xff] }
  0x12   : > { %v503_v4 = vpop.eup %502 }
  0x13   : > { %v239_v5 = vmul.f32 128.0, %v503_v4  ;;  %vm243_vm0 = vweird.f32 %v503_v4 }
  0x14   : > { %362 = vmatpush.bf16.msra.mxu0 %v483_v20 }
  0x15   : > { %v240_v6 = vsub.f32 1.0, %v239_v5 }
  0x17   : > { %v241_v7 = vmul.f32 %v503_v4, %v240_v6 }
  0x18   : > { %363 = vmatpush.bf16.msra.mxu0 %v482_v21 }
  0x19   : > { %236 = vadd.xlane.f32.xlu0 %v489_v2  ;;  %v242_v8 = vadd.f32 %v503_v4, %v241_v7 }
  0x1b   : > { %v244_v9 = vsel %vm243_vm0, %v503_v4, %v242_v8 }
  0x1c   : > { %364 = vmatpush.bf16.msra.mxu0 %v481_v22 }
  0x20   : > { %365 = vmatpush.bf16.msra.mxu0 %v480_v23 }
  0x24   : > { %366 = vmatpush.bf16.msra.mxu0 %v479_v24 }
  0x28   : > { %367 = vmatpush.bf16.msra.mxu0 %v478_v26 }
  0x84   : > { %v235_v10 = vpop.xlane.xlu0 %234 }
  0x85   : > { %v245_v11 = vmul.f32 %v244_v9, %v235_v10 }
  0x87   : > { %v247_v12 = vsub.f32 %v488_v1, %v245_v11 }
  0x89   : > { %v249_v13 = vmul.f32 %v247_v12, %v247_v12 }
  0x8b   : > { %251 = vadd.xlane.f32.xlu1 %v249_v13 }
  0x8c   : > { %v237_v14 = vpop.xlane.xlu0 %236 }
  0x8d   : > { %v246_v15 = vmul.f32 %v244_v9, %v237_v14 }
  0x8f   : > { %v248_v16 = vsub.f32 %v489_v2, %v246_v15 }
  0x91   : > { %v250_v17 = vmul.f32 %v248_v16, %v248_v16 }
  0x93   : > { %253 = vadd.xlane.f32.xlu1 %v250_v17 }
  0xfe   : > { %v252_v25 = vpop.xlane.xlu1 %251 }
  0xff   : > { %v255_v27 = vmul.f32 %v252_v25, %v244_v9 }
 0x101   : > { %v257_v28 = vadd.f32 1e-05, %v255_v27 }
 0x103   : > { %504 = vrsqrt.f32 %v257_v28  ;;  %vm265_vm2 = vweird.f32 %v257_v28 }
 0x106   : > { %v254_v29 = vpop.xlane.xlu1 %253 }
 0x107   : > { %v256_v30 = vmul.f32 %v254_v29, %v244_v9 }
 0x109   : > { %v505_v31 = vpop.eup %504  ;;  %v258_v32 = vadd.f32 1e-05, %v256_v30 }
 0x10a   : > { %v260_v33 = vmul.f32 %v505_v31, %v257_v28  ;;  %vm266_vm1 = vweird.f32 %v505_v31 }
 0x10b   : > { %506 = vrsqrt.f32 %v258_v32  ;;  %vm267_vm3 = vmor %vm265_vm2, %vm266_vm1  ;;  %vm275_vm5 = vweird.f32 %v258_v32 }
 0x10c   : > { %v261_v34 = vmul.f32 %v505_v31, %v260_v33 }
 0x10e   : > { %v262_v35 = vmul.f32 0.5, %v261_v34 }
 0x110   : > { %v263_v36 = vsub.f32 1.5, %v262_v35 }
 0x111   : > { %v507_v37 = vpop.eup %506 }
 0x112   : > { %v264_v38 = vmul.f32 %v505_v31, %v263_v36  ;;  %v270_v39 = vmul.f32 %v507_v37, %v258_v32  ;;  %vm276_vm4 = vweird.f32 %v507_v37 }
 0x113   : > { %vm277_vm6 = vmor %vm275_vm5, %vm276_vm4 }
 0x114   : > { %v271_v40 = vmul.f32 %v507_v37, %v270_v39  ;;  %v268_v42 = vsel %vm267_vm3, %v505_v31, %v264_v38 }
 0x115   : > { %v279_v44 = vmul.f32 %v268_v42, %v247_v12 }
 0x116   : > { %v272_v41 = vmul.f32 0.5, %v271_v40 }
 0x117   : > { %v284_v49 = vmul.f32 %v499_v45, %v279_v44 }
 0x118   : > { %v273_v43 = vsub.f32 1.5, %v272_v41 }
 0x119   : > { %v289_v52 = vadd.f32 %v500_v50, %v284_v49 }
 0x11a   : > { %v274_v46 = vmul.f32 %v507_v37, %v273_v43 }
 0x11c   : > { %v278_v47 = vsel %vm277_vm6, %v507_v37, %v274_v46 }
 0x11d   : > { %v280_v48 = vmul.f32 %v278_v47, %v248_v16 }
 0x11f   : > { %v285_v51 = vmul.f32 %v499_v45, %v280_v48 }
 0x121   : > { %v290_v53 = vadd.f32 %v500_v50, %v285_v51 }
 0x123   : > { %v291_v54 = vpack.c.bf16 %v290_v53, %v289_v52 }
 0x125   : > { %368 = vmatmul.bf16.vlgmr.msra.gmra.mxu0 %v291_v54 }
 0x1a2   : > { %v369_v56 = vpop.f32.mrf.mxu0 }
 0x1a3   : > { %v370_v57 = vadd.f32 %v501_v55, %v369_v56 }
 0x1a5   : > { %v374_v58 = vpack.c.bf16 %v370_v57, %v370_v57 }
 0x1a7   : > { %377 = vst.msk [vmem:[%s226_s27] sm:$0xf] %vm376_vm7, %v374_v58 }
 0x1aa   : > { %v371_v59 = vpop.f32.mrf.mxu0 }
 0x1ab   : > { %v372_v60 = vadd.f32 %v501_v55, %v371_v59 }
 0x1ad   : > { %v375_v61 = vpack.c.bf16 %v372_v60, %v372_v60 }
 0x1af   : > { %378 = vst.msk [vmem:[%s226_s27 + $0x4] sm:$0xf] %vm376_vm7, %v375_v61 }
 0x1b0 PF: > { %s15_s18 = sadd.s32 1, %s514_s18  }
 0x1b1   : > { %p12_p4 = scmp.ge.s32.totalorder %s15_s18, 4  }
 0x1b3   :  { %14 = sbr.rel (!%p12_p4) target bundleno = 1 (0x1), region = 70 }

// kernel: swint_forward.13
= control target key start
LH: loop header
LB: loop body
LE: loop exit
PB: predicated region body
PF: predicated region fallthrough
CT: control target
= control target key end

     0   :  { %vm32_vm0 = vcmask 523264   ;;  %s424_s0 = inlined_call_operand.vmem [shape: bf16[2,16,64], index: 0, kind: input, shape index: {}]   ;;  %s425_s1 = inlined_call_operand.vmem [shape: f32[1,64], index: 1, kind: input, shape index: {}]   ;;  %s426_s2 = inlined_call_operand.vmem [shape: f32[1,64], index: 2, kind: input, shape index: {}]   ;;  %s427_s3 = inlined_call_operand.vmem [shape: bf16[64,10], index: 3, kind: input, shape index: {}]   ;;  %s428_s4 = inlined_call_operand.vmem [shape: f32[1,10], index: 4, kind: input, shape index: {}]   ;;  %s429_s5 = inlined_call_operand.hbm [shape: f32[2,10], index: 5, kind: output, shape index: {}]  }
   0x1   :  { %v277_v0 = vld [vmem:[%s424_s0 + $0x8] sm:$0xff]   ;;  %v270_v1 = vld [vmem:[%s424_s0] sm:$0xff]  }
   0x2   :  { %v275_v2 = vunpack.c.l.bf16 %v277_v0  ;;  %v271_v3 = vunpack.c.l.bf16 %v270_v1 }
   0x3   :  { %10 = vsyncpa [#allocation3], 0  ;;  %v276_v6 = vunpack.c.h.bf16 %v277_v0  ;;  %v272_v7 = vunpack.c.h.bf16 %v270_v1  ;;  %v322_v10 = vmov 64.0   ;;  %v268_v43 = vld [vmem:[%s427_s3 + $0x18] sm:$0xff]  ;;  %v267_v48 = vld [vmem:[%s427_s3 + $0x10] sm:$0xff]  ;;  %vm187_vm15 = vcmask 1041409  }
   0x4   :  { %v39_v4 = vsel %vm32_vm0, %v275_v2, 0.0  ;;  %v33_v5 = vsel %vm32_vm0, %v271_v3, 0.0  ;;  %284 = vrcp.f32 %v322_v10  ;;  %221 = vmatpush.bf16.msra.mxu0 %v268_v43  ;;  %v266_v55 = vld [vmem:[%s427_s3 + $0x8] sm:$0xff]  ;;  %v265_v60 = vld [vmem:[%s427_s3] sm:$0xff]  ;;  %s324_s7 = smov [#allocation2]   ;;  %s239_s11 = sshll.u32 %s429_s5, 4  ;;  %s240_s11 = int_to_ptr.hbm [resolvable:$true] %s239_s11 }
   0x5   :  { %40 = vadd.xlane.f32.xlu1 %v39_v4  ;;  %34 = vadd.xlane.f32.xlu0 %v33_v5  ;;  %v42_v8 = vsel %vm32_vm0, %v276_v6, 0.0  ;;  %v36_v9 = vsel %vm32_vm0, %v272_v7, 0.0  ;;  %s237_s8 = sshll.u32 %s324_s7, 4  ;;  %s238_s8 = int_to_ptr.vmem [resolvable:$true] %s237_s8 }
   0x8   :  { %222 = vmatpush.bf16.msra.mxu0 %v267_v48 }
   0xa   :  { %v285_v11 = vpop.eup %284 }
   0xb   :  { %v46_v12 = vmul.f32 64.0, %v285_v11  ;;  %vm50_vm1 = vweird.f32 %v285_v11 }
   0xc   :  { %223 = vmatpush.bf16.msra.mxu0 %v266_v55 }
   0xd   :  { %43 = vadd.xlane.f32.xlu1 %v42_v8  ;;  %37 = vadd.xlane.f32.xlu0 %v36_v9  ;;  %v47_v13 = vsub.f32 1.0, %v46_v12  ;;  %v281_v12 = vld [vmem:[%s425_s1] ss:$0 sm:$0xff] }
   0xf   :  { %v48_v14 = vmul.f32 %v285_v11, %v47_v13 }
  0x10   :  { %224 = vmatpush.bf16.msra.mxu0 %v265_v60 }
  0x11   :  { %v49_v15 = vadd.f32 %v285_v11, %v48_v14 }
  0x13   :  { %v51_v16 = vsel %vm50_vm1, %v285_v11, %v49_v15  ;;  %v323_v11 = vmov 16.0   ;;  %vm230_vm1 = vcmask 74752  }
  0x78   :  { %v41_v17 = vpop.xlane.xlu1 %40  ;;  %v35_v18 = vpop.xlane.xlu0 %34 }
  0x79   :  { %v54_v19 = vmul.f32 %v51_v16, %v41_v17  ;;  %v52_v20 = vmul.f32 %v51_v16, %v35_v18 }
  0x7b   :  { %v365_v21 = vsub.f32 %v275_v2, %v54_v19  ;;  %v367_v22 = vsub.f32 %v271_v3, %v52_v20  ;;  %v282_v19 = vld [vmem:[%s426_s2] ss:$0 sm:$0xff] }
  0x7d   :  { %v62_v23 = vmul.f32 %v365_v21, %v365_v21  ;;  %v60_v24 = vmul.f32 %v367_v22, %v367_v22 }
  0x7f   :  { %v70_v25 = vsel %vm32_vm0, %v62_v23, 0.0  ;;  %v64_v26 = vsel %vm32_vm0, %v60_v24, 0.0 }
  0x80   :  { %v44_v27 = vpop.xlane.xlu1 %43  ;;  %71 = vadd.xlane.f32.xlu0 %v70_v25  ;;  %65 = vadd.xlane.f32.xlu2 %v64_v26  ;;  %v38_v28 = vpop.xlane.xlu0 %37 }
  0x81   :  { %v55_v29 = vmul.f32 %v51_v16, %v44_v27  ;;  %v53_v30 = vmul.f32 %v51_v16, %v38_v28 }
  0x83   :  { %v375_v31 = vsub.f32 %v276_v6, %v55_v29  ;;  %v377_v32 = vsub.f32 %v272_v7, %v53_v30 }
  0x85   :  { %v63_v33 = vmul.f32 %v375_v31, %v375_v31  ;;  %v61_v34 = vmul.f32 %v377_v32, %v377_v32 }
  0x87   :  { %v73_v35 = vsel %vm32_vm0, %v63_v33, 0.0  ;;  %v67_v36 = vsel %vm32_vm0, %v61_v34, 0.0 }
  0x88   :  { %74 = vadd.xlane.f32.xlu1 %v73_v35  ;;  %68 = vadd.xlane.f32.xlu2 %v67_v36 }
  0xf3   :  { %v66_v37 = vpop.xlane.xlu2 %65  ;;  %v72_v38 = vpop.xlane.xlu0 %71 }
  0xf4   :  { %v76_v39 = vmul.f32 %v66_v37, %v51_v16  ;;  %v78_v40 = vmul.f32 %v72_v38, %v51_v16 }
  0xf6   :  { %v80_v41 = vadd.f32 1e-05, %v76_v39  ;;  %v82_v42 = vadd.f32 1e-05, %v78_v40 }
  0xf8   :  { %286 = vrsqrt.f32 %v80_v41  ;;  %vm90_vm4 = vweird.f32 %v80_v41  ;;  %vm110_vm6 = vweird.f32 %v82_v42 }
  0xf9   :  { %288 = vrsqrt.f32 %v82_v42 }
  0xfb   :  { %v75_v44 = vpop.xlane.xlu1 %74  ;;  %v69_v45 = vpop.xlane.xlu2 %68 }
  0xfc   :  { %v79_v46 = vmul.f32 %v75_v44, %v51_v16  ;;  %v77_v47 = vmul.f32 %v69_v45, %v51_v16 }
  0xfe   :  { %v287_v49 = vpop.eup %286  ;;  %v83_v50 = vadd.f32 1e-05, %v79_v46  ;;  %v81_v51 = vadd.f32 1e-05, %v77_v47 }
  0xff   :  { %v289_v52 = vpop.eup %288  ;;  %v85_v53 = vmul.f32 %v287_v49, %v80_v41  ;;  %vm91_vm2 = vweird.f32 %v287_v49 }
 0x100   :  { %v105_v54 = vmul.f32 %v289_v52, %v82_v42  ;;  %290 = vrsqrt.f32 %v83_v50  ;;  %vm111_vm3 = vweird.f32 %v289_v52  ;;  %vm397_vm5 = vmor %vm90_vm4, %vm91_vm2  ;;  %vm120_vm10 = vweird.f32 %v83_v50 }
 0x101   :  { %v86_v56 = vmul.f32 %v287_v49, %v85_v53  ;;  %292 = vrsqrt.f32 %v81_v51  ;;  %vm112_vm7 = vmor %vm110_vm6, %vm111_vm3  ;;  %vm100_vm12 = vweird.f32 %v81_v51 }
 0x102   :  { %v106_v57 = vmul.f32 %v289_v52, %v105_v54  ;;  %294 = vrcp.f32 %v323_v11 }
 0x103   :  { %v87_v58 = vmul.f32 0.5, %v86_v56 }
 0x104   :  { %v107_v59 = vmul.f32 0.5, %v106_v57 }
 0x105   :  { %v88_v61 = vsub.f32 1.5, %v87_v58 }
 0x106   :  { %v291_v62 = vpop.eup %290  ;;  %v108_v63 = vsub.f32 1.5, %v107_v59 }
 0x107   :  { %v293_v0 = vpop.eup %292  ;;  %v89_v1 = vmul.f32 %v287_v49, %v88_v61  ;;  %v115_v2 = vmul.f32 %v291_v62, %v83_v50  ;;  %vm121_vm8 = vweird.f32 %v291_v62 }
 0x108   :  { %v109_v4 = vmul.f32 %v289_v52, %v108_v63  ;;  %v95_v5 = vmul.f32 %v293_v0, %v81_v51  ;;  %vm101_vm9 = vweird.f32 %v293_v0  ;;  %vm122_vm11 = vmor %vm120_vm10, %vm121_vm8  ;;  %v295_v24 = vpop.eup %294 }
 0x109   :  { %v116_v6 = vmul.f32 %v291_v62, %v115_v2  ;;  %v93_v7 = vsel %vm397_vm5, %v287_v49, %v89_v1  ;;  %vm102_vm13 = vmor %vm100_vm12, %vm101_vm9  ;;  %v161_v30 = vmul.f32 16.0, %v295_v24  ;;  %vm165_vm14 = vweird.f32 %v295_v24  ;;  %v283_v1 = vld [vmem:[%s428_s4] ss:$0 sm:$0xff] }
 0x10a   :  { %v113_v8 = vsel %vm112_vm7, %v289_v52, %v109_v4  ;;  %v96_v9 = vmul.f32 %v293_v0, %v95_v5  ;;  %v124_v15 = vmul.f32 %v93_v7, %v367_v22 }
 0x10b   :  { %v117_v10 = vmul.f32 0.5, %v116_v6  ;;  %v126_v13 = vmul.f32 %v113_v8, %v365_v21  ;;  %v162_v39 = vsub.f32 1.0, %v161_v30 }
 0x10c   :  { %v97_v14 = vmul.f32 0.5, %v96_v9  ;;  %v131_v25 = vmul.f32 %v281_v12, %v124_v15 }
 0x10d   :  { %v118_v16 = vsub.f32 1.5, %v117_v10  ;;  %v133_v20 = vmul.f32 %v281_v12, %v126_v13  ;;  %v163_v44 = vmul.f32 %v295_v24, %v162_v39 }
 0x10e   :  { %v98_v17 = vsub.f32 1.5, %v97_v14  ;;  %v138_v33 = vadd.f32 %v282_v19, %v131_v25 }
 0x10f   :  { %v119_v18 = vmul.f32 %v291_v62, %v118_v16  ;;  %v140_v28 = vadd.f32 %v282_v19, %v133_v20  ;;  %v164_v49 = vadd.f32 %v295_v24, %v163_v44 }
 0x110   :  { %v99_v23 = vmul.f32 %v293_v0, %v98_v17  ;;  %v142_v40 = vsel %vm32_vm0, %v138_v33, 0.0 }
 0x111   :  { %v123_v21 = vsel %vm122_vm11, %v291_v62, %v119_v18  ;;  %v151_v37 = vsel %vm32_vm0, %v140_v28, 0.0  ;;  %v166_v54 = vsel %vm165_vm14, %v295_v24, %v164_v49 }
 0x112   :  { %v127_v22 = vmul.f32 %v123_v21, %v375_v31  ;;  %v103_v26 = vsel %vm102_vm13, %v293_v0, %v99_v23 }
 0x113   :  { %v125_v27 = vmul.f32 %v103_v26, %v377_v32 }
 0x114   :  { %v134_v29 = vmul.f32 %v281_v12, %v127_v22 }
 0x115   :  { %v132_v34 = vmul.f32 %v281_v12, %v125_v27 }
 0x116   :  { %v141_v35 = vadd.f32 %v282_v19, %v134_v29 }
 0x117   :  { %v139_v36 = vadd.f32 %v282_v19, %v132_v34 }
 0x118   :  { %v152_v38 = vsel %vm32_vm0, %v141_v35, 0.0 }
 0x119   :  { %v153_v41 = vadd.f32 %v152_v38, %v151_v37  ;;  %v143_v31 = vsel %vm32_vm0, %v139_v36, 0.0 }
 0x11a   :  { %v144_v42 = vadd.f32 %v143_v31, %v142_v40 }
 0x11b   :  { %v154_v43 = vrot.slane %v153_v41, 4 }
 0x11c   :  { %v145_v32 = vrot.slane %v144_v42, 4 }
 0x11d   :  { %v155_v45 = vadd.f32 %v154_v43, %v153_v41 }
 0x11e   :  { %v146_v46 = vadd.f32 %v145_v32, %v144_v42 }
 0x11f   :  { %v156_v47 = vrot.slane %v155_v45, 2 }
 0x120   :  { %v147_v48 = vrot.slane %v146_v46, 2 }
 0x121   :  { %v157_v50 = vadd.f32 %v156_v47, %v155_v45 }
 0x122   :  { %v148_v51 = vadd.f32 %v147_v48, %v146_v46 }
 0x123   :  { %v158_v52 = vrot.slane %v157_v50, 1 }
 0x124   :  { %v149_v53 = vrot.slane %v148_v51, 1 }
 0x125   :  { %v159_v55 = vadd.f32 %v158_v52, %v157_v50 }
 0x126   :  { %v150_v56 = vadd.f32 %v149_v53, %v148_v51 }
 0x127   :  { %v168_v57 = vmul.f32 %v166_v54, %v159_v55 }
 0x128   :  { %v167_v58 = vmul.f32 %v166_v54, %v150_v56 }
 0x129   :  { %v170_v59 = vpack.c.bf16 %v168_v57, %v168_v57 }
 0x12a   :  { %v169_v60 = vpack.c.bf16 %v167_v58, %v167_v58 }
 0x12b   :  { %v186_v61 = vunpack.c.l.b16 %v170_v59 }
 0x12c   :  { %v185_v62 = vunpack.c.l.b16 %v169_v60 }
 0x12e   :  { %v188_v63 = vsel %vm187_vm15, %v186_v61, %v185_v62 }
 0x12f   :  { %v189_v0 = vpack.c.b16 %v188_v63, %v188_v63 }
 0x131   :  { %264 = vmatmul.msk.bf16.vlgmr.msra.gmra.mxu0 %vm32_vm0, %v189_v0 }
 0x1ae   :  { %v226_v2 = vpop.f32.mrf.mxu0 }
 0x1af   :  { %v227_v3 = vadd.f32 %v283_v1, %v226_v2 }
 0x1b1   :  { %231 = vst.msk [vmem:[#allocation2] sm:$0x3] %vm230_vm1, %v227_v3 }
 0x1b2   :  { %242 = dma.vmem_to_hbm [thread:$0]  %s238_s8, 32, %s240_s11, [#allocation3]  }
 0x1b6   :  { %v228_v4 = vpop.f32.mrf.mxu0 }
 0x1b7   :  { %320 = dma.done.wait [#allocation3], 32  }
 0x1b8   :  { %321 = vsyncadd [#allocation3], 4294967264 }
 0x1b9   :  { %247 = vsyncpa [#allocation3], 1 }

// kernel: swint_forward.11
= control target key start
LH: loop header
LB: loop body
LE: loop exit
PB: predicated region body
PF: predicated region fallthrough
CT: control target
= control target key end

     0   :  { %s1914_s29 = smov 0   ;;  %s2344_s0 = inlined_call_operand.vmem [shape: bf16[2,16,64], index: 0, kind: input, shape index: {}]   ;;  %s2345_s1 = inlined_call_operand.vmem [shape: f32[1,64], index: 1, kind: input, shape index: {}]   ;;  %s2346_s2 = inlined_call_operand.vmem [shape: f32[1,64], index: 2, kind: input, shape index: {}]   ;;  %s2347_s3 = inlined_call_operand.vmem [shape: bf16[64,192], index: 3, kind: input, shape index: {}]   ;;  %s2348_s4 = inlined_call_operand.vmem [shape: f32[1,192], index: 4, kind: input, shape index: {}]   ;;  %s2349_s5 = inlined_call_operand.vmem [shape: f32[4,16,16], index: 5, kind: input, shape index: {}]   ;;  %s2350_s6 = inlined_call_operand.vmem [shape: bf16[64,64], index: 6, kind: input, shape index: {}]   ;;  %s2351_s7 = inlined_call_operand.vmem [shape: f32[1,64], index: 7, kind: input, shape index: {}]   ;;  %s2352_s8 = inlined_call_operand.vmem [shape: f32[1,64], index: 8, kind: input, shape index: {}]   ;;  %s2353_s9 = inlined_call_operand.vmem [shape: f32[1,64], index: 9, kind: input, shape index: {}]   ;;  %s2354_s10 = inlined_call_operand.vmem [shape: bf16[64,256], index: 10, kind: input, shape index: {}]   ;;  %s2355_s11 = inlined_call_operand.vmem [shape: f32[1,256], index: 11, kind: input, shape index: {}]   ;;  %s2356_s12 = inlined_call_operand.vmem [shape: bf16[256,64], index: 12, kind: input, shape index: {}]   ;;  %s2357_s13 = inlined_call_operand.vmem [shape: f32[1,64], index: 13, kind: input, shape index: {}]   ;;  %s2358_s14 = inlined_call_operand.vmem [shape: bf16[2,16,64], index: 14, kind: output, shape index: {}]  }
   0x1 LB: > { %s1532_s30 = sadd.s32 4294967295, %s1829_s29   ;;  %p1536_p0 = scmp.ge.s32.totalorder %s1829_s29, 1  ;;  %s1829_s29 = sphi %s1914_s29, %s24_s29  }
   0x2   : > { %p412_p1 = scmp.lt.s32.totalorder %s1829_s29, 3 }
   0x4   : > { %p413_p2 = pnand %p1536_p0, %p412_p1 }
   0x5   : > { %p458_p3 = scmp.lt.s32.totalorder (!%p413_p2), %s1532_s30, 1  ;;  %s1833_s19 = smov (!%p413_p2), 112  }
   0x6   : > { %416 = sbr.rel (%p413_p2) target bundleno = 2389 (0x955), region = 76  ;;  %s1834_s20 = smov (!%p413_p2), 64  }
   0x7   : > { %s1835_s16 = smov (!%p413_p2), 96   ;;  %s1836_s17 = smov (!%p413_p2), 16  }
   0xb   : > { %s2370_s30 = smov (!%p458_p3, %s1532_s30), 1  ;;  %vm475_vm0 = vcmask 523264   ;;  %v1831_v5 = vmov 64.0   ;;  %v1567_v22 = vld [vmem:[%s2347_s3 + $0x30] sm:$0xf]  ;;  %vm647_vm8 = vcmask 130048  }
   0xc   : > { %s1709_s15 = sshll.u32 %s2370_s30, 3  ;;  %1773 = vrcp.f32 %v1831_v5  ;;  %v1718_v23 = vld [vmem:[%s2347_s3 + $0x34] sm:$0xf0]  ;;  %v1717_v24 = vld [vmem:[%s2347_s3 + $0x34] sm:$0xf] }
   0xd   : > { %s462_s18 = scalar_lea.vmem %s2344_s0, %s1709_s15  ;;  %v1568_v25 = vor.u32 %v1718_v23, %v1567_v22  ;;  %v1569_v26 = vld [vmem:[%s2347_s3 + $0x38] sm:$0xf0]  ;;  %v1559_v28 = vld [vmem:[%s2347_s3 + $0x20] sm:$0xf]  ;;  %v1716_v29 = vld [vmem:[%s2347_s3 + $0x24] sm:$0xf0] }
   0xe   : > { %v1748_v0 = vld [vmem:[%s462_s18] sm:$0xff]   ;;  %v1572_v27 = vor.u32 %v1717_v24, %v1569_v26  ;;  %v1560_v31 = vor.u32 %v1716_v29, %v1559_v28  ;;  %v1561_v32 = vld [vmem:[%s2347_s3 + $0x28] sm:$0xf0]  ;;  %v1551_v34 = vld [vmem:[%s2347_s3 + $0x10] sm:$0xf]  ;;  %s1832_s18 = smov 48  }
   0xf   : > { %v1930_v1 = vunpack.c.l.bf16 %v1748_v0  ;;  %v1934_v3 = vunpack.c.h.bf16 %v1748_v0  ;;  %599 = vmatpush.bf16.msra.mxu0 %v1568_v25  ;;  %v1715_v30 = vld [vmem:[%s2347_s3 + $0x24] sm:$0xf]  ;;  %v1714_v35 = vld [vmem:[%s2347_s3 + $0x14] sm:$0xf0]  ;;  %v1713_v36 = vld [vmem:[%s2347_s3 + $0x14] sm:$0xf] }
  0x10   : > { %613 = vmatpush.bf16.msra.mxu1 %v1572_v27  ;;  %v1564_v33 = vor.u32 %v1715_v30, %v1561_v32  ;;  %v1552_v37 = vor.u32 %v1714_v35, %v1551_v34  ;;  %v1553_v38 = vld [vmem:[%s2347_s3 + $0x18] sm:$0xf0]  ;;  %v1543_v40 = vld [vmem:[%s2347_s3] sm:$0xf]  ;;  %v1712_v41 = vld [vmem:[%s2347_s3 + $0x4] sm:$0xf0] }
  0x11   : > { %v476_v2 = vsel %vm475_vm0, %v1930_v1, 0.0  ;;  %v479_v4 = vsel %vm475_vm0, %v1934_v3, 0.0  ;;  %v1556_v39 = vor.u32 %v1713_v36, %v1553_v38  ;;  %v1711_v42 = vld [vmem:[%s2347_s3 + $0x4] sm:$0xf]  ;;  %v1544_v44 = vor.u32 %v1712_v41, %v1543_v40  ;;  %v1545_v45 = vld [vmem:[%s2347_s3 + $0x8] sm:$0xf0] }
  0x12   : > { %477 = vadd.xlane.f32.xlu0 %v476_v2  ;;  %v1774_v6 = vpop.eup %1773  ;;  %v1548_v47 = vor.u32 %v1711_v42, %v1545_v45  ;;  %v1767_v2 = vld [vmem:[%s2345_s1] ss:$0 sm:$0xff] }
  0x13   : > { %v483_v7 = vmul.f32 64.0, %v1774_v6  ;;  %vm487_vm1 = vweird.f32 %v1774_v6  ;;  %600 = vmatpush.bf16.msra.mxu0 %v1560_v31  ;;  %v642_v35 = vld [vmem:[%s2349_s5] sm:$0xff] }
  0x14   : > { %614 = vmatpush.bf16.msra.mxu1 %v1564_v33 }
  0x15   : > { %v484_v8 = vsub.f32 1.0, %v483_v7 }
  0x17   : > { %v485_v9 = vmul.f32 %v1774_v6, %v484_v8  ;;  %601 = vmatpush.bf16.msra.mxu0 %v1552_v37  ;;  %v1768_v8 = vld [vmem:[%s2346_s2] ss:$0 sm:$0xff] }
  0x18   : > { %615 = vmatpush.bf16.msra.mxu1 %v1556_v39  ;;  %v643_v39 = vld [vmem:[%s2349_s5 + $0x8] sm:$0xff] }
  0x19   : > { %v486_v10 = vadd.f32 %v1774_v6, %v485_v9 }
  0x1a   : > { %480 = vadd.xlane.f32.xlu0 %v479_v4 }
  0x1b   : > { %v1938_v11 = vsel %vm487_vm1, %v1774_v6, %v486_v10  ;;  %602 = vmatpush.bf16.msra.mxu0 %v1544_v44 }
  0x1c   : > { %616 = vmatpush.bf16.msra.mxu1 %v1548_v47  ;;  %v1583_v47 = vld [vmem:[%s2349_s5 + $0x18] sm:$0xff] }
  0x85   : > { %v478_v12 = vpop.xlane.xlu0 %477 }
  0x86   : > { %v489_v13 = vmul.f32 %v1938_v11, %v478_v12 }
  0x88   : > { %v1942_v14 = vsub.f32 %v1930_v1, %v489_v13 }
  0x8a   : > { %v493_v15 = vmul.f32 %v1942_v14, %v1942_v14 }
  0x8c   : > { %v495_v16 = vsel %vm475_vm0, %v493_v15, 0.0 }
  0x8d   : > { %496 = vadd.xlane.f32.xlu1 %v495_v16  ;;  %v481_v17 = vpop.xlane.xlu0 %480 }
  0x8e   : > { %v490_v18 = vmul.f32 %v1938_v11, %v481_v17 }
  0x90   : > { %v1949_v19 = vsub.f32 %v1934_v3, %v490_v18 }
  0x92   : > { %v494_v20 = vmul.f32 %v1949_v19, %v1949_v19 }
  0x94   : > { %v498_v21 = vsel %vm475_vm0, %v494_v20, 0.0 }
  0x95   : > { %499 = vadd.xlane.f32.xlu1 %v498_v21 }
 0x100   : > { %v497_v43 = vpop.xlane.xlu1 %496 }
 0x101   : > { %v501_v46 = vmul.f32 %v497_v43, %v1938_v11  ;;  %v1582_v43 = vld [vmem:[%s2349_s5 + $0x10] sm:$0xff] }
 0x103   : > { %v503_v48 = vadd.f32 1e-05, %v501_v46 }
 0x105   : > { %1775 = vrsqrt.f32 %v503_v48  ;;  %vm511_vm3 = vweird.f32 %v503_v48 }
 0x108   : > { %v500_v49 = vpop.xlane.xlu1 %499 }
 0x109   : > { %v502_v50 = vmul.f32 %v500_v49, %v1938_v11 }
 0x10b   : > { %v1776_v51 = vpop.eup %1775  ;;  %v504_v52 = vadd.f32 1e-05, %v502_v50 }
 0x10c   : > { %v506_v53 = vmul.f32 %v1776_v51, %v503_v48  ;;  %vm512_vm2 = vweird.f32 %v1776_v51 }
 0x10d   : > { %1777 = vrsqrt.f32 %v504_v52  ;;  %vm513_vm4 = vmor %vm511_vm3, %vm512_vm2  ;;  %vm521_vm6 = vweird.f32 %v504_v52 }
 0x10e   : > { %v507_v54 = vmul.f32 %v1776_v51, %v506_v53 }
 0x110   : > { %v508_v55 = vmul.f32 0.5, %v507_v54 }
 0x112   : > { %v509_v56 = vsub.f32 1.5, %v508_v55 }
 0x113   : > { %v1778_v57 = vpop.eup %1777 }
 0x114   : > { %v510_v58 = vmul.f32 %v1776_v51, %v509_v56  ;;  %v516_v59 = vmul.f32 %v1778_v57, %v504_v52  ;;  %vm522_vm5 = vweird.f32 %v1778_v57 }
 0x115   : > { %vm523_vm7 = vmor %vm521_vm6, %vm522_vm5 }
 0x116   : > { %v517_v60 = vmul.f32 %v1778_v57, %v516_v59  ;;  %v514_v61 = vsel %vm513_vm4, %v1776_v51, %v510_v58 }
 0x117   : > { %v525_v0 = vmul.f32 %v514_v61, %v1942_v14  ;;  %v546_v14 = vld [vmem:[%s2348_s4] sm:$0x3] }
 0x118   : > { %v518_v62 = vmul.f32 0.5, %v517_v60  ;;  %v548_v17 = vperm.slane %v546_v14, 0  ;;  %v549_v18 = vperm.slane %v546_v14, 1 }
 0x119   : > { %v530_v7 = vmul.f32 %v1767_v2, %v525_v0 }
 0x11a   : > { %v519_v63 = vsub.f32 1.5, %v518_v62 }
 0x11b   : > { %v535_v10 = vadd.f32 %v1768_v8, %v530_v7 }
 0x11c   : > { %v520_v4 = vmul.f32 %v1778_v57, %v519_v63 }
 0x11e   : > { %v524_v5 = vsel %vm523_vm7, %v1778_v57, %v520_v4 }
 0x11f   : > { %v526_v6 = vmul.f32 %v524_v5, %v1949_v19 }
 0x121   : > { %v531_v9 = vmul.f32 %v1767_v2, %v526_v6 }
 0x123   : > { %v536_v12 = vadd.f32 %v1768_v8, %v531_v9 }
 0x125   : > { %v537_v13 = vpack.c.bf16 %v536_v12, %v535_v10  ;;  %v1720_v12 = vld [vmem:[%s2350_s6 + $0x8] sm:$0xff] }
 0x127   : > { %1573 = vmatmul.msk.bf16.vlgmr.msra.gmra.mxu0 %vm475_vm0, %v537_v13  ;;  %1574 = vmatmul.msk.bf16.vlgmr.msra.gmra.mxu1 %vm475_vm0, %v537_v13 }
 0x1a4   : > { %v604_v15 = vpop.f32.mrf.mxu0  ;;  %v618_v16 = vpop.f32.mrf.mxu1 }
 0x1a5   : > { %v605_v19 = vadd.f32 %v604_v15, %v548_v17  ;;  %v619_v22 = vadd.f32 %v618_v16, %v549_v18 }
 0x1a7   : > { %v623_v25 = vmul.f32 0.25, %v605_v19 }
 0x1ac   : > { %v606_v20 = vpop.f32.mrf.mxu0  ;;  %v620_v21 = vpop.f32.mrf.mxu1 }
 0x1ad   : > { %v607_v23 = vadd.f32 %v606_v20, %v548_v17  ;;  %v621_v24 = vadd.f32 %v620_v21, %v549_v18 }
 0x1af   : > { %v624_v26 = vmul.f32 0.25, %v607_v23  ;;  %v2017_v27 = vpack.c.bf16 %v607_v23, %v605_v19  ;;  %v2019_v28 = vpack.c.bf16 %v621_v24, %v619_v22  ;;  %v1719_v19 = vld [vmem:[%s2350_s6] sm:$0xff] }
 0x1b0   : > { %751 = vmatpush.bf16.msra.mxu3 %v1719_v19 }
 0x1b1   : > { %v2021_v29 = vpack.c.bf16 %v624_v26, %v623_v25  ;;  %727 = vmatpush.bf16.msrb.mxu1 %v2019_v28  ;;  %766 = vrot.lane.b32.xlu2 %v2017_v27, %s1832_s18  ;;  %s1837_s18 = smov 32  }
 0x1b3   : > { %764 = vrot.lane.b32.xlu0 %v2021_v29, %s1833_s19 }
 0x1b5   : > { %875 = vmatpush.bf16.msra.mxu1 %v1720_v12 }
 0x1b9   : > { %645 = vrot.lane.b32.xlu2 %v2017_v27, %s1834_s20 }
 0x20b   : > { %v767_v30 = vpop.permute.xlu2 %766 }
 0x20c   : > { %v772_v31 = vsel %vm647_vm8, %v767_v30, 0 }
 0x20d   : > { %781 = vmatpush.bf16.xpose.msra.mxu2 %v772_v31 }
 0x213   : > { %v646_v32 = vpop.permute.xlu2 %645 }
 0x214   : > { %v652_v33 = vsel %vm647_vm8, %v646_v32, 0 }
 0x215   : > { %661 = vmatpush.bf16.xpose.msrb.mxu0 %v652_v33 }
 0x21c   : > { %1575 = vmatmul.msk.bf16.vlgmr.msrb.gmra.mxu0 %vm647_vm8, %v2021_v29 }
 0x225   : > { %v765_v34 = vpop.permute.xlu0 %764 }
 0x226   : > { %1584 = vmatmul.msk.bf16.vlgmr.msra.gmra.mxu2 %vm647_vm8, %v765_v34 }
 0x299   : > { %v663_v36 = vpop.f32.mrf.mxu0 }
 0x29a   : > { %v664_v37 = vadd.f32 %v663_v36, %v642_v35 }
 0x29c   : > { %v668_v38 = vsel %vm647_vm8, %v664_v37, -inf }
 0x29d   : > { %669 = vmax.xlane.f32.xlu1 %v668_v38 }
 0x2a1   : > { %v665_v40 = vpop.f32.mrf.mxu0 }
 0x2a2   : > { %v666_v41 = vadd.f32 %v665_v40, %v643_v39 }
 0x2a4   : > { %v671_v42 = vsel %vm647_vm8, %v666_v41, -inf }
 0x2a5   : > { %672 = vmax.xlane.f32.xlu2 %v671_v42 }
 0x2a9   : > { %v783_v44 = vpop.f32.mrf.mxu2 }
 0x2aa   : > { %v784_v45 = vadd.f32 %v1582_v43, %v783_v44 }
 0x2ac   : > { %v788_v46 = vsel %vm647_vm8, %v784_v45, -inf }
 0x2ad   : > { %789 = vmax.xlane.f32.xlu1 %v788_v46 }
 0x2b1   : > { %v785_v48 = vpop.f32.mrf.mxu2 }
 0x2b2   : > { %v786_v49 = vadd.f32 %v1583_v47, %v785_v48 }
 0x2b4   : > { %v791_v50 = vsel %vm647_vm8, %v786_v49, -inf }
 0x2b5   : > { %792 = vmax.xlane.f32.xlu1 %v791_v50 }
 0x2bd   : > { %838 = vrot.lane.b32.xlu2 %v2019_v28, %s1833_s19  ;;  %s1838_s19 = smov 80  }
 0x2c5   : > { %887 = vrot.lane.b32.xlu2 %v2021_v29, %s1835_s16 }
 0x310   : > { %v670_v51 = vpop.xlane.xlu1 %669 }
 0x311   : > { %v674_v52 = vsub.f32 %v664_v37, %v670_v51 }
 0x313   : > { %v676_v53 = vmul.f32 1.442695, %v674_v52 }
 0x315   : > { %1779 = vpow2.f32 %v676_v53 }
 0x318   : > { %v673_v54 = vpop.xlane.xlu2 %672 }
 0x319   : > { %v675_v60 = vsub.f32 %v666_v41, %v673_v54 }
 0x31b   : > { %v2053_v55 = vpop.eup %1779  ;;  %v678_v62 = vmul.f32 1.442695, %v675_v60 }
 0x31c   : > { %v680_v56 = vsel %vm647_vm8, %v2053_v55, 0.0 }
 0x31d   : > { %681 = vadd.xlane.f32.xlu0 %v680_v56 }
 0x320   : > { %v839_v57 = vpop.permute.xlu2 %838  ;;  %v790_v58 = vpop.xlane.xlu1 %789 }
 0x321   : > { %v794_v59 = vsub.f32 %v784_v45, %v790_v58  ;;  %851 = vmatpush.bf16.msra.mxu0 %v839_v57 }
 0x323   : > { %v796_v61 = vmul.f32 1.442695, %v794_v59 }
 0x325   : > { %1781 = vpow2.f32 %v796_v61 }
 0x326   : > { %1783 = vpow2.f32 %v678_v62 }
 0x328   : > { %v793_v63 = vpop.xlane.xlu1 %792 }
 0x329   : > { %v795_v2 = vsub.f32 %v786_v49, %v793_v63 }
 0x32b   : > { %v2057_v0 = vpop.eup %1781  ;;  %v798_v5 = vmul.f32 1.442695, %v795_v2 }
 0x32c   : > { %v800_v4 = vsel %vm647_vm8, %v2057_v0, 0.0  ;;  %v2061_v6 = vpop.eup %1783 }
 0x32d   : > { %801 = vadd.xlane.f32.xlu1 %v800_v4  ;;  %1785 = vpow2.f32 %v798_v5  ;;  %v683_v7 = vsel %vm647_vm8, %v2061_v6, 0.0 }
 0x331   : > { %1011 = vrot.lane.b32.xlu0 %v2017_v27, %s1836_s17 }
 0x333   : > { %v2066_v8 = vpop.eup %1785 }
 0x334   : > { %v803_v9 = vsel %vm647_vm8, %v2066_v8, 0.0 }
 0x335   : > { %684 = vadd.xlane.f32.xlu1 %v683_v7 }
 0x33d   : > { %804 = vadd.xlane.f32.xlu1 %v803_v9 }
 0x356   : > { %889 = vrot.lane.b32.xlu1 %v2017_v27, %s1837_s18 }
 0x35e   : > { %1009 = vrot.lane.b32.xlu1 %v2021_v29, %s1838_s19 }
 0x390   : > { %v682_v10 = vpop.xlane.xlu0 %681 }
 0x391   : > { %1787 = vrcp.f32 %v682_v10  ;;  %v697_v27 = vand.u32 2147483648, %v682_v10  ;;  %vm691_vm10 = vweird.f32 %v682_v10  ;;  %v695_v29 = vand.u32 2147483647, %v682_v10 }
 0x393   : > { %v698_v37 = vor.u32 1.1754944e-38, %v697_v27  ;;  %vm696_vm13 = vcmp.eq.f32.partialorder %v695_v29, 8.507059e+37  ;;  %v1591_v29 = vld [vmem:[%s2349_s5 + $0x20] sm:$0xff] }
 0x397   : > { %v1788_v14 = vpop.eup %1787 }
 0x398   : > { %v687_v15 = vmul.f32 %v1788_v14, %v682_v10  ;;  %vm692_vm9 = vweird.f32 %v1788_v14 }
 0x399   : > { %vm2079_vm11 = vmor %vm691_vm10, %vm692_vm9 }
 0x39a   : > { %v688_v17 = vsub.f32 1.0, %v687_v15 }
 0x39c   : > { %v689_v21 = vmul.f32 %v1788_v14, %v688_v17  ;;  %v1769_v17 = vld [vmem:[%s2351_s7] ss:$0 sm:$0xff] }
 0x39e   : > { %v690_v24 = vadd.f32 %v1788_v14, %v689_v21 }
 0x3a0   : > { %v802_v13 = vpop.xlane.xlu1 %801  ;;  %v694_v34 = vsel %vm2079_vm11, %v1788_v14, %v690_v24 }
 0x3a1   : > { %1789 = vrcp.f32 %v802_v13  ;;  %v699_v42 = vsel %vm696_vm13, %v698_v37, %v694_v34  ;;  %vm811_vm3 = vweird.f32 %v802_v13  ;;  %v817_v45 = vand.u32 2147483648, %v802_v13  ;;  %v1601_v37 = vld [vmem:[%s2349_s5 + $0x38] sm:$0xff] }
 0x3a2   : > { %v815_v48 = vand.u32 2147483647, %v802_v13  ;;  %v700_v50 = vmul.f32 %v2053_v55, %v699_v42 }
 0x3a3   : > { %v1012_v53 = vpop.permute.xlu0 %1011  ;;  %v818_v59 = vor.u32 1.1754944e-38, %v817_v45 }
 0x3a4   : > { %vm816_vm6 = vcmp.eq.f32.partialorder %v815_v48, 8.507059e+37  ;;  %v1017_v60 = vsel %vm647_vm8, %v1012_v53, 0 }
 0x3a7   : > { %v1790_v16 = vpop.eup %1789 }
 0x3a8   : > { %v685_v18 = vpop.xlane.xlu1 %684  ;;  %v807_v20 = vmul.f32 %v1790_v16, %v802_v13  ;;  %vm812_vm15 = vweird.f32 %v1790_v16 }
 0x3a9   : > { %1791 = vrcp.f32 %v685_v18  ;;  %v712_v33 = vand.u32 2147483648, %v685_v18  ;;  %v710_v36 = vand.u32 2147483647, %v685_v18  ;;  %vm706_vm14 = vweird.f32 %v685_v18  ;;  %vm2085_vm4 = vmor %vm811_vm3, %vm812_vm15 }
 0x3aa   : > { %v808_v23 = vsub.f32 1.0, %v807_v20 }
 0x3ab   : > { %v713_v41 = vor.u32 1.1754944e-38, %v712_v33  ;;  %vm711_vm2 = vcmp.eq.f32.partialorder %v710_v36, 8.507059e+37 }
 0x3ac   : > { %v809_v32 = vmul.f32 %v1790_v16, %v808_v23  ;;  %v638_v23 = vadd.f32 %v1769_v17, %v1934_v3 }
 0x3ae   : > { %v810_v40 = vadd.f32 %v1790_v16, %v809_v32 }
 0x3af   : > { %v1792_v22 = vpop.eup %1791 }
 0x3b0   : > { %v702_v25 = vmul.f32 %v1792_v22, %v685_v18  ;;  %v805_v26 = vpop.xlane.xlu1 %804  ;;  %vm707_vm12 = vweird.f32 %v1792_v22  ;;  %v814_v52 = vsel %vm2085_vm4, %v1790_v16, %v810_v40  ;;  %v637_v18 = vadd.f32 %v1769_v17, %v1930_v1  ;;  %v1600_v1 = vld [vmem:[%s2349_s5 + $0x30] sm:$0xff] }
 0x3b1   : > { %1793 = vrcp.f32 %v805_v26  ;;  %vm708_vm1 = vmor %vm706_vm14, %vm707_vm12  ;;  %v832_v54 = vand.u32 2147483648, %v805_v26  ;;  %v830_v57 = vand.u32 2147483647, %v805_v26  ;;  %vm826_vm7 = vweird.f32 %v805_v26 }
 0x3b2   : > { %v703_v30 = vsub.f32 1.0, %v702_v25  ;;  %v819_v55 = vsel %vm816_vm6, %v818_v59, %v814_v52 }
 0x3b3   : > { %v833_v62 = vor.u32 1.1754944e-38, %v832_v54  ;;  %vm831_vm10 = vcmp.eq.f32.partialorder %v830_v57, 8.507059e+37  ;;  %v820_v4 = vmul.f32 %v2057_v0, %v819_v55  ;;  %v888_v0 = vpop.permute.xlu2 %887 }
 0x3b4   : > { %v704_v35 = vmul.f32 %v1792_v22, %v703_v30 }
 0x3b6   : > { %v705_v38 = vadd.f32 %v1792_v22, %v704_v35  ;;  %v1592_v35 = vld [vmem:[%s2349_s5 + $0x28] sm:$0xff] }
 0x3b7   : > { %v1794_v39 = vpop.eup %1793 }
 0x3b8   : > { %v709_v43 = vsel %vm708_vm1, %v1792_v22, %v705_v38  ;;  %v822_v44 = vmul.f32 %v1794_v39, %v805_v26  ;;  %vm827_vm5 = vweird.f32 %v1794_v39 }
 0x3b9   : > { %v714_v46 = vsel %vm711_vm2, %v713_v41, %v709_v43  ;;  %vm828_vm9 = vmor %vm826_vm7, %vm827_vm5 }
 0x3ba   : > { %v823_v49 = vsub.f32 1.0, %v822_v44  ;;  %v715_v51 = vmul.f32 %v2061_v6, %v714_v46 }
 0x3bc   : > { %v824_v56 = vmul.f32 %v1794_v39, %v823_v49  ;;  %v716_v58 = vpack.c.bf16 %v715_v51, %v700_v50 }
 0x3be   : > { %v825_v61 = vadd.f32 %v1794_v39, %v824_v56  ;;  %1576 = vmatmul.msk.bf16.vlgmr.msrb.gmra.mxu1 %vm647_vm8, %v716_v58 }
 0x3bf   : > { %1026 = vmatpush.bf16.xpose.msrb.mxu1 %v1017_v60 }
 0x3c0   : > { %v829_v63 = vsel %vm828_vm9, %v1794_v39, %v825_v61 }
 0x3c1   : > { %v834_v2 = vsel %vm831_vm10, %v833_v62, %v829_v63 }
 0x3c2   : > { %v835_v5 = vmul.f32 %v2066_v8, %v834_v2 }
 0x3c4   : > { %v836_v6 = vpack.c.bf16 %v835_v5, %v820_v4 }
 0x3c6   : > { %1585 = vmatmul.msk.bf16.vlgmr.msra.gmra.mxu0 %vm647_vm8, %v836_v6 }
 0x3c8   : > { %v890_v7 = vpop.permute.xlu1 %889 }
 0x3c9   : > { %v895_v9 = vsel %vm647_vm8, %v890_v7, 0 }
 0x3ca   : > { %904 = vmatpush.bf16.xpose.msrb.mxu3 %v895_v9 }
 0x3d0   : > { %v1010_v8 = vpop.permute.xlu1 %1009 }
 0x43b   : > { %v729_v10 = vpop.f32.mrf.mxu1 }
 0x443   : > { %v731_v12 = vpop.f32.mrf.mxu1  ;;  %v853_v13 = vpop.f32.mrf.mxu0 }
 0x444   : > { %v734_v14 = vpack.c.bf16 %v731_v12, %v729_v10 }
 0x446   : > { %1581 = vmatmul.msk.bf16.vlgmr.msra.gmra.mxu3 %vm647_vm8, %v734_v14 }
 0x44b   : > { %v855_v15 = vpop.f32.mrf.mxu0 }
 0x44c   : > { %v858_v16 = vpack.c.bf16 %v855_v15, %v853_v13 }
 0x44e   : > { %1590 = vmatmul.msk.bf16.vlgmr.msra.gmra.mxu1 %vm647_vm8, %v858_v16 }
 0x456   : > { %1593 = vmatmul.msk.bf16.vlgmr.msrb.gmra.mxu3 %vm647_vm8, %v888_v0 }
 0x45e   : > { %1602 = vmatmul.msk.bf16.vlgmr.msrb.gmra.mxu1 %vm647_vm8, %v1010_v8 }
 0x4c9   : > { %v753_v19 = vpop.f32.mrf.mxu3 }
 0x4ca   : > { %v758_v20 = vadd.f32 %v753_v19, %v637_v18 }
 0x4cb   : > { %v877_v21 = vpop.f32.mrf.mxu1 }
 0x4cc   : > { %v2107_v22 = vadd.f32 %v877_v21, %v758_v20 }
 0x4d1   : > { %v755_v24 = vpop.f32.mrf.mxu3 }
 0x4d2   : > { %v759_v25 = vadd.f32 %v755_v24, %v638_v23  ;;  %v1730_v23 = vld [vmem:[%s2354_s10 + $0x34] sm:$0xf0] }
 0x4d3   : > { %v879_v26 = vpop.f32.mrf.mxu1 }
 0x4d4   : > { %v2110_v27 = vadd.f32 %v879_v26, %v759_v25  ;;  %v1637_v26 = vld [vmem:[%s2354_s10 + $0x38] sm:$0xf0] }
 0x4d9   : > { %v906_v30 = vpop.f32.mrf.mxu3 }
 0x4da   : > { %v907_v31 = vadd.f32 %v1591_v29, %v906_v30 }
 0x4db   : > { %v1028_v32 = vpop.f32.mrf.mxu1 }
 0x4dc   : > { %v1029_v33 = vadd.f32 %v1600_v1, %v1028_v32  ;;  %v911_v34 = vsel %vm647_vm8, %v907_v31, -inf }
 0x4dd   : > { %912 = vmax.xlane.f32.xlu0 %v911_v34 }
 0x4de   : > { %v1033_v3 = vsel %vm647_vm8, %v1029_v33, -inf }
 0x4df   : > { %1034 = vmax.xlane.f32.xlu2 %v1033_v3 }
 0x4e1   : > { %v908_v36 = vpop.f32.mrf.mxu3 }
 0x4e2   : > { %v909_v38 = vadd.f32 %v1592_v35, %v908_v36 }
 0x4e3   : > { %v1030_v39 = vpop.f32.mrf.mxu1 }
 0x4e4   : > { %v1031_v40 = vadd.f32 %v1601_v37, %v1030_v39  ;;  %v914_v42 = vsel %vm647_vm8, %v909_v38, -inf }
 0x4e6   : > { %v1036_v41 = vsel %vm647_vm8, %v1031_v40, -inf }
 0x4e7   : > { %1037 = vmax.xlane.f32.xlu1 %v1036_v41  ;;  %915 = vmax.xlane.f32.xlu2 %v914_v42 }
 0x550   : > { %v913_v43 = vpop.xlane.xlu0 %912 }
 0x551   : > { %v917_v44 = vsub.f32 %v907_v31, %v913_v43 }
 0x552   : > { %v1035_v45 = vpop.xlane.xlu2 %1034 }
 0x553   : > { %v919_v46 = vmul.f32 1.442695, %v917_v44  ;;  %v1039_v47 = vsub.f32 %v1029_v33, %v1035_v45 }
 0x555   : > { %1795 = vpow2.f32 %v919_v46  ;;  %v1041_v48 = vmul.f32 1.442695, %v1039_v47 }
 0x557   : > { %1797 = vpow2.f32 %v1041_v48 }
 0x55a   : > { %v1038_v49 = vpop.xlane.xlu1 %1037  ;;  %v916_v50 = vpop.xlane.xlu2 %915 }
 0x55b   : > { %v2128_v51 = vpop.eup %1795  ;;  %v1040_v52 = vsub.f32 %v1031_v40, %v1038_v49  ;;  %v918_v53 = vsub.f32 %v909_v38, %v916_v50 }
 0x55c   : > { %v923_v54 = vsel %vm647_vm8, %v2128_v51, 0.0 }
 0x55d   : > { %v2132_v56 = vpop.eup %1797  ;;  %v1043_v57 = vmul.f32 1.442695, %v1040_v52  ;;  %v921_v58 = vmul.f32 1.442695, %v918_v53  ;;  %924 = vadd.xlane.f32.xlu0 %v923_v54 }
 0x55e   : > { %v1045_v59 = vsel %vm647_vm8, %v2132_v56, 0.0 }
 0x55f   : > { %1799 = vpow2.f32 %v1043_v57  ;;  %1046 = vadd.xlane.f32.xlu2 %v1045_v59 }
 0x560   : > { %1801 = vpow2.f32 %v921_v58 }
 0x565   : > { %v2136_v60 = vpop.eup %1799 }
 0x566   : > { %v2138_v61 = vpop.eup %1801  ;;  %v1048_v55 = vsel %vm647_vm8, %v2136_v60, 0.0 }
 0x567   : > { %1049 = vadd.xlane.f32.xlu1 %v1048_v55  ;;  %v926_v62 = vsel %vm647_vm8, %v2138_v61, 0.0 }
 0x568   : > { %927 = vadd.xlane.f32.xlu2 %v926_v62 }
 0x571   : > { %960 = vrot.lane.b32.xlu0 %v2019_v28, %s1835_s16  ;;  %s467_s16 = scalar_lea.vmem %s2358_s14, %s1709_s15 }
 0x580   : > { %1082 = vrot.lane.b32.xlu1 %v2019_v28, %s1838_s19 }
 0x5d0   : > { %v925_v63 = vpop.xlane.xlu0 %924 }
 0x5d1   : > { %1803 = vrcp.f32 %v925_v63  ;;  %v938_v15 = vand.u32 2147483647, %v925_v63  ;;  %v940_v16 = vand.u32 2147483648, %v925_v63  ;;  %vm934_vm12 = vweird.f32 %v925_v63 }
 0x5d2   : > { %v2148_v2 = vpop.xlane.xlu2 %1046 }
 0x5d3   : > { %1805 = vrcp.f32 %v2148_v2  ;;  %vm2156_vm13 = vcmp.eq.f32.partialorder %v938_v15, 8.507059e+37  ;;  %v941_v24 = vor.u32 1.1754944e-38, %v940_v16  ;;  %vm1056_vm4 = vweird.f32 %v2148_v2 }
 0x5d4   : > { %v1062_v36 = vand.u32 2147483648, %v2148_v2  ;;  %v1060_v39 = vand.u32 2147483647, %v2148_v2 }
 0x5d6   : > { %v1063_v47 = vor.u32 1.1754944e-38, %v1062_v36  ;;  %v1725_v36 = vld [vmem:[%s2354_s10 + $0x14] sm:$0xf] }
 0x5d7   : > { %v1804_v4 = vpop.eup %1803 }
 0x5d8   : > { %v930_v5 = vmul.f32 %v1804_v4, %v925_v63  ;;  %vm935_vm11 = vweird.f32 %v1804_v4 }
 0x5d9   : > { %v2151_v6 = vpop.eup %1805  ;;  %vm2161_vm15 = vmor %vm934_vm12, %vm935_vm11  ;;  %vm1061_vm12 = vcmp.eq.f32.partialorder %v1060_v39, 8.507059e+37  ;;  %v1621_v39 = vld [vmem:[%s2354_s10 + $0x18] sm:$0xf0] }
 0x5da   : > { %v1050_v7 = vpop.xlane.xlu1 %1049  ;;  %v931_v9 = vsub.f32 1.0, %v930_v5  ;;  %v1052_v12 = vmul.f32 %v2151_v6, %v2148_v2  ;;  %vm1057_vm14 = vweird.f32 %v2151_v6 }
 0x5db   : > { %1807 = vrcp.f32 %v1050_v7  ;;  %v928_v10 = vpop.xlane.xlu2 %927  ;;  %v1077_v30 = vand.u32 2147483648, %v1050_v7  ;;  %vm1071_vm3 = vweird.f32 %v1050_v7  ;;  %v1075_v35 = vand.u32 2147483647, %v1050_v7  ;;  %vm1058_vm9 = vmor %vm1056_vm4, %vm1057_vm14 }
 0x5dc   : > { %1809 = vrcp.f32 %v928_v10  ;;  %v932_v13 = vmul.f32 %v1804_v4, %v931_v9  ;;  %v1053_v28 = vsub.f32 1.0, %v1052_v12  ;;  %v955_v1 = vand.u32 2147483648, %v928_v10 }
 0x5dd   : > { %v953_v33 = vand.u32 2147483647, %v928_v10  ;;  %vm949_vm6 = vweird.f32 %v928_v10  ;;  %v1078_v43 = vor.u32 1.1754944e-38, %v1077_v30  ;;  %vm1076_vm11 = vcmp.eq.f32.partialorder %v1075_v35, 8.507059e+37  ;;  %v1627_v30 = vld [vmem:[%s2354_s10 + $0x20] sm:$0xf] }
 0x5de   : > { %v933_v17 = vadd.f32 %v1804_v4, %v932_v13  ;;  %v1054_v20 = vmul.f32 %v2151_v6, %v1053_v28  ;;  %v956_v41 = vor.u32 1.1754944e-38, %v955_v1  ;;  %v1728_v1 = vld [vmem:[%s2354_s10 + $0x24] sm:$0xf0]  ;;  %v1726_v35 = vld [vmem:[%s2354_s10 + $0x14] sm:$0xf0] }
 0x5df   : > { %vm954_vm10 = vcmp.eq.f32.partialorder %v953_v33, 8.507059e+37  ;;  %v1629_v33 = vld [vmem:[%s2354_s10 + $0x28] sm:$0xf0] }
 0x5e0   : > { %v937_v31 = vsel %vm2161_vm15, %v1804_v4, %v933_v17  ;;  %v1055_v34 = vadd.f32 %v2151_v6, %v1054_v20 }
 0x5e1   : > { %v1808_v14 = vpop.eup %1807  ;;  %v942_v42 = vsel %vm2156_vm13, %v941_v24, %v937_v31  ;;  %v1729_v24 = vld [vmem:[%s2354_s10 + $0x34] sm:$0xf]  ;;  %v1727_v31 = vld [vmem:[%s2354_s10 + $0x24] sm:$0xf] }
 0x5e2   : > { %v1810_v0 = vpop.eup %1809  ;;  %v1067_v8 = vmul.f32 %v1808_v14, %v1050_v7  ;;  %vm1072_vm1 = vweird.f32 %v1808_v14  ;;  %v1059_v45 = vsel %vm1058_vm9, %v2151_v6, %v1055_v34  ;;  %v943_v49 = vmul.f32 %v2128_v51, %v942_v42  ;;  %v1721_v51 = vld [vmem:[%s2350_s6 + $0x10] sm:$0xff] }
 0x5e3   : > { %v945_v18 = vmul.f32 %v1810_v0, %v928_v10  ;;  %v961_v19 = vpop.permute.xlu0 %960  ;;  %vm950_vm2 = vweird.f32 %v1810_v0  ;;  %vm2170_vm5 = vmor %vm1071_vm3, %vm1072_vm1  ;;  %v1064_v52 = vsel %vm1061_vm12, %v1063_v47, %v1059_v45  ;;  %997 = vmatpush.bf16.msrb.mxu0 %v1721_v51  ;;  %v1632_v34 = vor.u32 %v1727_v31, %v1629_v33  ;;  %v1613_v47 = vld [vmem:[%s2354_s10 + $0x8] sm:$0xf0]  ;;  %v1731_v31 = vld [vmem:[%s2356_s12] sm:$0xff] }
 0x5e4   : > { %v1068_v21 = vsub.f32 1.0, %v1067_v8  ;;  %973 = vmatpush.bf16.msrb.mxu2 %v961_v19  ;;  %vm951_vm7 = vmor %vm949_vm6, %vm950_vm2  ;;  %v1065_v57 = vmul.f32 %v2132_v56, %v1064_v52 }
 0x5e5   : > { %v946_v25 = vsub.f32 1.0, %v945_v18 }
 0x5e6   : > { %v1069_v29 = vmul.f32 %v1808_v14, %v1068_v21  ;;  %v1635_v21 = vld [vmem:[%s2354_s10 + $0x30] sm:$0xf] }
 0x5e7   : > { %v947_v32 = vmul.f32 %v1810_v0, %v946_v25  ;;  %v1636_v25 = vor.u32 %v1730_v23, %v1635_v21  ;;  %v1742_v21 = vld [vmem:[%s2356_s12 + $0x58] sm:$0xff]  ;;  %v1733_v23 = vld [vmem:[%s2356_s12 + $0x10] sm:$0xff] }
 0x5e8   : > { %v1070_v3 = vadd.f32 %v1808_v14, %v1069_v29  ;;  %v1640_v29 = vor.u32 %v1729_v24, %v1637_v26  ;;  %v1741_v24 = vld [vmem:[%s2356_s12 + $0x50] sm:$0xff]  ;;  %v1740_v26 = vld [vmem:[%s2356_s12 + $0x48] sm:$0xff] }
 0x5e9   : > { %v948_v38 = vadd.f32 %v1810_v0, %v947_v32  ;;  %1246 = vmatpush.bf16.msra.mxu0 %v1636_v25  ;;  %v1628_v32 = vor.u32 %v1728_v1, %v1627_v30  ;;  %v1732_v25 = vld [vmem:[%s2356_s12 + $0x8] sm:$0xff] }
 0x5ea   : > { %v1074_v40 = vsel %vm2170_vm5, %v1808_v14, %v1070_v3  ;;  %1260 = vmatpush.bf16.msra.mxu1 %v1640_v29  ;;  %v1619_v3 = vld [vmem:[%s2354_s10 + $0x10] sm:$0xf]  ;;  %v1193_v29 = vld [vmem:[%s2355_s11] sm:$0x3] }
 0x5eb   : > { %v952_v44 = vsel %vm951_vm7, %v1810_v0, %v948_v38  ;;  %v1079_v48 = vsel %vm1076_vm11, %v1078_v43, %v1074_v40  ;;  %v1620_v38 = vor.u32 %v1726_v35, %v1619_v3  ;;  %v1611_v43 = vld [vmem:[%s2354_s10] sm:$0xf]  ;;  %v1195_v30 = vperm.slane %v1193_v29, 0 }
 0x5ec   : > { %v957_v46 = vsel %vm954_vm10, %v956_v41, %v952_v44  ;;  %v1080_v54 = vmul.f32 %v2136_v60, %v1079_v48  ;;  %v1624_v41 = vor.u32 %v1725_v36, %v1621_v39  ;;  %v1724_v44 = vld [vmem:[%s2354_s10 + $0x4] sm:$0xf0]  ;;  %v1196_v1 = vperm.slane %v1193_v29, 1 }
 0x5ed   : > { %v958_v50 = vmul.f32 %v2138_v61, %v957_v46  ;;  %v1722_v61 = vld [vmem:[%s2350_s6 + $0x18] sm:$0xff]  ;;  %1247 = vmatpush.bf16.msra.mxu0 %v1628_v32  ;;  %v1612_v45 = vor.u32 %v1724_v44, %v1611_v43  ;;  %v1723_v46 = vld [vmem:[%s2354_s10 + $0x4] sm:$0xf] }
 0x5ee   : > { %v1081_v59 = vpack.c.bf16 %v1080_v54, %v1065_v57  ;;  %1119 = vmatpush.bf16.msra.mxu2 %v1722_v61  ;;  %1261 = vmatpush.bf16.msra.mxu1 %v1632_v34  ;;  %v1616_v48 = vor.u32 %v1723_v46, %v1613_v47  ;;  %v1739_v32 = vld [vmem:[%s2356_s12 + $0x40] sm:$0xff] }
 0x5ef   : > { %v959_v53 = vpack.c.bf16 %v958_v50, %v943_v49 }
 0x5f1   : > { %1594 = vmatmul.msk.bf16.vlgmr.msrb.gmra.mxu2 %vm647_vm8, %v959_v53  ;;  %1248 = vmatpush.bf16.msra.mxu0 %v1620_v38 }
 0x5f2   : > { %v1083_v58 = vpop.permute.xlu1 %1082  ;;  %1262 = vmatpush.bf16.msra.mxu1 %v1624_v41 }
 0x5f3   : > { %1095 = vmatpush.bf16.msra.mxu3 %v1083_v58 }
 0x5f5   : > { %1249 = vmatpush.bf16.msra.mxu0 %v1612_v45 }
 0x5f6   : > { %1603 = vmatmul.msk.bf16.vlgmr.msra.gmra.mxu3 %vm647_vm8, %v1081_v59  ;;  %1263 = vmatpush.bf16.msra.mxu1 %v1616_v48 }
 0x674   : > { %v975_v60 = vpop.f32.mrf.mxu2 }
 0x679   : > { %v1097_v55 = vpop.f32.mrf.mxu3 }
 0x67c   : > { %v977_v62 = vpop.f32.mrf.mxu2 }
 0x67d   : > { %v980_v63 = vpack.c.bf16 %v977_v62, %v975_v60 }
 0x67f   : > { %1599 = vmatmul.msk.bf16.vlgmr.msrb.gmra.mxu0 %vm647_vm8, %v980_v63 }
 0x681   : > { %v1099_v56 = vpop.f32.mrf.mxu3 }
 0x682   : > { %v1102_v2 = vpack.c.bf16 %v1099_v56, %v1097_v55 }
 0x684   : > { %1608 = vmatmul.msk.bf16.vlgmr.msra.gmra.mxu2 %vm647_vm8, %v1102_v2 }
 0x6fc   : > { %v999_v4 = vpop.f32.mrf.mxu0 }
 0x6fd   : > { %v1004_v5 = vadd.f32 %v999_v4, %v2107_v22 }
 0x704   : > { %v1001_v10 = vpop.f32.mrf.mxu0 }
 0x705   : > { %v1005_v12 = vadd.f32 %v1001_v10, %v2110_v27 }
 0x707   : > { %v1121_v6 = vpop.f32.mrf.mxu2 }
 0x708   : > { %v2197_v7 = vadd.f32 %v1121_v6, %v1004_v5  ;;  %v1771_v6 = vld [vmem:[%s2353_s9] ss:$0 sm:$0xff] }
 0x70a   : > { %v1130_v9 = vsel %vm475_vm0, %v2197_v7, 0.0 }
 0x70b   : > { %1131 = vadd.xlane.f32.xlu2 %v1130_v9 }
 0x70f   : > { %v1123_v13 = vpop.f32.mrf.mxu2 }
 0x710   : > { %v2202_v28 = vadd.f32 %v1123_v13, %v1005_v12 }
 0x712   : > { %v1133_v14 = vsel %vm475_vm0, %v2202_v28, 0.0 }
 0x713   : > { %1134 = vadd.xlane.f32.xlu2 %v1133_v14 }
 0x77e   : > { %v1132_v15 = vpop.xlane.xlu2 %1131 }
 0x77f   : > { %v1136_v22 = vmul.f32 %v1132_v15, %v1938_v11 }
 0x781   : > { %v2208_v16 = vsub.f32 %v2197_v7, %v1136_v22  ;;  %v1738_v22 = vld [vmem:[%s2356_s12 + $0x38] sm:$0xff] }
 0x782   : > { %1436 = vmatpush.bf16.msrb.mxu3 %v1738_v22 }
 0x783   : > { %v1140_v0 = vmul.f32 %v2208_v16, %v2208_v16 }
 0x785   : > { %v1142_v8 = vsel %vm475_vm0, %v1140_v0, 0.0  ;;  %v1737_v0 = vld [vmem:[%s2356_s12 + $0x30] sm:$0xff] }
 0x786   : > { %1143 = vadd.xlane.f32.xlu0 %v1142_v8  ;;  %v1135_v27 = vpop.xlane.xlu2 %1134  ;;  %v1745_v8 = vld [vmem:[%s2356_s12 + $0x70] sm:$0xff]  ;;  %1437 = vmatpush.bf16.msrb.mxu3 %v1737_v0 }
 0x787   : > { %v1137_v17 = vmul.f32 %v1135_v27, %v1938_v11  ;;  %v1736_v27 = vld [vmem:[%s2356_s12 + $0x28] sm:$0xff] }
 0x789   : > { %v2215_v18 = vsub.f32 %v2202_v28, %v1137_v17  ;;  %v1744_v17 = vld [vmem:[%s2356_s12 + $0x68] sm:$0xff] }
 0x78a   : > { %1438 = vmatpush.bf16.msrb.mxu3 %v1736_v27 }
 0x78b   : > { %v1141_v19 = vmul.f32 %v2215_v18, %v2215_v18 }
 0x78d   : > { %v1145_v20 = vsel %vm475_vm0, %v1141_v19, 0.0  ;;  %v1743_v19 = vld [vmem:[%s2356_s12 + $0x60] sm:$0xff] }
 0x78e   : > { %1146 = vadd.xlane.f32.xlu2 %v1145_v20  ;;  %v1734_v20 = vld [vmem:[%s2356_s12 + $0x18] sm:$0xff] }
 0x7f9   : > { %v1144_v37 = vpop.xlane.xlu0 %1143 }
 0x7fa   : > { %v1148_v40 = vmul.f32 %v1144_v37, %v1938_v11 }
 0x7fc   : > { %v1150_v42 = vadd.f32 1e-05, %v1148_v40 }
 0x7fe   : > { %1811 = vrsqrt.f32 %v1150_v42  ;;  %vm1158_vm13 = vweird.f32 %v1150_v42 }
 0x801   : > { %v1147_v49 = vpop.xlane.xlu2 %1146 }
 0x802   : > { %v1149_v50 = vmul.f32 %v1147_v49, %v1938_v11  ;;  %v1770_v11 = vld [vmem:[%s2352_s8] ss:$0 sm:$0xff] }
 0x804   : > { %v1812_v52 = vpop.eup %1811  ;;  %v1151_v53 = vadd.f32 1e-05, %v1149_v50 }
 0x805   : > { %v1153_v54 = vmul.f32 %v1812_v52, %v1150_v42  ;;  %vm1159_vm8 = vweird.f32 %v1812_v52 }
 0x806   : > { %1813 = vrsqrt.f32 %v1151_v53  ;;  %vm1160_vm14 = vmor %vm1158_vm13, %vm1159_vm8  ;;  %vm1168_vm1 = vweird.f32 %v1151_v53 }
 0x807   : > { %v1154_v57 = vmul.f32 %v1812_v52, %v1153_v54 }
 0x809   : > { %v1155_v58 = vmul.f32 0.5, %v1154_v57 }
 0x80b   : > { %v1156_v59 = vsub.f32 1.5, %v1155_v58 }
 0x80c   : > { %v1814_v51 = vpop.eup %1813 }
 0x80d   : > { %v1157_v61 = vmul.f32 %v1812_v52, %v1156_v59  ;;  %v1163_v60 = vmul.f32 %v1814_v51, %v1151_v53  ;;  %vm1169_vm15 = vweird.f32 %v1814_v51 }
 0x80e   : > { %vm1170_vm2 = vmor %vm1168_vm1, %vm1169_vm15 }
 0x80f   : > { %v1164_v55 = vmul.f32 %v1814_v51, %v1163_v60  ;;  %v1161_v62 = vsel %vm1160_vm14, %v1812_v52, %v1157_v61 }
 0x810   : > { %v1172_v2 = vmul.f32 %v1161_v62, %v2208_v16  ;;  %v1746_v16 = vld [vmem:[%s2356_s12 + $0x78] sm:$0xff] }
 0x811   : > { %v1165_v63 = vmul.f32 0.5, %v1164_v55  ;;  %1450 = vmatpush.bf16.msrb.mxu2 %v1746_v16 }
 0x812   : > { %v1177_v9 = vmul.f32 %v1770_v11, %v1172_v2 }
 0x813   : > { %v1166_v56 = vsub.f32 1.5, %v1165_v63 }
 0x814   : > { %v1182_v13 = vadd.f32 %v1771_v6, %v1177_v9 }
 0x815   : > { %v1167_v4 = vmul.f32 %v1814_v51, %v1166_v56  ;;  %1451 = vmatpush.bf16.msrb.mxu2 %v1745_v8 }
 0x817   : > { %v1171_v5 = vsel %vm1170_vm2, %v1814_v51, %v1167_v4 }
 0x818   : > { %v1173_v10 = vmul.f32 %v1171_v5, %v2215_v18  ;;  %v1735_v18 = vld [vmem:[%s2356_s12 + $0x20] sm:$0xff] }
 0x819   : > { %1452 = vmatpush.bf16.msrb.mxu2 %v1744_v17  ;;  %1439 = vmatpush.bf16.msrb.mxu3 %v1735_v18  ;;  %v1772_v18 = vld [vmem:[%s2357_s13] ss:$0 sm:$0xff] }
 0x81a   : > { %v1178_v12 = vmul.f32 %v1770_v11, %v1173_v10 }
 0x81c   : > { %v1183_v14 = vadd.f32 %v1771_v6, %v1178_v12 }
 0x81d   : > { %1453 = vmatpush.bf16.msrb.mxu2 %v1743_v19  ;;  %1440 = vmatpush.bf16.msrb.mxu3 %v1734_v20 }
 0x81e   : > { %v1184_v15 = vpack.c.bf16 %v1183_v14, %v1182_v13 }
 0x820   : > { %1641 = vmatmul.msk.bf16.vlgmr.msra.gmra.mxu0 %vm475_vm0, %v1184_v15  ;;  %1642 = vmatmul.msk.bf16.vlgmr.msra.gmra.mxu1 %vm475_vm0, %v1184_v15  ;;  %vm1474_vm0 = vcmask 519168  }
 0x821   : > { %1454 = vmatpush.bf16.msrb.mxu2 %v1742_v21  ;;  %1441 = vmatpush.bf16.msrb.mxu3 %v1733_v23 }
 0x825   : > { %1455 = vmatpush.bf16.msrb.mxu2 %v1741_v24  ;;  %1442 = vmatpush.bf16.msrb.mxu3 %v1732_v25 }
 0x829   : > { %1456 = vmatpush.bf16.msrb.mxu2 %v1740_v26  ;;  %1443 = vmatpush.bf16.msrb.mxu3 %v1731_v31 }
 0x82d   : > { %1457 = vmatpush.bf16.msrb.mxu2 %v1739_v32 }
 0x89d   : > { %v1251_v33 = vpop.f32.mrf.mxu0  ;;  %v1265_v34 = vpop.f32.mrf.mxu1 }
 0x89e   : > { %v1252_v3 = vadd.f32 %v1251_v33, %v1195_v30  ;;  %v1266_v35 = vadd.f32 %v1265_v34, %v1196_v1 }
 0x8a0   : > { %v1274_v36 = vmul.f32 0.044715, %v1252_v3  ;;  %v1275_v37 = vmul.f32 0.044715, %v1266_v35  ;;  %v1270_v4 = vmul.f32 0.5, %v1252_v3  ;;  %v1271_v9 = vmul.f32 0.5, %v1266_v35 }
 0x8a2   : > { %v1278_v38 = vmul.f32 %v1274_v36, %v1252_v3  ;;  %v1279_v39 = vmul.f32 %v1275_v37, %v1266_v35 }
 0x8a4   : > { %v1282_v40 = vmul.f32 %v1278_v38, %v1252_v3  ;;  %v1283_v41 = vmul.f32 %v1279_v39, %v1266_v35 }
 0x8a5   : > { %v1253_v42 = vpop.f32.mrf.mxu0  ;;  %v1267_v43 = vpop.f32.mrf.mxu1 }
 0x8a6   : > { %v1286_v44 = vadd.f32 %v1282_v40, %v1252_v3  ;;  %v1254_v45 = vadd.f32 %v1253_v42, %v1195_v30  ;;  %v1268_v46 = vadd.f32 %v1267_v43, %v1196_v1  ;;  %v1287_v47 = vadd.f32 %v1283_v41, %v1266_v35 }
 0x8a8   : > { %v1276_v48 = vmul.f32 0.044715, %v1254_v45  ;;  %v1277_v49 = vmul.f32 0.044715, %v1268_v46  ;;  %v1290_v50 = vmul.f32 0.7978846, %v1286_v44 }
 0x8a9   : > { %v1291_v53 = vmul.f32 0.7978846, %v1287_v47  ;;  %v1272_v5 = vmul.f32 0.5, %v1254_v45  ;;  %v1273_v10 = vmul.f32 0.5, %v1268_v46 }
 0x8aa   : > { %v1280_v52 = vmul.f32 %v1276_v48, %v1254_v45  ;;  %v1281_v54 = vmul.f32 %v1277_v49, %v1268_v46  ;;  %1815 = vtanh.f32 %v1290_v50 }
 0x8ab   : > { %1817 = vtanh.f32 %v1291_v53 }
 0x8ac   : > { %v1284_v57 = vmul.f32 %v1280_v52, %v1254_v45  ;;  %v1285_v58 = vmul.f32 %v1281_v54, %v1268_v46 }
 0x8ae   : > { %v1288_v59 = vadd.f32 %v1284_v57, %v1254_v45  ;;  %v1289_v51 = vadd.f32 %v1285_v58, %v1268_v46 }
 0x8b0   : > { %v1292_v61 = vmul.f32 0.7978846, %v1288_v59  ;;  %v1293_v60 = vmul.f32 0.7978846, %v1289_v51  ;;  %v1816_v55 = vpop.eup %1815 }
 0x8b1   : > { %v1818_v62 = vpop.eup %1817  ;;  %v1298_v63 = vadd.f32 1.0, %v1816_v55 }
 0x8b2   : > { %1819 = vtanh.f32 %v1292_v61  ;;  %v1299_v11 = vadd.f32 1.0, %v1818_v62 }
 0x8b3   : > { %1821 = vtanh.f32 %v1293_v60  ;;  %v1302_v13 = vmul.f32 %v1298_v63, %v1270_v4 }
 0x8b4   : > { %v1303_v15 = vmul.f32 %v1299_v11, %v1271_v9 }
 0x8b8   : > { %v1820_v56 = vpop.eup %1819 }
 0x8b9   : > { %v1822_v2 = vpop.eup %1821  ;;  %v1300_v6 = vadd.f32 1.0, %v1820_v56 }
 0x8ba   : > { %v1301_v12 = vadd.f32 1.0, %v1822_v2 }
 0x8bb   : > { %v1304_v14 = vmul.f32 %v1300_v6, %v1272_v5 }
 0x8bc   : > { %v1305_v22 = vmul.f32 %v1301_v12, %v1273_v10 }
 0x8bd   : > { %v1306_v16 = vpack.c.bf16 %v1304_v14, %v1302_v13 }
 0x8be   : > { %v1307_v0 = vpack.c.bf16 %v1305_v22, %v1303_v15 }
 0x8bf   : > { %1444 = vmatmul.bf16.vlgmr.msrb.gmra.mxu3 %v1306_v16 }
 0x8c0   : > { %1458 = vmatmul.bf16.vlgmr.msrb.gmra.mxu2 %v1307_v0 }
 0x942   : > { %v1445_v8 = vpop.f32.mrf.mxu3 }
 0x943   : > { %v1459_v27 = vpop.f32.mrf.mxu2 }
 0x944   : > { %v1460_v17 = vadd.f32 %v1459_v27, %v1445_v8 }
 0x946   : > { %v1464_v19 = vadd.f32 %v1460_v17, %v2197_v7 }
 0x948   : > { %v1470_v20 = vadd.f32 %v1772_v18, %v1464_v19 }
 0x94a   : > { %v1472_v21 = vpack.c.bf16 %v1470_v20, %v1470_v20  ;;  %v1447_v23 = vpop.f32.mrf.mxu3 }
 0x94b   : > { %v1461_v24 = vpop.f32.mrf.mxu2 }
 0x94c   : > { %1475 = vst.msk [vmem:[%s467_s16] sm:$0xf] %vm1474_vm0, %v1472_v21  ;;  %v1462_v25 = vadd.f32 %v1461_v24, %v1447_v23 }
 0x94e   : > { %v1465_v26 = vadd.f32 %v1462_v25, %v2202_v28 }
 0x950   : > { %v1471_v29 = vadd.f32 %v1772_v18, %v1465_v26 }
 0x952   : > { %v1473_v30 = vpack.c.bf16 %v1471_v29, %v1471_v29 }
 0x954   : > { %1476 = vst.msk [vmem:[%s467_s16 + $0x4] sm:$0xf] %vm1474_vm0, %v1473_v30 }
 0x955 PF: > { %s24_s29 = sadd.s32 1, %s1829_s29  }
 0x956   : > { %p21_p4 = scmp.ge.s32.totalorder %s24_s29, 4  }
 0x958   :  { %23 = sbr.rel (!%p21_p4) target bundleno = 1 (0x1), region = 109 }

</bundles_post_ra>
